<compile_context>
chip_gen: v7x
topology: tpu7x:2x2x1
jax: 0.10.0
libtpu: 0.0.40
codegen_flags: <defaults>
</compile_context>

<pallas_src>
import jax
import jax.numpy as jnp
from jax.experimental import pallas as pl
from jax.experimental.pallas import tpu as pltpu

LANE = 128
SUBLANE = 8


def recompute_on_backward_forward(x_nchw, w1, b1, w2, b2):
    """Forward pass of make_recompute_on_backward([conv3x3, ReLU, conv3x3]).

    x_nchw: (N, Cin, H, W) float32   (PyTorch layout)
    w1:     (3, 3, Cin, Cmid)        (HWIO)
    b1:     (Cmid,)
    w2:     (3, 3, Cmid, Cout)       (HWIO)
    b2:     (Cout,)
    returns (N, Cout, H, W) float32
    """
    N, Cin, H, W = x_nchw.shape
    Cmid = w1.shape[3]
    Cout = w2.shape[3]
    # Lane-dense channel padding.  NOTE(v6e/v7x): at real revnet sizes prefer
    # Cp = 256 so each MXU push fills the 2x256x256 array (only matters once
    # the kernel is MXU-bound); also set vmem_limit_bytes explicitly and
    # re-derive tile sizes against v7x's 64 MiB physical VMEM.
    Cp = max(LANE, pl.cdiv(max(Cin, Cmid, Cout), LANE) * LANE)
    Wp = pl.cdiv(W + 2, SUBLANE) * SUBLANE      # sublane-aligned padded width
    RT = 8                                      # image rows per inner tile
    while H % RT:
        RT -= 1
    n_row_tiles = H // RT

    def kernel(x_ref, w1_ref, b1_ref, w2_ref, b2_ref, out_ref, pad_a, pad_b):
        # x_ref   : (H, W, Cp)    bf16  (batch dim squeezed by BlockSpec)
        # w*_ref  : (9, Cp, Cp)   bf16  per-tap weights, resident across grid
        # b*_ref  : (1, Cp)       f32
        # out_ref : (H, W, Cp)    bf16
        # pad_a/b : (H+2, Wp, Cp) bf16  persistent VMEM, 1-px zero halo

        def zero_halo(buf):
            # Zero only the halo strips: the interior is fully overwritten
            # every grid step and columns >= W+2 are never read.  Done every
            # step (not under program_id==0) so the kernel is correct when the
            # parallel batch axis is split across TensorCores (v7x megacore).
            zrow = jnp.zeros((1, Wp, Cp), buf.dtype)
            buf[pl.ds(0, 1), :, :] = zrow
            buf[pl.ds(H + 1, 1), :, :] = zrow
            zcol = jnp.zeros((H, 1, Cp), buf.dtype)
            buf[pl.ds(1, H), pl.ds(0, 1), :] = zcol
            buf[pl.ds(1, H), pl.ds(W + 1, 1), :] = zcol

        zero_halo(pad_a)
        zero_halo(pad_b)

        # Interior copy x -> pad_a, row-tiled to bound live vregs.
        @pl.loop(0, n_row_tiles)
        def _(i):
            r0 = pl.multiple_of(i * RT, RT)
            pad_a[pl.ds(1 + r0, RT), pl.ds(1, W), :] = x_ref[pl.ds(r0, RT), :, :]

        def conv3x3(src, w_ref, b_ref, relu, store):
            # 3x3 SAME conv as 9 per-tap MXU matmuls accumulated in f32, with
            # the bias/ReLU/cast/store epilogue fused per RT-row chunk.
            @pl.loop(0, n_row_tiles)
            def _(i):
                r0 = pl.multiple_of(i * RT, RT)
                acc = jnp.zeros((RT * W, Cp), jnp.float32)
                for dy in range(3):
                    for dx in range(3):
                        tap = src[pl.ds(r0 + dy, RT), pl.ds(dx, W), :]
                        acc = acc + jnp.dot(
                            tap.reshape(RT * W, Cp), w_ref[dy * 3 + dx],
                            preferred_element_type=jnp.float32)
                acc = acc + b_ref[...]
                if relu:
                    acc = jnp.maximum(acc, 0.0)
                store(r0, acc)

        # conv1 + bias + ReLU -> pad_b interior (bf16 feeds conv2's MXU).
        def store_mid(r0, v):
            pad_b[pl.ds(1 + r0, RT), pl.ds(1, W), :] = (
                v.reshape(RT, W, Cp).astype(pad_b.dtype))

        conv3x3(pad_a, w1_ref, b1_ref, True, store_mid)

        # conv2 + bias -> bf16 output block (halves HBM writeback).
        def store_out(r0, v):
            out_ref[pl.ds(r0, RT), :, :] = (
                v.reshape(RT, W, Cp).astype(out_ref.dtype))

        conv3x3(pad_b, w2_ref, b2_ref, False, store_out)

    # ---- wrapper-side glue (single fused XLA op each) ----
    # NCHW -> NHWC, cast bf16, zero-pad channels to the lane width.  Padded
    # bias entries are zero and ReLU(0)=0, so padded channels stay exactly
    # zero through conv1 and contribute nothing to conv2 (math unchanged).
    x = jnp.pad(jnp.transpose(x_nchw, (0, 2, 3, 1)).astype(jnp.bfloat16),
                ((0, 0), (0, 0), (0, 0), (0, Cp - Cin)))

    def prep_w(w, cin, cout):
        wp = jnp.pad(w.astype(jnp.bfloat16),
                     ((0, 0), (0, 0), (0, Cp - cin), (0, Cp - cout)))
        # (3,3,Cp,Cp) -> (9,Cp,Cp); tap index t = dy*3+dx matches the kernel.
        return wp.reshape(9, Cp, Cp)

    w1p = prep_w(w1, Cin, Cmid)
    w2p = prep_w(w2, Cmid, Cout)
    b1p = jnp.pad(b1.astype(jnp.float32), (0, Cp - Cmid)).reshape(1, Cp)
    b2p = jnp.pad(b2.astype(jnp.float32), (0, Cp - Cout)).reshape(1, Cp)

    out_nhwc = pl.pallas_call(
        kernel,
        out_shape=jax.ShapeDtypeStruct((N, H, W, Cp), jnp.bfloat16),
        grid_spec=pltpu.PrefetchScalarGridSpec(
            num_scalar_prefetch=0,
            grid=(N,),
            in_specs=[
                pl.BlockSpec((None, H, W, Cp), lambda n: (n, 0, 0, 0)),
                pl.BlockSpec((9, Cp, Cp), lambda n: (0, 0, 0)),   # resident
                pl.BlockSpec((1, Cp), lambda n: (0, 0)),
                pl.BlockSpec((9, Cp, Cp), lambda n: (0, 0, 0)),   # resident
                pl.BlockSpec((1, Cp), lambda n: (0, 0)),
            ],
            out_specs=pl.BlockSpec((None, H, W, Cp), lambda n: (n, 0, 0, 0)),
            scratch_shapes=[
                pltpu.VMEM((H + 2, Wp, Cp), jnp.bfloat16),   # padded conv1 in
                pltpu.VMEM((H + 2, Wp, Cp), jnp.bfloat16),   # padded conv2 in
            ],
        ),
        compiler_params=pltpu.CompilerParams(
            dimension_semantics=("parallel",)),
    )(x, w1p, b1p, w2p, b2p)

    # Glue: drop channel padding, cast back to f32, NHWC -> NCHW.
    return jnp.transpose(out_nhwc[..., :Cout].astype(jnp.float32), (0, 3, 1, 2))


def _ref_forward(x, w1, b1, w2, b2):
    """Pure-JAX f32 reference (Conv2d(pad=1) -> ReLU -> Conv2d(pad=1))."""
    def conv(x, w, b):
        y = jax.lax.conv_general_dilated(
            x, w, window_strides=(1, 1), padding=((1, 1), (1, 1)),
            dimension_numbers=("NCHW", "HWIO", "NCHW"))
        return y + b.reshape(1, -1, 1, 1)
    h = jnp.maximum(conv(x, w1, b1), 0.0)
    return conv(h, w2, b2)


if __name__ == "__main__":
    key = jax.random.PRNGKey(0)
    k1, k2, k3, k4, k5 = jax.random.split(key, 5)

    N, C, H, W = 2, 4, 16, 16
    x = jax.random.normal(k1, (N, C, H, W), jnp.float32)

    # deterministic PyTorch-Conv2d-style init: U(-1/sqrt(fan_in), 1/sqrt(fan_in))
    fan_in = C * 3 * 3
    bound = 1.0 / (fan_in ** 0.5)
    w1 = jax.random.uniform(k2, (3, 3, C, C), jnp.float32, -bound, bound)
    b1 = jax.random.uniform(k3, (C,), jnp.float32, -bound, bound)
    w2 = jax.random.uniform(k4, (3, 3, C, C), jnp.float32, -bound, bound)
    b2 = jax.random.uniform(k5, (C,), jnp.float32, -bound, bound)

    out = recompute_on_backward_forward(x, w1, b1, w2, b2)
    out = jax.block_until_ready(out)

    ref = _ref_forward(x, w1, b1, w2, b2)
    assert out.shape == ref.shape == (N, C, H, W)
    # Intended precision: bf16 MXU operands, bf16 intermediate activation,
    # bf16 output, f32 accumulation -> loosened tolerance vs the f32 reference.
    assert jnp.allclose(out, ref, atol=3e-2, rtol=3e-2), "Pallas vs reference mismatch"

    print("KERNEL_OK")
</pallas_src>

<mosaic_0001>
module attributes {stable_mosaic.version = 11 : i64} {
  func.func @kernel(%arg0: i32, %arg1: memref<1x16x16x128xbf16, #tpu.memory_space<vmem>>, %arg2: memref<9x128x128xbf16, #tpu.memory_space<vmem>>, %arg3: memref<1x128xf32, #tpu.memory_space<vmem>>, %arg4: memref<9x128x128xbf16, #tpu.memory_space<vmem>>, %arg5: memref<1x128xf32, #tpu.memory_space<vmem>>, %arg6: memref<1x16x16x128xbf16, #tpu.memory_space<vmem>>, %arg7: memref<18x24x128xbf16, #tpu.memory_space<vmem>>, %arg8: memref<18x24x128xbf16, #tpu.memory_space<vmem>>) attributes {dimension_semantics = [#tpu.dimension_semantics<parallel>], iteration_bounds = array<i64: 2>, scalar_prefetch = 0 : i64, scratch_operands = 2 : i64, tpu.core_type = #tpu.core_type<tc>, window_params = [{transform_indices = @transform_0, window_bounds = array<i64: 1, 16, 16, 128>}, {pipeline_mode = #tpu.pipeline_mode<synchronous>, transform_indices = @transform_1, window_bounds = array<i64: 9, 128, 128>}, {pipeline_mode = #tpu.pipeline_mode<synchronous>, transform_indices = @transform_2, window_bounds = array<i64: 1, 128>}, {pipeline_mode = #tpu.pipeline_mode<synchronous>, transform_indices = @transform_3, window_bounds = array<i64: 9, 128, 128>}, {pipeline_mode = #tpu.pipeline_mode<synchronous>, transform_indices = @transform_4, window_bounds = array<i64: 1, 128>}, {transform_indices = @transform_5, window_bounds = array<i64: 1, 16, 16, 128>}]} {
    %cst = arith.constant 0.000000e+00 : bf16
    %0 = vector.broadcast %cst : bf16 to vector<1x24x128xbf16>
    %c0 = arith.constant 0 : index
    %c0_0 = arith.constant 0 : index
    %c0_1 = arith.constant 0 : index
    %1 = vector.load %arg7[%c0, %c0_0, %c0_1] : memref<18x24x128xbf16, #tpu.memory_space<vmem>>, vector<1x24x128xbf16>
    tpu.vector_store %arg7[%c0, %c0_0, %c0_1], %0 {strides = array<i32>} : memref<18x24x128xbf16, #tpu.memory_space<vmem>>, vector<1x24x128xbf16>,
    %c17 = arith.constant 17 : index
    %c0_2 = arith.constant 0 : index
    %c0_3 = arith.constant 0 : index
    %2 = vector.load %arg7[%c17, %c0_2, %c0_3] : memref<18x24x128xbf16, #tpu.memory_space<vmem>>, vector<1x24x128xbf16>
    tpu.vector_store %arg7[%c17, %c0_2, %c0_3], %0 {strides = array<i32>} : memref<18x24x128xbf16, #tpu.memory_space<vmem>>, vector<1x24x128xbf16>,
    %cst_4 = arith.constant 0.000000e+00 : bf16
    %3 = vector.broadcast %cst_4 : bf16 to vector<16x1x128xbf16>
    %c1 = arith.constant 1 : index
    %c0_5 = arith.constant 0 : index
    %c0_6 = arith.constant 0 : index
    %4 = vector.load %arg7[%c1, %c0_5, %c0_6] : memref<18x24x128xbf16, #tpu.memory_space<vmem>>, vector<16x1x128xbf16>
    tpu.vector_store %arg7[%c1, %c0_5, %c0_6], %3 {strides = array<i32>} : memref<18x24x128xbf16, #tpu.memory_space<vmem>>, vector<16x1x128xbf16>,
    %c1_7 = arith.constant 1 : index
    %c17_8 = arith.constant 17 : index
    %c0_9 = arith.constant 0 : index
    %5 = vector.load %arg7[%c1_7, %c17_8, %c0_9] : memref<18x24x128xbf16, #tpu.memory_space<vmem>>, vector<16x1x128xbf16>
    tpu.vector_store %arg7[%c1_7, %c17_8, %c0_9], %3 {strides = array<i32>} : memref<18x24x128xbf16, #tpu.memory_space<vmem>>, vector<16x1x128xbf16>,
    %cst_10 = arith.constant 0.000000e+00 : bf16
    %6 = vector.broadcast %cst_10 : bf16 to vector<1x24x128xbf16>
    %c0_11 = arith.constant 0 : index
    %c0_12 = arith.constant 0 : index
    %c0_13 = arith.constant 0 : index
    %7 = vector.load %arg8[%c0_11, %c0_12, %c0_13] : memref<18x24x128xbf16, #tpu.memory_space<vmem>>, vector<1x24x128xbf16>
    tpu.vector_store %arg8[%c0_11, %c0_12, %c0_13], %6 {strides = array<i32>} : memref<18x24x128xbf16, #tpu.memory_space<vmem>>, vector<1x24x128xbf16>,
    %c17_14 = arith.constant 17 : index
    %c0_15 = arith.constant 0 : index
    %c0_16 = arith.constant 0 : index
    %8 = vector.load %arg8[%c17_14, %c0_15, %c0_16] : memref<18x24x128xbf16, #tpu.memory_space<vmem>>, vector<1x24x128xbf16>
    tpu.vector_store %arg8[%c17_14, %c0_15, %c0_16], %6 {strides = array<i32>} : memref<18x24x128xbf16, #tpu.memory_space<vmem>>, vector<1x24x128xbf16>,
    %cst_17 = arith.constant 0.000000e+00 : bf16
    %9 = vector.broadcast %cst_17 : bf16 to vector<16x1x128xbf16>
    %c1_18 = arith.constant 1 : index
    %c0_19 = arith.constant 0 : index
    %c0_20 = arith.constant 0 : index
    %10 = vector.load %arg8[%c1_18, %c0_19, %c0_20] : memref<18x24x128xbf16, #tpu.memory_space<vmem>>, vector<16x1x128xbf16>
    tpu.vector_store %arg8[%c1_18, %c0_19, %c0_20], %9 {strides = array<i32>} : memref<18x24x128xbf16, #tpu.memory_space<vmem>>, vector<16x1x128xbf16>,
    %c1_21 = arith.constant 1 : index
    %c17_22 = arith.constant 17 : index
    %c0_23 = arith.constant 0 : index
    %11 = vector.load %arg8[%c1_21, %c17_22, %c0_23] : memref<18x24x128xbf16, #tpu.memory_space<vmem>>, vector<16x1x128xbf16>
    tpu.vector_store %arg8[%c1_21, %c17_22, %c0_23], %9 {strides = array<i32>} : memref<18x24x128xbf16, #tpu.memory_space<vmem>>, vector<16x1x128xbf16>,
    %c0_i32 = arith.constant 0 : i32
    %c2_i32 = arith.constant 2 : i32
    %12 = arith.addi %c0_i32, %c2_i32 : i32
    %c1_i32 = arith.constant 1 : i32
    scf.for %arg9 = %c0_i32 to %12 step %c1_i32  : i32 {
      %c1_i32_33 = arith.constant 1 : i32
      %15 = arith.muli %arg9, %c1_i32_33 : i32
      %c0_i32_34 = arith.constant 0 : i32
      %16 = arith.addi %c0_i32_34, %15 : i32
      %c8_i32 = arith.constant 8 : i32
      %17 = arith.muli %16, %c8_i32 : i32
      %18 = tpu.assume_multiple %17, 8 : i32
      %c0_35 = arith.constant 0 : index
      %19 = arith.index_cast %18 : i32 to index
      %c0_36 = arith.constant 0 : index
      %c0_37 = arith.constant 0 : index
      %20 = vector.load %arg1[%c0_35, %19, %c0_36, %c0_37] : memref<1x16x16x128xbf16, #tpu.memory_space<vmem>>, vector<1x8x16x128xbf16>
      %21 = vector.shape_cast %20 : vector<1x8x16x128xbf16> to vector<8x16x128xbf16>
      %c1_i32_38 = arith.constant 1 : i32
      %22 = arith.addi %c1_i32_38, %18 : i32
      %23 = arith.index_cast %22 : i32 to index
      %c1_39 = arith.constant 1 : index
      %c0_40 = arith.constant 0 : index
      %24 = vector.load %arg7[%23, %c1_39, %c0_40] : memref<18x24x128xbf16, #tpu.memory_space<vmem>>, vector<8x16x128xbf16>
      tpu.vector_store %arg7[%23, %c1_39, %c0_40], %21 {strides = array<i32>} : memref<18x24x128xbf16, #tpu.memory_space<vmem>>, vector<8x16x128xbf16>,
    }
    %c2_i32_24 = arith.constant 2 : i32
    %c0_i32_25 = arith.constant 0 : i32
    %c2_i32_26 = arith.constant 2 : i32
    %13 = arith.addi %c0_i32_25, %c2_i32_26 : i32
    %c1_i32_27 = arith.constant 1 : i32
    scf.for %arg9 = %c0_i32_25 to %13 step %c1_i32_27  : i32 {
      %c1_i32_33 = arith.constant 1 : i32
      %15 = arith.muli %arg9, %c1_i32_33 : i32
      %c0_i32_34 = arith.constant 0 : i32
      %16 = arith.addi %c0_i32_34, %15 : i32
      %c8_i32 = arith.constant 8 : i32
      %17 = arith.muli %16, %c8_i32 : i32
      %18 = tpu.assume_multiple %17, 8 : i32
      %cst_35 = arith.constant 0.000000e+00 : f32
      %19 = vector.broadcast %cst_35 : f32 to vector<128x128xf32>
      %c0_i32_36 = arith.constant 0 : i32
      %20 = arith.addi %18, %c0_i32_36 : i32
      %21 = arith.index_cast %20 : i32 to index
      %c0_37 = arith.constant 0 : index
      %c0_38 = arith.constant 0 : index
      %22 = vector.load %arg7[%21, %c0_37, %c0_38] : memref<18x24x128xbf16, #tpu.memory_space<vmem>>, vector<8x16x128xbf16>
      %23 = vector.shape_cast %22 : vector<8x16x128xbf16> to vector<128x128xbf16>
      %c0_39 = arith.constant 0 : index
      %c0_40 = arith.constant 0 : index
      %c0_41 = arith.constant 0 : index
      %24 = vector.load %arg2[%c0_39, %c0_40, %c0_41] : memref<9x128x128xbf16, #tpu.memory_space<vmem>>, vector<1x128x128xbf16>
      %25 = vector.shape_cast %24 : vector<1x128x128xbf16> to vector<128x128xbf16>
      %cst_42 = arith.constant dense<0.000000e+00> : vector<128x128xf32>
      %26 = tpu.matmul %23, %25, %cst_42 {dimension_numbers = #tpu.dot_dimension_numbers<[1], [0], [0], [1], [0, 0, 1, 1], [], []>} : vector<128x128xbf16>, vector<128x128xbf16>, vector<128x128xf32> -> vector<128x128xf32>
      %27 = arith.addf %19, %26 : vector<128x128xf32>
      %c0_i32_43 = arith.constant 0 : i32
      %28 = arith.addi %18, %c0_i32_43 : i32
      %29 = arith.index_cast %28 : i32 to index
      %c1_44 = arith.constant 1 : index
      %c0_45 = arith.constant 0 : index
      %30 = vector.load %arg7[%29, %c1_44, %c0_45] : memref<18x24x128xbf16, #tpu.memory_space<vmem>>, vector<8x16x128xbf16>
      %31 = vector.shape_cast %30 : vector<8x16x128xbf16> to vector<128x128xbf16>
      %c1_46 = arith.constant 1 : index
      %c0_47 = arith.constant 0 : index
      %c0_48 = arith.constant 0 : index
      %32 = vector.load %arg2[%c1_46, %c0_47, %c0_48] : memref<9x128x128xbf16, #tpu.memory_space<vmem>>, vector<1x128x128xbf16>
      %33 = vector.shape_cast %32 : vector<1x128x128xbf16> to vector<128x128xbf16>
      %cst_49 = arith.constant dense<0.000000e+00> : vector<128x128xf32>
      %34 = tpu.matmul %31, %33, %cst_49 {dimension_numbers = #tpu.dot_dimension_numbers<[1], [0], [0], [1], [0, 0, 1, 1], [], []>} : vector<128x128xbf16>, vector<128x128xbf16>, vector<128x128xf32> -> vector<128x128xf32>
      %35 = arith.addf %27, %34 : vector<128x128xf32>
      %c0_i32_50 = arith.constant 0 : i32
      %36 = arith.addi %18, %c0_i32_50 : i32
      %37 = arith.index_cast %36 : i32 to index
      %c2 = arith.constant 2 : index
      %c0_51 = arith.constant 0 : index
      %38 = vector.load %arg7[%37, %c2, %c0_51] : memref<18x24x128xbf16, #tpu.memory_space<vmem>>, vector<8x16x128xbf16>
      %39 = vector.shape_cast %38 : vector<8x16x128xbf16> to vector<128x128xbf16>
      %c2_52 = arith.constant 2 : index
      %c0_53 = arith.constant 0 : index
      %c0_54 = arith.constant 0 : index
      %40 = vector.load %arg2[%c2_52, %c0_53, %c0_54] : memref<9x128x128xbf16, #tpu.memory_space<vmem>>, vector<1x128x128xbf16>
      %41 = vector.shape_cast %40 : vector<1x128x128xbf16> to vector<128x128xbf16>
      %cst_55 = arith.constant dense<0.000000e+00> : vector<128x128xf32>
      %42 = tpu.matmul %39, %41, %cst_55 {dimension_numbers = #tpu.dot_dimension_numbers<[1], [0], [0], [1], [0, 0, 1, 1], [], []>} : vector<128x128xbf16>, vector<128x128xbf16>, vector<128x128xf32> -> vector<128x128xf32>
      %43 = arith.addf %35, %42 : vector<128x128xf32>
      %c1_i32_56 = arith.constant 1 : i32
      %44 = arith.addi %18, %c1_i32_56 : i32
      %45 = arith.index_cast %44 : i32 to index
      %c0_57 = arith.constant 0 : index
      %c0_58 = arith.constant 0 : index
      %46 = vector.load %arg7[%45, %c0_57, %c0_58] : memref<18x24x128xbf16, #tpu.memory_space<vmem>>, vector<8x16x128xbf16>
      %47 = vector.shape_cast %46 : vector<8x16x128xbf16> to vector<128x128xbf16>
      %c3 = arith.constant 3 : index
      %c0_59 = arith.constant 0 : index
      %c0_60 = arith.constant 0 : index
      %48 = vector.load %arg2[%c3, %c0_59, %c0_60] : memref<9x128x128xbf16, #tpu.memory_space<vmem>>, vector<1x128x128xbf16>
      %49 = vector.shape_cast %48 : vector<1x128x128xbf16> to vector<128x128xbf16>
      %cst_61 = arith.constant dense<0.000000e+00> : vector<128x128xf32>
      %50 = tpu.matmul %47, %49, %cst_61 {dimension_numbers = #tpu.dot_dimension_numbers<[1], [0], [0], [1], [0, 0, 1, 1], [], []>} : vector<128x128xbf16>, vector<128x128xbf16>, vector<128x128xf32> -> vector<128x128xf32>
      %51 = arith.addf %43, %50 : vector<128x128xf32>
      %c1_i32_62 = arith.constant 1 : i32
      %52 = arith.addi %18, %c1_i32_62 : i32
      %53 = arith.index_cast %52 : i32 to index
      %c1_63 = arith.constant 1 : index
      %c0_64 = arith.constant 0 : index
      %54 = vector.load %arg7[%53, %c1_63, %c0_64] : memref<18x24x128xbf16, #tpu.memory_space<vmem>>, vector<8x16x128xbf16>
      %55 = vector.shape_cast %54 : vector<8x16x128xbf16> to vector<128x128xbf16>
      %c4 = arith.constant 4 : index
      %c0_65 = arith.constant 0 : index
      %c0_66 = arith.constant 0 : index
      %56 = vector.load %arg2[%c4, %c0_65, %c0_66] : memref<9x128x128xbf16, #tpu.memory_space<vmem>>, vector<1x128x128xbf16>
      %57 = vector.shape_cast %56 : vector<1x128x128xbf16> to vector<128x128xbf16>
      %cst_67 = arith.constant dense<0.000000e+00> : vector<128x128xf32>
      %58 = tpu.matmul %55, %57, %cst_67 {dimension_numbers = #tpu.dot_dimension_numbers<[1], [0], [0], [1], [0, 0, 1, 1], [], []>} : vector<128x128xbf16>, vector<128x128xbf16>, vector<128x128xf32> -> vector<128x128xf32>
      %59 = arith.addf %51, %58 : vector<128x128xf32>
      %c1_i32_68 = arith.constant 1 : i32
      %60 = arith.addi %18, %c1_i32_68 : i32
      %61 = arith.index_cast %60 : i32 to index
      %c2_69 = arith.constant 2 : index
      %c0_70 = arith.constant 0 : index
      %62 = vector.load %arg7[%61, %c2_69, %c0_70] : memref<18x24x128xbf16, #tpu.memory_space<vmem>>, vector<8x16x128xbf16>
      %63 = vector.shape_cast %62 : vector<8x16x128xbf16> to vector<128x128xbf16>
      %c5 = arith.constant 5 : index
      %c0_71 = arith.constant 0 : index
      %c0_72 = arith.constant 0 : index
      %64 = vector.load %arg2[%c5, %c0_71, %c0_72] : memref<9x128x128xbf16, #tpu.memory_space<vmem>>, vector<1x128x128xbf16>
      %65 = vector.shape_cast %64 : vector<1x128x128xbf16> to vector<128x128xbf16>
      %cst_73 = arith.constant dense<0.000000e+00> : vector<128x128xf32>
      %66 = tpu.matmul %63, %65, %cst_73 {dimension_numbers = #tpu.dot_dimension_numbers<[1], [0], [0], [1], [0, 0, 1, 1], [], []>} : vector<128x128xbf16>, vector<128x128xbf16>, vector<128x128xf32> -> vector<128x128xf32>
      %67 = arith.addf %59, %66 : vector<128x128xf32>
      %c2_i32_74 = arith.constant 2 : i32
      %68 = arith.addi %18, %c2_i32_74 : i32
      %69 = arith.index_cast %68 : i32 to index
      %c0_75 = arith.constant 0 : index
      %c0_76 = arith.constant 0 : index
      %70 = vector.load %arg7[%69, %c0_75, %c0_76] : memref<18x24x128xbf16, #tpu.memory_space<vmem>>, vector<8x16x128xbf16>
      %71 = vector.shape_cast %70 : vector<8x16x128xbf16> to vector<128x128xbf16>
      %c6 = arith.constant 6 : index
      %c0_77 = arith.constant 0 : index
      %c0_78 = arith.constant 0 : index
      %72 = vector.load %arg2[%c6, %c0_77, %c0_78] : memref<9x128x128xbf16, #tpu.memory_space<vmem>>, vector<1x128x128xbf16>
      %73 = vector.shape_cast %72 : vector<1x128x128xbf16> to vector<128x128xbf16>
      %cst_79 = arith.constant dense<0.000000e+00> : vector<128x128xf32>
      %74 = tpu.matmul %71, %73, %cst_79 {dimension_numbers = #tpu.dot_dimension_numbers<[1], [0], [0], [1], [0, 0, 1, 1], [], []>} : vector<128x128xbf16>, vector<128x128xbf16>, vector<128x128xf32> -> vector<128x128xf32>
      %75 = arith.addf %67, %74 : vector<128x128xf32>
      %c2_i32_80 = arith.constant 2 : i32
      %76 = arith.addi %18, %c2_i32_80 : i32
      %77 = arith.index_cast %76 : i32 to index
      %c1_81 = arith.constant 1 : index
      %c0_82 = arith.constant 0 : index
      %78 = vector.load %arg7[%77, %c1_81, %c0_82] : memref<18x24x128xbf16, #tpu.memory_space<vmem>>, vector<8x16x128xbf16>
      %79 = vector.shape_cast %78 : vector<8x16x128xbf16> to vector<128x128xbf16>
      %c7 = arith.constant 7 : index
      %c0_83 = arith.constant 0 : index
      %c0_84 = arith.constant 0 : index
      %80 = vector.load %arg2[%c7, %c0_83, %c0_84] : memref<9x128x128xbf16, #tpu.memory_space<vmem>>, vector<1x128x128xbf16>
      %81 = vector.shape_cast %80 : vector<1x128x128xbf16> to vector<128x128xbf16>
      %cst_85 = arith.constant dense<0.000000e+00> : vector<128x128xf32>
      %82 = tpu.matmul %79, %81, %cst_85 {dimension_numbers = #tpu.dot_dimension_numbers<[1], [0], [0], [1], [0, 0, 1, 1], [], []>} : vector<128x128xbf16>, vector<128x128xbf16>, vector<128x128xf32> -> vector<128x128xf32>
      %83 = arith.addf %75, %82 : vector<128x128xf32>
      %c2_i32_86 = arith.constant 2 : i32
      %84 = arith.addi %18, %c2_i32_86 : i32
      %85 = arith.index_cast %84 : i32 to index
      %c2_87 = arith.constant 2 : index
      %c0_88 = arith.constant 0 : index
      %86 = vector.load %arg7[%85, %c2_87, %c0_88] : memref<18x24x128xbf16, #tpu.memory_space<vmem>>, vector<8x16x128xbf16>
      %87 = vector.shape_cast %86 : vector<8x16x128xbf16> to vector<128x128xbf16>
      %c8 = arith.constant 8 : index
      %c0_89 = arith.constant 0 : index
      %c0_90 = arith.constant 0 : index
      %88 = vector.load %arg2[%c8, %c0_89, %c0_90] : memref<9x128x128xbf16, #tpu.memory_space<vmem>>, vector<1x128x128xbf16>
      %89 = vector.shape_cast %88 : vector<1x128x128xbf16> to vector<128x128xbf16>
      %cst_91 = arith.constant dense<0.000000e+00> : vector<128x128xf32>
      %90 = tpu.matmul %87, %89, %cst_91 {dimension_numbers = #tpu.dot_dimension_numbers<[1], [0], [0], [1], [0, 0, 1, 1], [], []>} : vector<128x128xbf16>, vector<128x128xbf16>, vector<128x128xf32> -> vector<128x128xf32>
      %91 = arith.addf %83, %90 : vector<128x128xf32>
      %c0_92 = arith.constant 0 : index
      %c0_93 = arith.constant 0 : index
      %92 = vector.load %arg3[%c0_92, %c0_93] : memref<1x128xf32, #tpu.memory_space<vmem>>, vector<1x128xf32>
      %93 = vector.broadcast %92 : vector<1x128xf32> to vector<128x128xf32>
      %94 = arith.addf %91, %93 : vector<128x128xf32>
      %cst_94 = arith.constant 0.000000e+00 : f32
      %95 = vector.broadcast %cst_94 : f32 to vector<128x128xf32>
      %96 = arith.maximumf %94, %95 : vector<128x128xf32>
      %97 = vector.shape_cast %96 : vector<128x128xf32> to vector<8x16x128xf32>
      %98 = arith.truncf %97 : vector<8x16x128xf32> to vector<8x16x128xbf16>
      %c1_i32_95 = arith.constant 1 : i32
      %99 = arith.addi %c1_i32_95, %18 : i32
      %100 = arith.index_cast %99 : i32 to index
      %c1_96 = arith.constant 1 : index
      %c0_97 = arith.constant 0 : index
      %101 = vector.load %arg8[%100, %c1_96, %c0_97] : memref<18x24x128xbf16, #tpu.memory_space<vmem>>, vector<8x16x128xbf16>
      tpu.vector_store %arg8[%100, %c1_96, %c0_97], %98 {strides = array<i32>} : memref<18x24x128xbf16, #tpu.memory_space<vmem>>, vector<8x16x128xbf16>,
    }
    %c2_i32_28 = arith.constant 2 : i32
    %c0_i32_29 = arith.constant 0 : i32
    %c2_i32_30 = arith.constant 2 : i32
    %14 = arith.addi %c0_i32_29, %c2_i32_30 : i32
    %c1_i32_31 = arith.constant 1 : i32
    scf.for %arg9 = %c0_i32_29 to %14 step %c1_i32_31  : i32 {
      %c1_i32_33 = arith.constant 1 : i32
      %15 = arith.muli %arg9, %c1_i32_33 : i32
      %c0_i32_34 = arith.constant 0 : i32
      %16 = arith.addi %c0_i32_34, %15 : i32
      %c8_i32 = arith.constant 8 : i32
      %17 = arith.muli %16, %c8_i32 : i32
      %18 = tpu.assume_multiple %17, 8 : i32
      %cst_35 = arith.constant 0.000000e+00 : f32
      %19 = vector.broadcast %cst_35 : f32 to vector<128x128xf32>
      %c0_i32_36 = arith.constant 0 : i32
      %20 = arith.addi %18, %c0_i32_36 : i32
      %21 = arith.index_cast %20 : i32 to index
      %c0_37 = arith.constant 0 : index
      %c0_38 = arith.constant 0 : index
      %22 = vector.load %arg8[%21, %c0_37, %c0_38] : memref<18x24x128xbf16, #tpu.memory_space<vmem>>, vector<8x16x128xbf16>
      %23 = vector.shape_cast %22 : vector<8x16x128xbf16> to vector<128x128xbf16>
      %c0_39 = arith.constant 0 : index
      %c0_40 = arith.constant 0 : index
      %c0_41 = arith.constant 0 : index
      %24 = vector.load %arg4[%c0_39, %c0_40, %c0_41] : memref<9x128x128xbf16, #tpu.memory_space<vmem>>, vector<1x128x128xbf16>
      %25 = vector.shape_cast %24 : vector<1x128x128xbf16> to vector<128x128xbf16>
      %cst_42 = arith.constant dense<0.000000e+00> : vector<128x128xf32>
      %26 = tpu.matmul %23, %25, %cst_42 {dimension_numbers = #tpu.dot_dimension_numbers<[1], [0], [0], [1], [0, 0, 1, 1], [], []>} : vector<128x128xbf16>, vector<128x128xbf16>, vector<128x128xf32> -> vector<128x128xf32>
      %27 = arith.addf %19, %26 : vector<128x128xf32>
      %c0_i32_43 = arith.constant 0 : i32
      %28 = arith.addi %18, %c0_i32_43 : i32
      %29 = arith.index_cast %28 : i32 to index
      %c1_44 = arith.constant 1 : index
      %c0_45 = arith.constant 0 : index
      %30 = vector.load %arg8[%29, %c1_44, %c0_45] : memref<18x24x128xbf16, #tpu.memory_space<vmem>>, vector<8x16x128xbf16>
      %31 = vector.shape_cast %30 : vector<8x16x128xbf16> to vector<128x128xbf16>
      %c1_46 = arith.constant 1 : index
      %c0_47 = arith.constant 0 : index
      %c0_48 = arith.constant 0 : index
      %32 = vector.load %arg4[%c1_46, %c0_47, %c0_48] : memref<9x128x128xbf16, #tpu.memory_space<vmem>>, vector<1x128x128xbf16>
      %33 = vector.shape_cast %32 : vector<1x128x128xbf16> to vector<128x128xbf16>
      %cst_49 = arith.constant dense<0.000000e+00> : vector<128x128xf32>
      %34 = tpu.matmul %31, %33, %cst_49 {dimension_numbers = #tpu.dot_dimension_numbers<[1], [0], [0], [1], [0, 0, 1, 1], [], []>} : vector<128x128xbf16>, vector<128x128xbf16>, vector<128x128xf32> -> vector<128x128xf32>
      %35 = arith.addf %27, %34 : vector<128x128xf32>
      %c0_i32_50 = arith.constant 0 : i32
      %36 = arith.addi %18, %c0_i32_50 : i32
      %37 = arith.index_cast %36 : i32 to index
      %c2 = arith.constant 2 : index
      %c0_51 = arith.constant 0 : index
      %38 = vector.load %arg8[%37, %c2, %c0_51] : memref<18x24x128xbf16, #tpu.memory_space<vmem>>, vector<8x16x128xbf16>
      %39 = vector.shape_cast %38 : vector<8x16x128xbf16> to vector<128x128xbf16>
      %c2_52 = arith.constant 2 : index
      %c0_53 = arith.constant 0 : index
      %c0_54 = arith.constant 0 : index
      %40 = vector.load %arg4[%c2_52, %c0_53, %c0_54] : memref<9x128x128xbf16, #tpu.memory_space<vmem>>, vector<1x128x128xbf16>
      %41 = vector.shape_cast %40 : vector<1x128x128xbf16> to vector<128x128xbf16>
      %cst_55 = arith.constant dense<0.000000e+00> : vector<128x128xf32>
      %42 = tpu.matmul %39, %41, %cst_55 {dimension_numbers = #tpu.dot_dimension_numbers<[1], [0], [0], [1], [0, 0, 1, 1], [], []>} : vector<128x128xbf16>, vector<128x128xbf16>, vector<128x128xf32> -> vector<128x128xf32>
      %43 = arith.addf %35, %42 : vector<128x128xf32>
      %c1_i32_56 = arith.constant 1 : i32
      %44 = arith.addi %18, %c1_i32_56 : i32
      %45 = arith.index_cast %44 : i32 to index
      %c0_57 = arith.constant 0 : index
      %c0_58 = arith.constant 0 : index
      %46 = vector.load %arg8[%45, %c0_57, %c0_58] : memref<18x24x128xbf16, #tpu.memory_space<vmem>>, vector<8x16x128xbf16>
      %47 = vector.shape_cast %46 : vector<8x16x128xbf16> to vector<128x128xbf16>
      %c3 = arith.constant 3 : index
      %c0_59 = arith.constant 0 : index
      %c0_60 = arith.constant 0 : index
      %48 = vector.load %arg4[%c3, %c0_59, %c0_60] : memref<9x128x128xbf16, #tpu.memory_space<vmem>>, vector<1x128x128xbf16>
      %49 = vector.shape_cast %48 : vector<1x128x128xbf16> to vector<128x128xbf16>
      %cst_61 = arith.constant dense<0.000000e+00> : vector<128x128xf32>
      %50 = tpu.matmul %47, %49, %cst_61 {dimension_numbers = #tpu.dot_dimension_numbers<[1], [0], [0], [1], [0, 0, 1, 1], [], []>} : vector<128x128xbf16>, vector<128x128xbf16>, vector<128x128xf32> -> vector<128x128xf32>
      %51 = arith.addf %43, %50 : vector<128x128xf32>
      %c1_i32_62 = arith.constant 1 : i32
      %52 = arith.addi %18, %c1_i32_62 : i32
      %53 = arith.index_cast %52 : i32 to index
      %c1_63 = arith.constant 1 : index
      %c0_64 = arith.constant 0 : index
      %54 = vector.load %arg8[%53, %c1_63, %c0_64] : memref<18x24x128xbf16, #tpu.memory_space<vmem>>, vector<8x16x128xbf16>
      %55 = vector.shape_cast %54 : vector<8x16x128xbf16> to vector<128x128xbf16>
      %c4 = arith.constant 4 : index
      %c0_65 = arith.constant 0 : index
      %c0_66 = arith.constant 0 : index
      %56 = vector.load %arg4[%c4, %c0_65, %c0_66] : memref<9x128x128xbf16, #tpu.memory_space<vmem>>, vector<1x128x128xbf16>
      %57 = vector.shape_cast %56 : vector<1x128x128xbf16> to vector<128x128xbf16>
      %cst_67 = arith.constant dense<0.000000e+00> : vector<128x128xf32>
      %58 = tpu.matmul %55, %57, %cst_67 {dimension_numbers = #tpu.dot_dimension_numbers<[1], [0], [0], [1], [0, 0, 1, 1], [], []>} : vector<128x128xbf16>, vector<128x128xbf16>, vector<128x128xf32> -> vector<128x128xf32>
      %59 = arith.addf %51, %58 : vector<128x128xf32>
      %c1_i32_68 = arith.constant 1 : i32
      %60 = arith.addi %18, %c1_i32_68 : i32
      %61 = arith.index_cast %60 : i32 to index
      %c2_69 = arith.constant 2 : index
      %c0_70 = arith.constant 0 : index
      %62 = vector.load %arg8[%61, %c2_69, %c0_70] : memref<18x24x128xbf16, #tpu.memory_space<vmem>>, vector<8x16x128xbf16>
      %63 = vector.shape_cast %62 : vector<8x16x128xbf16> to vector<128x128xbf16>
      %c5 = arith.constant 5 : index
      %c0_71 = arith.constant 0 : index
      %c0_72 = arith.constant 0 : index
      %64 = vector.load %arg4[%c5, %c0_71, %c0_72] : memref<9x128x128xbf16, #tpu.memory_space<vmem>>, vector<1x128x128xbf16>
      %65 = vector.shape_cast %64 : vector<1x128x128xbf16> to vector<128x128xbf16>
      %cst_73 = arith.constant dense<0.000000e+00> : vector<128x128xf32>
      %66 = tpu.matmul %63, %65, %cst_73 {dimension_numbers = #tpu.dot_dimension_numbers<[1], [0], [0], [1], [0, 0, 1, 1], [], []>} : vector<128x128xbf16>, vector<128x128xbf16>, vector<128x128xf32> -> vector<128x128xf32>
      %67 = arith.addf %59, %66 : vector<128x128xf32>
      %c2_i32_74 = arith.constant 2 : i32
      %68 = arith.addi %18, %c2_i32_74 : i32
      %69 = arith.index_cast %68 : i32 to index
      %c0_75 = arith.constant 0 : index
      %c0_76 = arith.constant 0 : index
      %70 = vector.load %arg8[%69, %c0_75, %c0_76] : memref<18x24x128xbf16, #tpu.memory_space<vmem>>, vector<8x16x128xbf16>
      %71 = vector.shape_cast %70 : vector<8x16x128xbf16> to vector<128x128xbf16>
      %c6 = arith.constant 6 : index
      %c0_77 = arith.constant 0 : index
      %c0_78 = arith.constant 0 : index
      %72 = vector.load %arg4[%c6, %c0_77, %c0_78] : memref<9x128x128xbf16, #tpu.memory_space<vmem>>, vector<1x128x128xbf16>
      %73 = vector.shape_cast %72 : vector<1x128x128xbf16> to vector<128x128xbf16>
      %cst_79 = arith.constant dense<0.000000e+00> : vector<128x128xf32>
      %74 = tpu.matmul %71, %73, %cst_79 {dimension_numbers = #tpu.dot_dimension_numbers<[1], [0], [0], [1], [0, 0, 1, 1], [], []>} : vector<128x128xbf16>, vector<128x128xbf16>, vector<128x128xf32> -> vector<128x128xf32>
      %75 = arith.addf %67, %74 : vector<128x128xf32>
      %c2_i32_80 = arith.constant 2 : i32
      %76 = arith.addi %18, %c2_i32_80 : i32
      %77 = arith.index_cast %76 : i32 to index
      %c1_81 = arith.constant 1 : index
      %c0_82 = arith.constant 0 : index
      %78 = vector.load %arg8[%77, %c1_81, %c0_82] : memref<18x24x128xbf16, #tpu.memory_space<vmem>>, vector<8x16x128xbf16>
      %79 = vector.shape_cast %78 : vector<8x16x128xbf16> to vector<128x128xbf16>
      %c7 = arith.constant 7 : index
      %c0_83 = arith.constant 0 : index
      %c0_84 = arith.constant 0 : index
      %80 = vector.load %arg4[%c7, %c0_83, %c0_84] : memref<9x128x128xbf16, #tpu.memory_space<vmem>>, vector<1x128x128xbf16>
      %81 = vector.shape_cast %80 : vector<1x128x128xbf16> to vector<128x128xbf16>
      %cst_85 = arith.constant dense<0.000000e+00> : vector<128x128xf32>
      %82 = tpu.matmul %79, %81, %cst_85 {dimension_numbers = #tpu.dot_dimension_numbers<[1], [0], [0], [1], [0, 0, 1, 1], [], []>} : vector<128x128xbf16>, vector<128x128xbf16>, vector<128x128xf32> -> vector<128x128xf32>
      %83 = arith.addf %75, %82 : vector<128x128xf32>
      %c2_i32_86 = arith.constant 2 : i32
      %84 = arith.addi %18, %c2_i32_86 : i32
      %85 = arith.index_cast %84 : i32 to index
      %c2_87 = arith.constant 2 : index
      %c0_88 = arith.constant 0 : index
      %86 = vector.load %arg8[%85, %c2_87, %c0_88] : memref<18x24x128xbf16, #tpu.memory_space<vmem>>, vector<8x16x128xbf16>
      %87 = vector.shape_cast %86 : vector<8x16x128xbf16> to vector<128x128xbf16>
      %c8 = arith.constant 8 : index
      %c0_89 = arith.constant 0 : index
      %c0_90 = arith.constant 0 : index
      %88 = vector.load %arg4[%c8, %c0_89, %c0_90] : memref<9x128x128xbf16, #tpu.memory_space<vmem>>, vector<1x128x128xbf16>
      %89 = vector.shape_cast %88 : vector<1x128x128xbf16> to vector<128x128xbf16>
      %cst_91 = arith.constant dense<0.000000e+00> : vector<128x128xf32>
      %90 = tpu.matmul %87, %89, %cst_91 {dimension_numbers = #tpu.dot_dimension_numbers<[1], [0], [0], [1], [0, 0, 1, 1], [], []>} : vector<128x128xbf16>, vector<128x128xbf16>, vector<128x128xf32> -> vector<128x128xf32>
      %91 = arith.addf %83, %90 : vector<128x128xf32>
      %c0_92 = arith.constant 0 : index
      %c0_93 = arith.constant 0 : index
      %92 = vector.load %arg5[%c0_92, %c0_93] : memref<1x128xf32, #tpu.memory_space<vmem>>, vector<1x128xf32>
      %93 = vector.broadcast %92 : vector<1x128xf32> to vector<128x128xf32>
      %94 = arith.addf %91, %93 : vector<128x128xf32>
      %95 = vector.shape_cast %94 : vector<128x128xf32> to vector<8x16x128xf32>
      %96 = arith.truncf %95 : vector<8x16x128xf32> to vector<8x16x128xbf16>
      %c0_94 = arith.constant 0 : index
      %97 = arith.index_cast %18 : i32 to index
      %c0_95 = arith.constant 0 : index
      %c0_96 = arith.constant 0 : index
      %98 = vector.load %arg6[%c0_94, %97, %c0_95, %c0_96] : memref<1x16x16x128xbf16, #tpu.memory_space<vmem>>, vector<1x8x16x128xbf16>
      %99 = vector.shape_cast %98 : vector<1x8x16x128xbf16> to vector<8x16x128xbf16>
      %100 = vector.shape_cast %96 : vector<8x16x128xbf16> to vector<1x8x16x128xbf16>
      tpu.vector_store %arg6[%c0_94, %97, %c0_95, %c0_96], %100 {strides = array<i32>} : memref<1x16x16x128xbf16, #tpu.memory_space<vmem>>, vector<1x8x16x128xbf16>,
    }
    %c2_i32_32 = arith.constant 2 : i32
    return
  }
  func.func @transform_0(%arg0: i32) -> (i32, i32, i32, i32) {
    %c0_i32 = arith.constant 0 : i32
    %c0_i32_0 = arith.constant 0 : i32
    %c0_i32_1 = arith.constant 0 : i32
    %c0_i32_2 = arith.constant 0 : i32
    return %arg0, %c0_i32, %c0_i32_0, %c0_i32_1 : i32, i32, i32, i32
  }
  func.func @transform_1(%arg0: i32) -> (i32, i32, i32) {
    %c0_i32 = arith.constant 0 : i32
    %c0_i32_0 = arith.constant 0 : i32
    %c0_i32_1 = arith.constant 0 : i32
    %c0_i32_2 = arith.constant 0 : i32
    return %c0_i32, %c0_i32_0, %c0_i32_1 : i32, i32, i32
  }
  func.func @transform_2(%arg0: i32) -> (i32, i32) {
    %c0_i32 = arith.constant 0 : i32
    %c0_i32_0 = arith.constant 0 : i32
    %c0_i32_1 = arith.constant 0 : i32
    return %c0_i32, %c0_i32_0 : i32, i32
  }
  func.func @transform_3(%arg0: i32) -> (i32, i32, i32) {
    %c0_i32 = arith.constant 0 : i32
    %c0_i32_0 = arith.constant 0 : i32
    %c0_i32_1 = arith.constant 0 : i32
    %c0_i32_2 = arith.constant 0 : i32
    return %c0_i32, %c0_i32_0, %c0_i32_1 : i32, i32, i32
  }
  func.func @transform_4(%arg0: i32) -> (i32, i32) {
    %c0_i32 = arith.constant 0 : i32
    %c0_i32_0 = arith.constant 0 : i32
    %c0_i32_1 = arith.constant 0 : i32
    return %c0_i32, %c0_i32_0 : i32, i32
  }
  func.func @transform_5(%arg0: i32) -> (i32, i32, i32, i32) {
    %c0_i32 = arith.constant 0 : i32
    %c0_i32_0 = arith.constant 0 : i32
    %c0_i32_1 = arith.constant 0 : i32
    %c0_i32_2 = arith.constant 0 : i32
    return %arg0, %c0_i32, %c0_i32_0, %c0_i32_1 : i32, i32, i32, i32
  }
}

</mosaic_0001>

<bundles_post_ra>
// kernel: tpu_custom_call.1
= control target key start
LH: loop header
LB: loop body
LE: loop exit
PB: predicated region body
PF: predicated region fallthrough
CT: control target
= control target key end

     0   :  { %10 = vsyncpa [#allocation5], 0  ;;  %s11681_s0 = inlined_call_operand.hbm [shape: bf16[2,16,16,128], index: 0, kind: input, shape index: {}]   ;;  %s11682_s1 = inlined_call_operand.hbm [shape: bf16[9,128,128], index: 1, kind: input, shape index: {}]   ;;  %s11683_s2 = inlined_call_operand.vmem [shape: f32[1,128], index: 2, kind: input, shape index: {}]   ;;  %s11684_s3 = inlined_call_operand.hbm [shape: bf16[9,128,128], index: 3, kind: input, shape index: {}]   ;;  %s11685_s4 = inlined_call_operand.vmem [shape: f32[1,128], index: 4, kind: input, shape index: {}]   ;;  %s11686_s5 = inlined_call_operand.hbm [shape: bf16[2,16,16,128], index: 5, kind: output, shape index: {}]  }
   0x1   :  { %12 = vsyncpa [#allocation5 + $0x1], 0 }
   0x2   :  { %13 = vsyncpa [#allocation8], 0 }
   0x3   :  { %14 = vsyncpa [#allocation6], 0 }
   0x4   :  { %16 = vsyncpa [#allocation6 + $0x1], 0  ;;  %s9473_s18 = smov 0   ;;  %s9475_s19 = smov 0  }
   0x5   :  { %s9477_s20 = smov 0   ;;  %s9479_s21 = smov 0  }
   0x6 LB: > { %s9494_s22 = sadd.s32 4294967295, %s9420_s21   ;;  %s7034_s23 = sadd.s32 4294967294, %s9420_s21   ;;  %s9420_s21 = sphi %s9479_s21, %s11758_s21   ;;  %s9416_s20 = sphi %s9477_s20, %s11757_s20   ;;  %s9412_s19 = sphi %s9475_s19, %s11756_s19   ;;  %s9408_s18 = sphi %s9473_s18, %s11755_s18  }
   0x7   : > { %p42_p0 = scmp.ne.s32.totalorder %s9412_s19, %s9408_s18  ;;  %p11687_p1 = scmp.eq.s32.totalorder %s9494_s22, 0 }
   0x8   : > { %p156_p3 = scmp.eq.s32.totalorder %s7034_s23, 1  ;;  %p7035_p5 = scmp.ge.s32.totalorder %s9420_s21, 1 }
   0x9   : > { %p9503_p4 = por %p11687_p1, %p42_p0  ;;  %p163_p7 = scmp.lt.s32.totalorder %s9420_s21, 3 }
   0xa   : > { %p9508_p6 = por %p156_p3, %p42_p0  ;;  %s9434_s27 = smov [#allocation7]  }
   0xb   : > { %s11703_s24 = scalar_select %p9503_p4, 1, 0 }
   0xc   : > { %s11704_s25 = scalar_select %p9508_p6, 1, 0 }
   0xd   : > { %p9513_p8 = pnand %p7035_p5, %p163_p7  ;;  %s175_s28 = sshll.u32 %s9434_s27, 4  ;;  %s9517_s28 = int_to_ptr.vmem [resolvable:$true] %s175_s28 }
   0xe   : > { %s9435_s30 = smov [#allocation9]   ;;  %s9252_s9 = scalar_lea.hbm %s11682_s1, 9216 }
   0xf   : > { %p8968_p9 = pneg %p9513_p8  ;;  %s191_s6 = sshll.u32 %s9435_s30, 4  ;;  %s9528_s6 = int_to_ptr.vmem [resolvable:$true] %s191_s6 }
  0x10   : > { %p9253_p12 = scmp.ne.s32.totalorder %s11682_s1, %s9252_s9  ;;  %p9259_p5 = scmp.lt.u32.totalorder %s9252_s9, %s11682_s1 }
  0x11   : > { %p9524_p11 = pnand %p8968_p9, %p11687_p1 }
  0x13   : > { %p9254_p13 = pneg %p9524_p11 }
  0x15   : > { %p9255_p0 = pnand %p9254_p13, %p9253_p12 }
  0x17   : > { %p9256_p3 = pneg %p9255_p0 }
  0x19   : > { %p9261_p7 = pnand %p9259_p5, %p9256_p3 }
  0x1b   : > { %9264 = shalt.err (!%p9261_p7)
}
  0x1c   : > { %s9265_s14 = scalar_lea.vmem %s9517_s28, 9216  ;;  %p9273_p2 = scmp.lt.s32.totalorder %s9517_s28, %s9517_s28 }
  0x1d   : > { %p9266_p9 = scmp.ne.s32.totalorder %s9517_s28, %s9265_s14  ;;  %p9274_p12 = scmp.lt.s32.totalorder %s9265_s14, %s9265_s14 }
  0x1f   : > { %p9268_p10 = pnand %p9266_p9, %p9254_p13  ;;  %p9275_p0 = por %p9274_p12, %p9273_p2 }
  0x21   : > { %p9269_p1 = pneg %p9268_p10 }
  0x23   : > { %p9276_p6 = pnand %p9275_p0, %p9269_p1 }
  0x25   : > { %9279 = shalt.err (!%p9276_p6)
}
  0x26   : > { %s9436_s15 = smov 64   ;;  %s9437_s16 = smov 4  }
  0x27   : > { %8971 = dma.hbm_to_vmem [thread:$0]  (!%p9524_p11), %s11682_s1, 9216, %s9517_s28, [#allocation8], %s9436_s15, %s9436_s15, %s9437_s16  }
  0x28   : > { %s9280_s7 = scalar_lea.hbm %s11684_s3, 9216 }
  0x29   : > { %p9281_p1 = scmp.ne.s32.totalorder %s11684_s3, %s9280_s7  ;;  %p9287_p10 = scmp.lt.u32.totalorder %s9280_s7, %s11684_s3 }
  0x2b   : > { %p9283_p2 = pnand %p9281_p1, %p9254_p13 }
  0x2d   : > { %p9284_p6 = pneg %p9283_p2 }
  0x2f   : > { %p9289_p3 = pnand %p9287_p10, %p9284_p6 }
  0x31   : > { %9292 = shalt.err (!%p9289_p3)
}
  0x32   : > { %s9293_s28 = scalar_lea.vmem %s9528_s6, 9216  ;;  %p9301_p12 = scmp.lt.s32.totalorder %s9528_s6, %s9528_s6 }
  0x33   : > { %p9294_p5 = scmp.ne.s32.totalorder %s9528_s6, %s9293_s28  ;;  %p9302_p0 = scmp.lt.s32.totalorder %s9293_s28, %s9293_s28 }
  0x35   : > { %p9296_p7 = pnand %p9294_p5, %p9254_p13  ;;  %p9303_p1 = por %p9302_p0, %p9301_p12 }
  0x37   : > { %p9297_p9 = pneg %p9296_p7 }
  0x39   : > { %p9304_p2 = pnand %p9303_p1, %p9297_p9 }
  0x3b   : > { %9307 = shalt.err (!%p9304_p2)
}
  0x3c   : > { %8974 = dma.hbm_to_vmem [thread:$0]  (!%p9524_p11), %s11684_s3, 9216, %s9528_s6, [#allocation8], %s9436_s15, %s9436_s15, %s9437_s16  }
  0x3d   : > { %s9589_s29 = sadd.s32 1, %s9420_s21   ;;  %s29_s14 = sadd.s32 1, %s9416_s20 }
  0x3e   : > { %s26_s17 = ssub.s32 %s9420_s21, %s9589_s29  ;;  %p36_p13 = scmp.ne.s32.totalorder %s9416_s20, %s9412_s19 }
  0x3f   : > { %p27_p6 = scmp.eq.s32.totalorder %s26_s17, 0  ;;  %p37_p10 = scmp.eq.s32.totalorder %s9420_s21, 0 }
  0x40   : > { %p11707_p3 = scmp.eq.s32.totalorder %s9494_s22, 1  ;;  %p8985_p7 = scmp.lt.s32.totalorder %s9420_s21, 2 }
  0x41   : > { %s9605_s27 = scalar_select %p27_p6, %s9416_s20, %s29_s14  }
  0x42   : > { %p9599_p5 = por %p11707_p3, %p36_p13  ;;  %p38_p9 = por %p37_p10, %p36_p13 }
  0x43   : > { %s208_s30 = sand.u32 1, %s9416_s20   ;;  %s7717_s6 = sshll.u32 %s9420_s21, 11 }
  0x44   : > { %s11708_s23 = scalar_select %p9599_p5, 1, 0 }
  0x45   : > { %s7039_s7 = sshll.u32 %s208_s30, 7  ;;  %s9612_s10 = scalar_lea.hbm %s11681_s0, %s7717_s6 }
  0x46   : > { %s212_s11 = scalar_lea.vmem [#allocation4], %s7039_s7  ;;  %p9616_p11 = pnand %p8985_p7, %p38_p9 }
  0x47   : > { %s219_s28 = sshll.u32 %s212_s11, 4  ;;  %s9620_s13 = scalar_lea.sflag [#allocation5], %s208_s30  ;;  %s9614_s28 = int_to_ptr.vmem [resolvable:$true] %s219_s28 }
  0x48   : > { %s9308_s14 = scalar_lea.hbm %s9612_s10, 2048  ;;  %p9310_p0 = pneg %p9616_p11 }
  0x49   : > { %p9309_p12 = scmp.ne.s32.totalorder %s9612_s10, %s9308_s14  ;;  %s9313_s6 = scalar_lea.hbm %s11681_s0, 4096 }
  0x4a   : > { %p9314_p13 = scmp.lt.u32.totalorder %s9612_s10, %s11681_s0  ;;  %p9315_p6 = scmp.lt.u32.totalorder %s9313_s6, %s9308_s14 }
  0x4b   : > { %p9311_p1 = pnand %p9310_p0, %p9309_p12  ;;  %p9317_p3 = scmp.lt.u32.totalorder %s9308_s14, %s9612_s10 }
  0x4c   : > { %p9316_p10 = por %p9315_p6, %p9314_p13 }
  0x4d   : > { %p9312_p2 = pneg %p9311_p1 }
  0x4e   : > { %p9318_p7 = por %p9317_p3, %p9316_p10 }
  0x50   : > { %p9319_p9 = pnand %p9318_p7, %p9312_p2 }
  0x52   : > { %9322 = shalt.err (!%p9319_p9)
}
  0x53   : > { %s9323_s30 = scalar_lea.vmem %s9614_s28, 2048  ;;  %s9438_s11 = smov [#allocation4]  }
  0x54   : > { %p9324_p12 = scmp.ne.s32.totalorder %s9614_s28, %s9323_s30  ;;  %s9328_s17 = sshll.u32 %s9438_s11, 4  ;;  %s9329_s17 = int_to_ptr.vmem [resolvable:$false] %s9328_s17 }
  0x55   : > { %s9330_s7 = scalar_lea.vmem %s9329_s17, 4096  ;;  %p9331_p4 = scmp.lt.s32.totalorder %s9614_s28, %s9329_s17 }
  0x56   : > { %p9326_p1 = pnand %p9324_p12, %p9310_p0  ;;  %p9332_p13 = scmp.lt.s32.totalorder %s9330_s7, %s9323_s30 }
  0x58   : > { %p9327_p5 = pneg %p9326_p1  ;;  %p9333_p6 = por %p9332_p13, %p9331_p4 }
  0x5a   : > { %p9334_p10 = pnand %p9333_p6, %p9327_p5 }
  0x5c   : > { %9337 = shalt.err (!%p9334_p10)
}
  0x5d   : > { %8978 = dma.hbm_to_vmem [thread:$0]  (!%p9616_p11), %s9612_s10, 2048, %s9614_s28, %s9620_s13, %s9436_s15, %s9436_s15, %s9437_s16  }
  0x5e   : > { %231 = sbr.rel (%p9513_p8) target bundleno = 1088 (0x440), region = 40 }
  0x65   : > { %s9654_s14 = sand.u32 1, %s9412_s19   ;;  %p11710_p4 = scmp.ne.s32.totalorder %s11703_s24, 0 }
  0x66   : > { %s7043_s6 = sshll.u32 %s9654_s14, 7  ;;  %s234_s8 = scalar_lea.sflag [#allocation5], %s9654_s14 }
  0x67   : > { %s9660_s12 = scalar_lea.vmem [#allocation4], %s7043_s6 }
  0x68   : > { %9395 = dma.done.wait (%p11710_p4), %s234_s8, 2048  }
  0x69   : > { %9397 = vsyncadd (%p11710_p4), %s234_s8, 4294965248  ;;  %p11711_p5 = scmp.eq.s32.totalorder %s9494_s22, 0 }
  0x6b   : > { %9399 = dma.done.wait (%p11711_p5), [#allocation8], 18432   ;;  %p11712_p8 = pmov %p11711_p5 }
  0x6c   : > { %v9439_v0 = vmov 0   ;;  %vm281_vm0 = vcmask 1040384   ;;  %vm282_vm1 = vsmask.f32 256  ;;  %v11713_v1 = vmov 0  ;;  %s9812_s24 = scalar_lea.vmem [#allocation10], %s7043_s6 }
  0x6d   : > { %9401 = vsyncadd (%p11712_p8), [#allocation8], 4294948864  ;;  %273 = vst [vmem:[#allocation2] sm:$0xf] %v9439_v0  ;;  %vm332_vm3 = vsmask.f32 7938 }
  0x6e   : > { %274 = vst [vmem:[#allocation2 + $0x4] sm:$0xf] %v9439_v0  ;;  %275 = vst [vmem:[#allocation2 + $0x8] sm:$0xf] %v9439_v0  ;;  %v284_v2 = vld [vmem:[#allocation2 + $0xc] sm:$0x1] }
  0x6f   : > { %277 = vst [vmem:[#allocation2 + $0xcc] sm:$0xf] %v9439_v0  ;;  %278 = vst [vmem:[#allocation2 + $0xd0] sm:$0xf] %v9439_v0  ;;  %v287_v3 = vld [vmem:[#allocation2 + $0x18] sm:$0x1] }
  0x70   : > { %279 = vst [vmem:[#allocation2 + $0xd4] sm:$0xf] %v9439_v0  ;;  %382 = vst [vmem:[#allocation3] sm:$0xf] %v9439_v0  ;;  %v290_v4 = vld [vmem:[#allocation2 + $0x24] sm:$0x1] }
  0x71   : > { %383 = vst [vmem:[#allocation3 + $0x4] sm:$0xf] %v9439_v0  ;;  %384 = vst [vmem:[#allocation3 + $0x8] sm:$0xf] %v9439_v0  ;;  %v293_v8 = vld [vmem:[#allocation2 + $0x30] sm:$0x1] }
  0x72   : > { %386 = vst [vmem:[#allocation3 + $0xcc] sm:$0xf] %v9439_v0  ;;  %387 = vst [vmem:[#allocation3 + $0xd0] sm:$0xf] %v9439_v0  ;;  %v296_v10 = vld [vmem:[#allocation2 + $0x3c] sm:$0x1] }
  0x73   : > { %388 = vst [vmem:[#allocation3 + $0xd4] sm:$0xf] %v9439_v0  ;;  %vm9672_vm2 = vmand %vm281_vm0, %vm282_vm1  ;;  %v299_v11 = vld [vmem:[#allocation2 + $0x48] sm:$0x1]  ;;  %v302_v14 = vld [vmem:[#allocation2 + $0x54] sm:$0x1] }
  0x74   : > { %v11714_v1 = vsel %vm9672_vm2, 4294967295, %v11713_v1  ;;  %v285_v5 = vsel %vm9672_vm2, 0, %v284_v2  ;;  %v288_v6 = vsel %vm9672_vm2, 0, %v287_v3  ;;  %v291_v7 = vsel %vm9672_vm2, 0, %v290_v4  ;;  %v305_v15 = vld [vmem:[#allocation2 + $0x60] sm:$0x1]  ;;  %vm9702_vm4 = vmand %vm281_vm0, %vm332_vm3 }
  0x75   : > { %11715 = vst [vmem:[#allocation14_spill] sm:$0xff] %v11714_v1  ;;  %286 = vst [vmem:[#allocation2 + $0xc] sm:$0x1] %v285_v5  ;;  %v294_v9 = vsel %vm9672_vm2, 0, %v293_v8  ;;  %v297_v12 = vsel %vm9672_vm2, 0, %v296_v10  ;;  %v300_v13 = vsel %vm9672_vm2, 0, %v299_v11 }
  0x76   : > { %289 = vst [vmem:[#allocation2 + $0x18] sm:$0x1] %v288_v6  ;;  %292 = vst [vmem:[#allocation2 + $0x24] sm:$0x1] %v291_v7  ;;  %v303_v16 = vsel %vm9672_vm2, 0, %v302_v14  ;;  %v306_v17 = vsel %vm9672_vm2, 0, %v305_v15 }
  0x77   : > { %295 = vst [vmem:[#allocation2 + $0x30] sm:$0x1] %v294_v9  ;;  %298 = vst [vmem:[#allocation2 + $0x3c] sm:$0x1] %v297_v12  ;;  %v308_v18 = vld [vmem:[#allocation2 + $0x6c] sm:$0x1] }
  0x78   : > { %301 = vst [vmem:[#allocation2 + $0x48] sm:$0x1] %v300_v13  ;;  %v311_v19 = vld [vmem:[#allocation2 + $0x78] sm:$0x1]  ;;  %304 = vst [vmem:[#allocation2 + $0x54] sm:$0x1] %v303_v16 }
  0x79   : > { %307 = vst [vmem:[#allocation2 + $0x60] sm:$0x1] %v306_v17  ;;  %v309_v20 = vsel %vm9672_vm2, 0, %v308_v18  ;;  %v312_v21 = vsel %vm9672_vm2, 0, %v311_v19  ;;  %v314_v22 = vld [vmem:[#allocation2 + $0x84] sm:$0x1] }
  0x7a   : > { %v317_v23 = vld [vmem:[#allocation2 + $0x90] sm:$0x1]  ;;  %310 = vst [vmem:[#allocation2 + $0x6c] sm:$0x1] %v309_v20  ;;  %313 = vst [vmem:[#allocation2 + $0x78] sm:$0x1] %v312_v21 }
  0x7b   : > { %v315_v24 = vsel %vm9672_vm2, 0, %v314_v22  ;;  %v318_v25 = vsel %vm9672_vm2, 0, %v317_v23  ;;  %v320_v26 = vld [vmem:[#allocation2 + $0x9c] sm:$0x1]  ;;  %v323_v27 = vld [vmem:[#allocation2 + $0xa8] sm:$0x1] }
  0x7c   : > { %316 = vst [vmem:[#allocation2 + $0x84] sm:$0x1] %v315_v24  ;;  %319 = vst [vmem:[#allocation2 + $0x90] sm:$0x1] %v318_v25  ;;  %v321_v29 = vsel %vm9672_vm2, 0, %v320_v26  ;;  %v324_v30 = vsel %vm9672_vm2, 0, %v323_v27 }
  0x7d   : > { %v326_v31 = vld [vmem:[#allocation2 + $0xb4] sm:$0x1]  ;;  %v329_v32 = vld [vmem:[#allocation2 + $0xc0] sm:$0x1]  ;;  %322 = vst [vmem:[#allocation2 + $0x9c] sm:$0x1] %v321_v29 }
  0x7e   : > { %325 = vst [vmem:[#allocation2 + $0xa8] sm:$0x1] %v324_v30  ;;  %v327_v33 = vsel %vm9672_vm2, 0, %v326_v31  ;;  %v330_v34 = vsel %vm9672_vm2, 0, %v329_v32  ;;  %v334_v35 = vld [vmem:[#allocation2 + $0x14] sm:$0x1] }
  0x7f   : > { %v337_v36 = vld [vmem:[#allocation2 + $0x20] sm:$0x1]  ;;  %328 = vst [vmem:[#allocation2 + $0xb4] sm:$0x1] %v327_v33  ;;  %331 = vst [vmem:[#allocation2 + $0xc0] sm:$0x1] %v330_v34 }
  0x80   : > { %v335_v37 = vsel %vm9702_vm4, 0, %v334_v35  ;;  %v338_v38 = vsel %vm9702_vm4, 0, %v337_v36  ;;  %v340_v39 = vld [vmem:[#allocation2 + $0x2c] sm:$0x1]  ;;  %v343_v40 = vld [vmem:[#allocation2 + $0x38] sm:$0x1] }
  0x81   : > { %336 = vst [vmem:[#allocation2 + $0x14] sm:$0x1] %v335_v37  ;;  %339 = vst [vmem:[#allocation2 + $0x20] sm:$0x1] %v338_v38  ;;  %v341_v41 = vsel %vm9702_vm4, 0, %v340_v39  ;;  %v344_v42 = vsel %vm9702_vm4, 0, %v343_v40 }
  0x82   : > { %v346_v43 = vld [vmem:[#allocation2 + $0x44] sm:$0x1]  ;;  %v349_v44 = vld [vmem:[#allocation2 + $0x50] sm:$0x1]  ;;  %342 = vst [vmem:[#allocation2 + $0x2c] sm:$0x1] %v341_v41 }
  0x83   : > { %345 = vst [vmem:[#allocation2 + $0x38] sm:$0x1] %v344_v42  ;;  %v347_v45 = vsel %vm9702_vm4, 0, %v346_v43  ;;  %v350_v46 = vsel %vm9702_vm4, 0, %v349_v44  ;;  %v352_v47 = vld [vmem:[#allocation2 + $0x5c] sm:$0x1] }
  0x84   : > { %v355_v48 = vld [vmem:[#allocation2 + $0x68] sm:$0x1]  ;;  %348 = vst [vmem:[#allocation2 + $0x44] sm:$0x1] %v347_v45  ;;  %351 = vst [vmem:[#allocation2 + $0x50] sm:$0x1] %v350_v46 }
  0x85   : > { %v353_v49 = vsel %vm9702_vm4, 0, %v352_v47  ;;  %v356_v50 = vsel %vm9702_vm4, 0, %v355_v48  ;;  %v358_v51 = vld [vmem:[#allocation2 + $0x74] sm:$0x1]  ;;  %v361_v52 = vld [vmem:[#allocation2 + $0x80] sm:$0x1] }
  0x86   : > { %354 = vst [vmem:[#allocation2 + $0x5c] sm:$0x1] %v353_v49  ;;  %357 = vst [vmem:[#allocation2 + $0x68] sm:$0x1] %v356_v50  ;;  %v359_v53 = vsel %vm9702_vm4, 0, %v358_v51  ;;  %v362_v54 = vsel %vm9702_vm4, 0, %v361_v52 }
  0x87   : > { %v364_v55 = vld [vmem:[#allocation2 + $0x8c] sm:$0x1]  ;;  %v367_v56 = vld [vmem:[#allocation2 + $0x98] sm:$0x1]  ;;  %360 = vst [vmem:[#allocation2 + $0x74] sm:$0x1] %v359_v53 }
  0x88   : > { %363 = vst [vmem:[#allocation2 + $0x80] sm:$0x1] %v362_v54  ;;  %v365_v57 = vsel %vm9702_vm4, 0, %v364_v55  ;;  %v368_v58 = vsel %vm9702_vm4, 0, %v367_v56  ;;  %v370_v59 = vld [vmem:[#allocation2 + $0xa4] sm:$0x1] }
  0x89   : > { %v373_v60 = vld [vmem:[#allocation2 + $0xb0] sm:$0x1]  ;;  %366 = vst [vmem:[#allocation2 + $0x8c] sm:$0x1] %v365_v57  ;;  %369 = vst [vmem:[#allocation2 + $0x98] sm:$0x1] %v368_v58 }
  0x8a   : > { %v371_v61 = vsel %vm9702_vm4, 0, %v370_v59  ;;  %v374_v62 = vsel %vm9702_vm4, 0, %v373_v60  ;;  %v376_v63 = vld [vmem:[#allocation2 + $0xbc] sm:$0x1]  ;;  %v379_v0 = vld [vmem:[#allocation2 + $0xc8] sm:$0x1] }
  0x8b   : > { %372 = vst [vmem:[#allocation2 + $0xa4] sm:$0x1] %v371_v61  ;;  %375 = vst [vmem:[#allocation2 + $0xb0] sm:$0x1] %v374_v62  ;;  %v377_v2 = vsel %vm9702_vm4, 0, %v376_v63  ;;  %v380_v3 = vsel %vm9702_vm4, 0, %v379_v0 }
  0x8c   : > { %v390_v4 = vld [vmem:[#allocation3 + $0xc] sm:$0x1]  ;;  %v393_v5 = vld [vmem:[#allocation3 + $0x18] sm:$0x1]  ;;  %378 = vst [vmem:[#allocation2 + $0xbc] sm:$0x1] %v377_v2 }
  0x8d   : > { %381 = vst [vmem:[#allocation2 + $0xc8] sm:$0x1] %v380_v3  ;;  %v391_v6 = vsel %vm9672_vm2, 0, %v390_v4  ;;  %v394_v7 = vsel %vm9672_vm2, 0, %v393_v5  ;;  %v396_v8 = vld [vmem:[#allocation3 + $0x24] sm:$0x1] }
  0x8e   : > { %v399_v9 = vld [vmem:[#allocation3 + $0x30] sm:$0x1]  ;;  %392 = vst [vmem:[#allocation3 + $0xc] sm:$0x1] %v391_v6  ;;  %395 = vst [vmem:[#allocation3 + $0x18] sm:$0x1] %v394_v7 }
  0x8f   : > { %v397_v10 = vsel %vm9672_vm2, 0, %v396_v8  ;;  %v400_v11 = vsel %vm9672_vm2, 0, %v399_v9  ;;  %v402_v12 = vld [vmem:[#allocation3 + $0x3c] sm:$0x1]  ;;  %v405_v13 = vld [vmem:[#allocation3 + $0x48] sm:$0x1] }
  0x90   : > { %398 = vst [vmem:[#allocation3 + $0x24] sm:$0x1] %v397_v10  ;;  %401 = vst [vmem:[#allocation3 + $0x30] sm:$0x1] %v400_v11  ;;  %v403_v14 = vsel %vm9672_vm2, 0, %v402_v12  ;;  %v406_v15 = vsel %vm9672_vm2, 0, %v405_v13 }
  0x91   : > { %v408_v16 = vld [vmem:[#allocation3 + $0x54] sm:$0x1]  ;;  %v411_v17 = vld [vmem:[#allocation3 + $0x60] sm:$0x1]  ;;  %404 = vst [vmem:[#allocation3 + $0x3c] sm:$0x1] %v403_v14 }
  0x92   : > { %407 = vst [vmem:[#allocation3 + $0x48] sm:$0x1] %v406_v15  ;;  %v409_v18 = vsel %vm9672_vm2, 0, %v408_v16  ;;  %v412_v19 = vsel %vm9672_vm2, 0, %v411_v17  ;;  %v414_v20 = vld [vmem:[#allocation3 + $0x6c] sm:$0x1] }
  0x93   : > { %v417_v21 = vld [vmem:[#allocation3 + $0x78] sm:$0x1]  ;;  %410 = vst [vmem:[#allocation3 + $0x54] sm:$0x1] %v409_v18  ;;  %413 = vst [vmem:[#allocation3 + $0x60] sm:$0x1] %v412_v19 }
  0x94   : > { %v415_v22 = vsel %vm9672_vm2, 0, %v414_v20  ;;  %v418_v23 = vsel %vm9672_vm2, 0, %v417_v21  ;;  %v420_v24 = vld [vmem:[#allocation3 + $0x84] sm:$0x1]  ;;  %v423_v25 = vld [vmem:[#allocation3 + $0x90] sm:$0x1] }
  0x95   : > { %416 = vst [vmem:[#allocation3 + $0x6c] sm:$0x1] %v415_v22  ;;  %419 = vst [vmem:[#allocation3 + $0x78] sm:$0x1] %v418_v23  ;;  %v421_v26 = vsel %vm9672_vm2, 0, %v420_v24  ;;  %v424_v27 = vsel %vm9672_vm2, 0, %v423_v25 }
  0x96   : > { %v426_v29 = vld [vmem:[#allocation3 + $0x9c] sm:$0x1]  ;;  %v429_v30 = vld [vmem:[#allocation3 + $0xa8] sm:$0x1]  ;;  %422 = vst [vmem:[#allocation3 + $0x84] sm:$0x1] %v421_v26 }
  0x97   : > { %425 = vst [vmem:[#allocation3 + $0x90] sm:$0x1] %v424_v27  ;;  %v427_v31 = vsel %vm9672_vm2, 0, %v426_v29  ;;  %v430_v32 = vsel %vm9672_vm2, 0, %v429_v30  ;;  %v432_v33 = vld [vmem:[#allocation3 + $0xb4] sm:$0x1] }
  0x98   : > { %v435_v34 = vld [vmem:[#allocation3 + $0xc0] sm:$0x1]  ;;  %428 = vst [vmem:[#allocation3 + $0x9c] sm:$0x1] %v427_v31  ;;  %431 = vst [vmem:[#allocation3 + $0xa8] sm:$0x1] %v430_v32 }
  0x99   : > { %v433_v35 = vsel %vm9672_vm2, 0, %v432_v33  ;;  %v436_v36 = vsel %vm9672_vm2, 0, %v435_v34  ;;  %v438_v37 = vld [vmem:[#allocation3 + $0x14] sm:$0x1]  ;;  %v441_v38 = vld [vmem:[#allocation3 + $0x20] sm:$0x1] }
  0x9a   : > { %434 = vst [vmem:[#allocation3 + $0xb4] sm:$0x1] %v433_v35  ;;  %437 = vst [vmem:[#allocation3 + $0xc0] sm:$0x1] %v436_v36  ;;  %v439_v39 = vsel %vm9702_vm4, 0, %v438_v37  ;;  %v442_v40 = vsel %vm9702_vm4, 0, %v441_v38 }
  0x9b   : > { %v444_v41 = vld [vmem:[#allocation3 + $0x2c] sm:$0x1]  ;;  %v447_v42 = vld [vmem:[#allocation3 + $0x38] sm:$0x1]  ;;  %440 = vst [vmem:[#allocation3 + $0x14] sm:$0x1] %v439_v39 }
  0x9c   : > { %443 = vst [vmem:[#allocation3 + $0x20] sm:$0x1] %v442_v40  ;;  %v445_v43 = vsel %vm9702_vm4, 0, %v444_v41  ;;  %v448_v44 = vsel %vm9702_vm4, 0, %v447_v42  ;;  %v450_v45 = vld [vmem:[#allocation3 + $0x44] sm:$0x1] }
  0x9d   : > { %v453_v46 = vld [vmem:[#allocation3 + $0x50] sm:$0x1]  ;;  %446 = vst [vmem:[#allocation3 + $0x2c] sm:$0x1] %v445_v43  ;;  %449 = vst [vmem:[#allocation3 + $0x38] sm:$0x1] %v448_v44 }
  0x9e   : > { %v451_v47 = vsel %vm9702_vm4, 0, %v450_v45  ;;  %v454_v48 = vsel %vm9702_vm4, 0, %v453_v46  ;;  %v456_v49 = vld [vmem:[#allocation3 + $0x5c] sm:$0x1]  ;;  %v459_v50 = vld [vmem:[#allocation3 + $0x68] sm:$0x1] }
  0x9f   : > { %452 = vst [vmem:[#allocation3 + $0x44] sm:$0x1] %v451_v47  ;;  %455 = vst [vmem:[#allocation3 + $0x50] sm:$0x1] %v454_v48  ;;  %v457_v51 = vsel %vm9702_vm4, 0, %v456_v49  ;;  %v460_v52 = vsel %vm9702_vm4, 0, %v459_v50 }
  0xa0   : > { %v462_v53 = vld [vmem:[#allocation3 + $0x74] sm:$0x1]  ;;  %v465_v54 = vld [vmem:[#allocation3 + $0x80] sm:$0x1]  ;;  %458 = vst [vmem:[#allocation3 + $0x5c] sm:$0x1] %v457_v51 }
  0xa1   : > { %461 = vst [vmem:[#allocation3 + $0x68] sm:$0x1] %v460_v52  ;;  %v463_v55 = vsel %vm9702_vm4, 0, %v462_v53  ;;  %v466_v56 = vsel %vm9702_vm4, 0, %v465_v54  ;;  %v468_v57 = vld [vmem:[#allocation3 + $0x8c] sm:$0x1] }
  0xa2   : > { %v471_v58 = vld [vmem:[#allocation3 + $0x98] sm:$0x1]  ;;  %464 = vst [vmem:[#allocation3 + $0x74] sm:$0x1] %v463_v55  ;;  %467 = vst [vmem:[#allocation3 + $0x80] sm:$0x1] %v466_v56 }
  0xa3   : > { %v469_v59 = vsel %vm9702_vm4, 0, %v468_v57  ;;  %v472_v60 = vsel %vm9702_vm4, 0, %v471_v58  ;;  %v474_v61 = vld [vmem:[#allocation3 + $0xa4] sm:$0x1]  ;;  %v477_v62 = vld [vmem:[#allocation3 + $0xb0] sm:$0x1] }
  0xa4   : > { %470 = vst [vmem:[#allocation3 + $0x8c] sm:$0x1] %v469_v59  ;;  %473 = vst [vmem:[#allocation3 + $0x98] sm:$0x1] %v472_v60  ;;  %v475_v63 = vsel %vm9702_vm4, 0, %v474_v61  ;;  %v478_v0 = vsel %vm9702_vm4, 0, %v477_v62 }
  0xa5   : > { %v480_v2 = vld [vmem:[#allocation3 + $0xbc] sm:$0x1]  ;;  %v483_v3 = vld [vmem:[#allocation3 + $0xc8] sm:$0x1]  ;;  %476 = vst [vmem:[#allocation3 + $0xa4] sm:$0x1] %v475_v63 }
  0xa6   : > { %479 = vst [vmem:[#allocation3 + $0xb0] sm:$0x1] %v478_v0  ;;  %v481_v4 = vsel %vm9702_vm4, 0, %v480_v2  ;;  %v484_v5 = vsel %vm9702_vm4, 0, %v483_v3  ;;  %s9814_s26 = smov 0  }
  0xa7   : > { %482 = vst [vmem:[#allocation3 + $0xbc] sm:$0x1] %v481_v4  ;;  %485 = vst [vmem:[#allocation3 + $0xc8] sm:$0x1] %v484_v5 }
  0xa8 LB: >> { %s7719_s15 = sshll.u32 %s9424_s26, 6  ;;  %s7051_s16 = smul.u32 96, %s9424_s26  ;;  %vm513_vm5 = vsmask.f32 4368  ;;  %vm678_vm6 = vcmask 1043456   ;;  %v11718_v15 = vmov 0  ;;  %s9424_s26 = sphi %s9814_s26, %s491_s26  }
  0xa9   : >> { %s9822_s10 = scalar_lea.vmem %s9660_s12, %s7719_s15 [#allocation4]  ;;  %vm9832_vm7 = vmand %vm678_vm6, %vm332_vm3  ;;  %v11721_v19 = vmov 0  ;;  %s491_s26 = sadd.s32 1, %s9424_s26  }
  0xaa   : >> { %v496_v28 = vld [vmem:[%s9822_s10] sm:$0xf]  ;;  %v497_v6 = vld [vmem:[%s9822_s10 + $0x4] sm:$0xf]  ;;  %s9826_s28 = scalar_lea.vmem [#allocation2], %s7051_s16  ;;  %v11719_v15 = vsel %vm9832_vm7, 4294967295, %v11718_v15  ;;  %vm9839_vm8 = vmor %vm282_vm1, %vm513_vm5 }
  0xab   : >> { %v516_v7 = vshrl.u32 %v496_v28, 16  ;;  %v519_v8 = vshll.u32 %v496_v28, 16  ;;  %v524_v9 = vshrl.u32 %v497_v6, 16  ;;  %v527_v10 = vshll.u32 %v497_v6, 16  ;;  %v7052_v11 = vld [vmem:[%s9826_s28 + $0xc] sm:$0xf] }
  0xac   : >> { %v7055_v12 = vld [vmem:[%s9826_s28 + $0x14] sm:$0x1]  ;;  %v498_v13 = vld [vmem:[%s9822_s10 + $0x8] sm:$0xf]  ;;  %11720 = vst [vmem:[#allocation15_spill] sm:$0xff] %v11719_v15  ;;  %v11722_v19 = vsel %vm9839_vm8, 4294967295, %v11721_v19 }
  0xad   : >> { %v518_v14 = vrot.slane %v516_v7, 7  ;;  %v526_v16 = vrot.slane %v524_v9, 7  ;;  %v533_v17 = vshrl.u32 %v498_v13, 16  ;;  %v499_v18 = vld [vmem:[%s9822_s10 + $0xc] sm:$0xf]  ;;  %11723 = vst [vmem:[#allocation16_spill] sm:$0xff] %v11722_v19 }
  0xae   : >> { %v536_v20 = vshll.u32 %v498_v13, 16  ;;  %v541_v21 = vshrl.u32 %v499_v18, 16  ;;  %v544_v22 = vshll.u32 %v499_v18, 16  ;;  %v500_v23 = vld [vmem:[%s9822_s10 + $0x10] sm:$0xf]  ;;  %p488_p11 = scmp.ge.s32.totalorder %s491_s26, 2  }
  0xaf   : >> { %v521_v24 = vor.u32 %v519_v8, %v518_v14  ;;  %v522_v25 = vrot.slane %v518_v14, 4  ;;  %v529_v26 = vor.u32 %v527_v10, %v526_v16  ;;  %v531_v27 = vrot.slane %v526_v16, 4  ;;  %v501_v29 = vld [vmem:[%s9822_s10 + $0x14] sm:$0xf]  ;;  %v7057_v31 = vld [vmem:[%s9826_s28 + $0x18] sm:$0xf] }
  0xb0   : >> { %v535_v30 = vrot.slane %v533_v17, 7  ;;  %v543_v32 = vrot.slane %v541_v21, 7  ;;  %v550_v33 = vshrl.u32 %v500_v23, 16  ;;  %v553_v34 = vshll.u32 %v500_v23, 16  ;;  %v7060_v38 = vld [vmem:[%s9826_s28 + $0x20] sm:$0x1] }
  0xb1   : >> { %v681_v35 = vsel %vm9832_vm7, %v521_v24, %v7052_v11  ;;  %v530_v36 = vsel %vm9839_vm8, %v522_v25, %v529_v26  ;;  %v685_v37 = vsel %vm9672_vm2, %v531_v27, %v7055_v12  ;;  %v558_v39 = vshrl.u32 %v501_v29, 16  ;;  %v502_v40 = vld [vmem:[%s9822_s10 + $0x18] sm:$0xf]  ;;  %v503_v45 = vld [vmem:[%s9822_s10 + $0x1c] sm:$0xf]  ;;  %s9944_s13 = smov (%p488_p11), 0  }
  0xb2   : >> { %7053 = vst [vmem:[%s9826_s28 + $0xc] sm:$0xf] %v681_v35  ;;  %7054 = vst [vmem:[%s9826_s28 + $0x10] sm:$0xf] %v530_v36  ;;  %v538_v41 = vor.u32 %v536_v20, %v535_v30  ;;  %v539_v42 = vrot.slane %v535_v30, 4  ;;  %v546_v43 = vor.u32 %v544_v22, %v543_v32  ;;  %v548_v44 = vrot.slane %v543_v32, 4 }
  0xb3   : >> { %7056 = vst [vmem:[%s9826_s28 + $0x14] sm:$0x1] %v685_v37  ;;  %v552_v46 = vrot.slane %v550_v33, 7  ;;  %v560_v47 = vrot.slane %v558_v39, 7  ;;  %v561_v48 = vshll.u32 %v501_v29, 16  ;;  %v567_v49 = vshrl.u32 %v502_v40, 16 }
  0xb4   : >> { %v504_v50 = vld [vmem:[%s9822_s10 + $0x20] sm:$0xf]  ;;  %v688_v51 = vsel %vm9832_vm7, %v538_v41, %v7057_v31  ;;  %v547_v52 = vsel %vm9839_vm8, %v539_v42, %v546_v43  ;;  %v692_v53 = vsel %vm9672_vm2, %v548_v44, %v7060_v38  ;;  %v7062_v54 = vld [vmem:[%s9826_s28 + $0x24] sm:$0xf]  ;;  %v7065_v55 = vld [vmem:[%s9826_s28 + $0x2c] sm:$0x1] }
  0xb5   : >> { %v570_v56 = vshll.u32 %v502_v40, 16  ;;  %7058 = vst [vmem:[%s9826_s28 + $0x18] sm:$0xf] %v688_v51  ;;  %7059 = vst [vmem:[%s9826_s28 + $0x1c] sm:$0xf] %v547_v52  ;;  %v555_v57 = vor.u32 %v553_v34, %v552_v46  ;;  %v556_v58 = vrot.slane %v552_v46, 4  ;;  %v563_v59 = vor.u32 %v561_v48, %v560_v47 }
  0xb6   : >> { %7061 = vst [vmem:[%s9826_s28 + $0x20] sm:$0x1] %v692_v53  ;;  %v565_v60 = vrot.slane %v560_v47, 4  ;;  %v505_v61 = vld [vmem:[%s9822_s10 + $0x24] sm:$0xf]  ;;  %v569_v62 = vrot.slane %v567_v49, 7 }
  0xb7   : >> { %v575_v63 = vshrl.u32 %v503_v45, 16  ;;  %v578_v0 = vshll.u32 %v503_v45, 16  ;;  %v584_v2 = vshrl.u32 %v504_v50, 16  ;;  %v506_v3 = vld [vmem:[%s9822_s10 + $0x28] sm:$0xf]  ;;  %v695_v4 = vsel %vm9832_vm7, %v555_v57, %v7062_v54 }
  0xb8   : >> { %v564_v5 = vsel %vm9839_vm8, %v556_v58, %v563_v59  ;;  %v699_v28 = vsel %vm9672_vm2, %v565_v60, %v7065_v55  ;;  %v7067_v6 = vld [vmem:[%s9826_s28 + $0x30] sm:$0xf]  ;;  %v7070_v7 = vld [vmem:[%s9826_s28 + $0x38] sm:$0x1]  ;;  %v587_v8 = vshll.u32 %v504_v50, 16  ;;  %v572_v9 = vor.u32 %v570_v56, %v569_v62 }
  0xb9   : >> { %7063 = vst [vmem:[%s9826_s28 + $0x24] sm:$0xf] %v695_v4  ;;  %7064 = vst [vmem:[%s9826_s28 + $0x28] sm:$0xf] %v564_v5  ;;  %v573_v10 = vrot.slane %v569_v62, 4  ;;  %v577_v11 = vrot.slane %v575_v63, 7 }
  0xba   : >> { %7066 = vst [vmem:[%s9826_s28 + $0x2c] sm:$0x1] %v699_v28  ;;  %v586_v12 = vrot.slane %v584_v2, 7  ;;  %v507_v13 = vld [vmem:[%s9822_s10 + $0x2c] sm:$0xf]  ;;  %v592_v16 = vshrl.u32 %v505_v61, 16  ;;  %v702_v21 = vsel %vm9832_vm7, %v572_v9, %v7067_v6 }
  0xbb   : >> { %v7072_v14 = vld [vmem:[%s9826_s28 + $0x3c] sm:$0xf]  ;;  %v595_v17 = vshll.u32 %v505_v61, 16  ;;  %v601_v18 = vshrl.u32 %v506_v3, 16  ;;  %v604_v20 = vshll.u32 %v506_v3, 16  ;;  %v580_v22 = vor.u32 %v578_v0, %v577_v11 }
  0xbc   : >> { %v582_v23 = vrot.slane %v577_v11, 4  ;;  %v589_v24 = vor.u32 %v587_v8, %v586_v12  ;;  %v508_v25 = vld [vmem:[%s9822_s10 + $0x30] sm:$0xf]  ;;  %7068 = vst [vmem:[%s9826_s28 + $0x30] sm:$0xf] %v702_v21  ;;  %v590_v26 = vrot.slane %v586_v12, 4 }
  0xbd   : >> { %v594_v27 = vrot.slane %v592_v16, 7  ;;  %v603_v29 = vrot.slane %v601_v18, 7  ;;  %v609_v30 = vshrl.u32 %v507_v13, 16  ;;  %v509_v31 = vld [vmem:[%s9822_s10 + $0x34] sm:$0xf]  ;;  %v581_v32 = vsel %vm9839_vm8, %v573_v10, %v580_v22 }
  0xbe   : >> { %v706_v33 = vsel %vm9672_vm2, %v582_v23, %v7070_v7  ;;  %v709_v34 = vsel %vm9832_vm7, %v589_v24, %v7072_v14  ;;  %v7075_v35 = vld [vmem:[%s9826_s28 + $0x44] sm:$0x1]  ;;  %v7077_v36 = vld [vmem:[%s9826_s28 + $0x48] sm:$0xf]  ;;  %v612_v37 = vshll.u32 %v507_v13, 16  ;;  %v618_v44 = vshrl.u32 %v508_v25, 16 }
  0xbf   : >> { %7069 = vst [vmem:[%s9826_s28 + $0x34] sm:$0xf] %v581_v32  ;;  %7071 = vst [vmem:[%s9826_s28 + $0x38] sm:$0x1] %v706_v33  ;;  %v597_v38 = vor.u32 %v595_v17, %v594_v27  ;;  %v599_v39 = vrot.slane %v594_v27, 4  ;;  %v606_v40 = vor.u32 %v604_v20, %v603_v29  ;;  %v607_v41 = vrot.slane %v603_v29, 4 }
  0xc0   : >> { %7073 = vst [vmem:[%s9826_s28 + $0x3c] sm:$0xf] %v709_v34  ;;  %v510_v42 = vld [vmem:[%s9822_s10 + $0x38] sm:$0xf]  ;;  %v611_v43 = vrot.slane %v609_v30, 7  ;;  %v621_v45 = vshll.u32 %v508_v25, 16 }
  0xc1   : >> { %v626_v46 = vshrl.u32 %v509_v31, 16  ;;  %v511_v47 = vld [vmem:[%s9822_s10 + $0x3c] sm:$0xf]  ;;  %v598_v48 = vsel %vm9839_vm8, %v590_v26, %v597_v38  ;;  %v713_v49 = vsel %vm9672_vm2, %v599_v39, %v7075_v35  ;;  %v716_v50 = vsel %vm9832_vm7, %v606_v40, %v7077_v36  ;;  %v7080_v51 = vld [vmem:[%s9826_s28 + $0x50] sm:$0x1] }
  0xc2   : >> { %v629_v52 = vshll.u32 %v509_v31, 16  ;;  %7074 = vst [vmem:[%s9826_s28 + $0x40] sm:$0xf] %v598_v48  ;;  %7076 = vst [vmem:[%s9826_s28 + $0x44] sm:$0x1] %v713_v49  ;;  %v614_v53 = vor.u32 %v612_v37, %v611_v43  ;;  %v616_v54 = vrot.slane %v611_v43, 4 }
  0xc3   : >> { %7078 = vst [vmem:[%s9826_s28 + $0x48] sm:$0xf] %v716_v50  ;;  %v620_v55 = vrot.slane %v618_v44, 7  ;;  %v628_v56 = vrot.slane %v626_v46, 7  ;;  %v7082_v57 = vld [vmem:[%s9826_s28 + $0x54] sm:$0xf] }
  0xc4   : >> { %v635_v58 = vshrl.u32 %v510_v42, 16  ;;  %v638_v59 = vshll.u32 %v510_v42, 16  ;;  %v643_v60 = vshrl.u32 %v511_v47, 16  ;;  %v646_v61 = vshll.u32 %v511_v47, 16  ;;  %v7085_v3 = vld [vmem:[%s9826_s28 + $0x5c] sm:$0x1] }
  0xc5   : >> { %v615_v62 = vsel %vm9839_vm8, %v607_v41, %v614_v53  ;;  %v720_v63 = vsel %vm9672_vm2, %v616_v54, %v7080_v51  ;;  %v623_v0 = vor.u32 %v621_v45, %v620_v55  ;;  %v624_v2 = vrot.slane %v620_v55, 4  ;;  %v7087_v8 = vld [vmem:[%s9826_s28 + $0x60] sm:$0xf]  ;;  %v7090_v13 = vld [vmem:[%s9826_s28 + $0x68] sm:$0x1] }
  0xc6   : >> { %7079 = vst [vmem:[%s9826_s28 + $0x4c] sm:$0xf] %v615_v62  ;;  %7081 = vst [vmem:[%s9826_s28 + $0x50] sm:$0x1] %v720_v63  ;;  %v631_v4 = vor.u32 %v629_v52, %v628_v56  ;;  %v633_v5 = vrot.slane %v628_v56, 4  ;;  %v637_v28 = vrot.slane %v635_v58, 7 }
  0xc7   : >> { %v645_v6 = vrot.slane %v643_v60, 7  ;;  %v723_v7 = vsel %vm9832_vm7, %v623_v0, %v7082_v57  ;;  %490 = sbr.rel (!%p488_p11) target bundleno = 168 (0xa8), region = 144 }
  0xc8   : >> { %7083 = vst [vmem:[%s9826_s28 + $0x54] sm:$0xf] %v723_v7  ;;  %v632_v9 = vsel %vm9839_vm8, %v624_v2, %v631_v4  ;;  %v727_v10 = vsel %vm9672_vm2, %v633_v5, %v7085_v3  ;;  %v640_v11 = vor.u32 %v638_v59, %v637_v28  ;;  %v641_v12 = vrot.slane %v637_v28, 4 }
  0xc9   : >> { %7084 = vst [vmem:[%s9826_s28 + $0x58] sm:$0xf] %v632_v9  ;;  %7086 = vst [vmem:[%s9826_s28 + $0x5c] sm:$0x1] %v727_v10  ;;  %v648_v14 = vor.u32 %v646_v61, %v645_v6  ;;  %v650_v16 = vrot.slane %v645_v6, 4 }
  0xca   : >> { %v730_v17 = vsel %vm9832_vm7, %v640_v11, %v7087_v8 }
  0xcb   : >> { %7088 = vst [vmem:[%s9826_s28 + $0x60] sm:$0xf] %v730_v17  ;;  %v649_v18 = vsel %vm9839_vm8, %v641_v12, %v648_v14  ;;  %v734_v20 = vsel %vm9672_vm2, %v650_v16, %v7090_v13 }
  0xcc   : >> { %7089 = vst [vmem:[%s9826_s28 + $0x64] sm:$0xf] %v649_v18  ;;  %7091 = vst [vmem:[%s9826_s28 + $0x68] sm:$0x1] %v734_v20 }
  0xce LB: >> { %v9052_v21 = vld [vmem:[#allocation7 + $0x40] sm:$0xff]   ;;  %v9054_v23 = vld [vmem:[#allocation7 + $0x48] sm:$0xff]   ;;  %v9056_v25 = vld [vmem:[#allocation7 + $0x50] sm:$0xff]   ;;  %s7720_s9 = smul.u32 96, %s9428_s13  ;;  %vm786_vm9 = vsmask.f32 3328  ;;  %s9428_s13 = sphi %s9944_s13, %s741_s13  }
  0xcf   : >> { %v9053_v22 = vld [vmem:[#allocation7 + $0x100] sm:$0xff]   ;;  %8092 = vmatprep.subr.bf16.mxu1 %v9052_v21  ;;  %v9055_v24 = vld [vmem:[#allocation7 + $0x108] sm:$0xff]   ;;  %v9057_v26 = vld [vmem:[#allocation7 + $0x110] sm:$0xff]   ;;  %vm787_vm10 = vsmask.f32 7440  ;;  %vm1392_vm12 = vcmask 1042432  }
  0xd0   : >> { %8220 = vmatprep.subr.bf16.mxu0 %v9053_v22  ;;  %8093 = vmatpush3.bf16.msra.mxu1 %v9052_v21  ;;  %v9058_v27 = vld [vmem:[#allocation7 + $0x58] sm:$0xff]   ;;  %v9060_v30 = vld [vmem:[#allocation7 + $0x60] sm:$0xff]   ;;  %v9062_v32 = vld [vmem:[#allocation7 + $0x68] sm:$0xff]   ;;  %s9952_s30 = scalar_lea.vmem [#allocation2], %s7720_s9  ;;  %vm1393_vm13 = vcmask 1046532   ;;  %s10765_s7 = scalar_lea.vmem [#allocation3], %s7720_s9 }
  0xd1   : >> { %8221 = vmatpush3.bf16.msra.mxu0 %v9053_v22  ;;  %8094 = vmatprep.subr.bf16.mxu1 %v9054_v23  ;;  %v9059_v29 = vld [vmem:[#allocation7 + $0x118] sm:$0xff]   ;;  %v9061_v31 = vld [vmem:[#allocation7 + $0x120] sm:$0xff]   ;;  %v9063_v33 = vld [vmem:[#allocation7 + $0x128] sm:$0xff]   ;;  %s741_s13 = sadd.s32 1, %s9428_s13  }
  0xd2   : >> { %8222 = vmatprep.subr.bf16.mxu0 %v9055_v24  ;;  %v9064_v47 = vld [vmem:[#allocation7 + $0x70] sm:$0xff]   ;;  %v9066_v57 = vld [vmem:[#allocation7 + $0x78] sm:$0xff]   ;;  %vm9982_vm11 = vmor %vm786_vm9, %vm787_vm10  ;;  %p738_p0 = scmp.ge.s32.totalorder %s741_s13, 2  }
  0xd3   : >> { %v9955_v34 = vld [vmem:[%s9952_s30] sm:$0xf]  ;;  %v9958_v35 = vld [vmem:[%s9952_s30 + $0x4] sm:$0xf]  ;;  %v9961_v36 = vld [vmem:[%s9952_s30 + $0x8] sm:$0x1] }
  0xd4   : >> { %8095 = vmatpush3.bf16.msra.mxu1 %v9054_v23  ;;  %v790_v37 = vshrl.u32 %v9955_v34, 16  ;;  %v793_v38 = vshll.u32 %v9955_v34, 16  ;;  %v799_v39 = vshll.u32 %v9958_v35, 16  ;;  %v803_v40 = vshrl.u32 %v9958_v35, 16  ;;  %v7185_v42 = vld [vmem:[%s9952_s30 + $0xc] sm:$0xf]  ;;  %vm10222_vm14 = vmor %vm1392_vm12, %vm1393_vm13 }
  0xd5   : >> { %8223 = vmatpush3.bf16.msra.mxu0 %v9055_v24  ;;  %8096 = vmatprep.subr.bf16.mxu1 %v9056_v25  ;;  %v809_v41 = vshll.u32 %v9961_v36, 16  ;;  %v9970_v45 = vld [vmem:[%s9952_s30 + $0x10] sm:$0xf]  ;;  %v9973_v46 = vld [vmem:[%s9952_s30 + $0x14] sm:$0x1]  ;;  %v1932_v50 = vshrl.u32 %v7185_v42, 16 }
  0xd6   : >> { %8224 = vmatprep.subr.bf16.mxu0 %v9057_v26  ;;  %v792_v43 = vrot.slane %v790_v37, 4  ;;  %v795_v44 = vrot.slane %v793_v38, 5  ;;  %v801_v48 = vrot.slane %v799_v39, 5  ;;  %v805_v49 = vrot.slane %v803_v40, 4  ;;  %v9065_v51 = vld [vmem:[#allocation7 + $0x130] sm:$0xff]   ;;  %v9067_v8 = vld [vmem:[#allocation7 + $0x138] sm:$0xff]  }
  0xd7   : >> { %v1935_v53 = vshll.u32 %v7185_v42, 16  ;;  %v1941_v54 = vshll.u32 %v9970_v45, 16  ;;  %v1945_v55 = vshrl.u32 %v9970_v45, 16  ;;  %v9978_v56 = vld [vmem:[%s9952_s30 + $0xc] sm:$0xf]  ;;  %v811_v60 = vrot.slane %v809_v41, 5 }
  0xd8   : >> { %8097 = vmatpush3.bf16.msra.mxu1 %v9056_v25  ;;  %v796_v52 = vor.u32 %v795_v44, %v792_v43  ;;  %v806_v59 = vor.u32 %v805_v49, %v801_v48  ;;  %v1934_v61 = vrot.slane %v1932_v50, 4  ;;  %v1951_v62 = vshll.u32 %v9973_v46, 16  ;;  %v9988_v63 = vld [vmem:[%s9952_s30 + $0x10] sm:$0xf]  ;;  %v9995_v12 = vld [vmem:[%s9952_s30 + $0x14] sm:$0x1] }
  0xd9   : >> { %8225 = vmatpush3.bf16.msra.mxu0 %v9057_v26  ;;  %8098 = vmatprep.subr.bf16.mxu1 %v9058_v27  ;;  %v1937_v2 = vrot.slane %v1935_v53, 5  ;;  %v1943_v3 = vrot.slane %v1941_v54, 5  ;;  %v1947_v4 = vrot.slane %v1945_v55, 4  ;;  %v814_v6 = vshrl.u32 %v9978_v56, 16  ;;  %v7188_v14 = vld [vmem:[%s9952_s30 + $0x18] sm:$0xf] }
  0xda   : >> { %8226 = vmatprep.subr.bf16.mxu0 %v9059_v29  ;;  %v797_v0 = vrot.slane %v796_v52, 4  ;;  %v807_v5 = vrot.slane %v806_v59, 4  ;;  %v1953_v28 = vrot.slane %v1951_v62, 5  ;;  %v817_v7 = vshll.u32 %v9978_v56, 16  ;;  %v10003_v21 = vld [vmem:[%s9952_s30 + $0x1c] sm:$0xf] }
  0xdb   : >> { %v1938_v10 = vor.u32 %v1937_v2, %v1934_v61  ;;  %v1948_v11 = vor.u32 %v1947_v4, %v1943_v3  ;;  %v823_v13 = vshll.u32 %v9988_v63, 16  ;;  %v816_v17 = vrot.slane %v814_v6, 4  ;;  %v9068_v26 = vld [vmem:[#allocation7] sm:$0xff]   ;;  %v10018_v50 = vld [vmem:[%s9952_s30 + $0x18] sm:$0xf]  ;;  %s10892_s6 = smov (%p738_p0), 0  }
  0xdc   : >> { %8099 = vmatpush3.bf16.msra.mxu1 %v9058_v27  ;;  %v802_v9 = vsel %vm9982_vm11, %v797_v0, %v801_v48  ;;  %v812_v16 = vsel %vm9982_vm11, %v807_v5, %v811_v60  ;;  %v819_v18 = vrot.slane %v817_v7, 5  ;;  %v827_v20 = vshrl.u32 %v9988_v63, 16  ;;  %v10005_v27 = vld [vmem:[#allocation7 + $0x140] sm:$0xff]   ;;  %v10026_v60 = vld [vmem:[%s9952_s30 + $0x1c] sm:$0xf] }
  0xdd   : >> { %8227 = vmatpush3.bf16.msra.mxu0 %v9059_v29  ;;  %8100 = vmatprep.subr.bf16.mxu1 %v9060_v30  ;;  %v7095_v22 = vcombine.low %v802_v9, %v812_v16  ;;  %v1939_v23 = vrot.slane %v1938_v10, 4  ;;  %v1949_v24 = vrot.slane %v1948_v11, 4  ;;  %v825_v25 = vrot.slane %v823_v13, 5  ;;  %v780_v61 = vld [vmem:[%s9952_s30 + $0x20] sm:$0x1]  ;;  %v9070_v7 = vld [vmem:[#allocation7 + $0x8] sm:$0xff]  }
  0xde   : >> { %8228 = vmatprep.subr.bf16.mxu0 %v9061_v31  ;;  %v820_v29 = vor.u32 %v819_v18, %v816_v17  ;;  %v1956_v38 = vshrl.u32 %v7188_v14, 16  ;;  %v1959_v39 = vshll.u32 %v7188_v14, 16  ;;  %v1965_v48 = vshll.u32 %v10003_v21, 16  ;;  %v7191_v4 = vld [vmem:[%s9952_s30 + $0x24] sm:$0xf] }
  0xdf   : >> { %8108 = vmatprep.mubr.bf16.mxu1 %v7095_v22  ;;  %v1954_v37 = vsel %vm9982_vm11, %v1949_v24, %v1953_v28  ;;  %v1969_v49 = vshrl.u32 %v10003_v21, 16  ;;  %v847_v10 = vshll.u32 %v10026_v60, 16  ;;  %v851_v11 = vshrl.u32 %v10026_v60, 16  ;;  %v10038_v14 = vld [vmem:[%s9952_s30 + $0x28] sm:$0xf]  ;;  %v9071_v24 = vld [vmem:[#allocation7 + $0x148] sm:$0xff]  }
  0xe0   : >> { %8101 = vmatpush3.bf16.msra.mxu1 %v9060_v30  ;;  %v829_v30 = vrot.slane %v827_v20, 4  ;;  %v821_v41 = vrot.slane %v820_v29, 4  ;;  %v1958_v44 = vrot.slane %v1956_v38, 4  ;;  %v857_v13 = vshll.u32 %v780_v61, 16  ;;  %v10043_v20 = vld [vmem:[%s9952_s30 + $0x2c] sm:$0x1] }
  0xe1   : >> { %8229 = vmatpush3.bf16.msra.mxu0 %v9061_v31  ;;  %8102 = vmatprep.subr.bf16.mxu1 %v9062_v32  ;;  %v833_v31 = vshll.u32 %v9995_v12, 16  ;;  %v1971_v59 = vrot.slane %v1969_v49, 4  ;;  %v1980_v22 = vshrl.u32 %v7191_v4, 16  ;;  %v853_v29 = vrot.slane %v851_v11, 4 }
  0xe2   : >> { %8230 = vmatprep.subr.bf16.mxu0 %v9063_v33  ;;  %v830_v42 = vor.u32 %v829_v30, %v825_v25  ;;  %v826_v52 = vsel %vm9982_vm11, %v821_v41, %v825_v25  ;;  %v849_v25 = vrot.slane %v847_v10, 5  ;;  %v859_v30 = vrot.slane %v857_v13, 5 }
  0xe3   : >> { %v835_v43 = vrot.slane %v833_v31, 5  ;;  %v1983_v31 = vshll.u32 %v7191_v4, 16 }
  0xe4   : >> { %8103 = vmatpush3.bf16.msra.mxu1 %v9062_v32  ;;  %v10009_v32 = vld [vmem:[%s9952_s30 + $0x20] sm:$0x1]  ;;  %v831_v53 = vrot.slane %v830_v42, 4 }
  0xe5   : >> { %8231 = vmatpush3.bf16.msra.mxu0 %v9063_v33  ;;  %8104 = vmatprep.subr.bf16.mxu1 %v9064_v47  ;;  %v1944_v33 = vsel %vm9982_vm11, %v1939_v23, %v1943_v3  ;;  %v1975_v54 = vshll.u32 %v10009_v32, 16  ;;  %v838_v3 = vshrl.u32 %v10018_v50, 16  ;;  %v9072_v23 = vld [vmem:[#allocation7 + $0x10] sm:$0xff]   ;;  %v1985_v42 = vrot.slane %v1983_v31, 5 }
  0xe6   : >> { %8232 = vmatprep.subr.bf16.mxu0 %v9065_v51  ;;  %v7209_v40 = vcombine.low %v1944_v33, %v1954_v37  ;;  %v836_v62 = vsel %vm9982_vm11, %v831_v53, %v835_v43  ;;  %v10046_v33 = vld [vmem:[%s9952_s30 + $0x24] sm:$0xf]  ;;  %v1993_v43 = vshrl.u32 %v10038_v14, 16 }
  0xe7   : >> { %v1977_v0 = vrot.slane %v1975_v54, 5  ;;  %v7096_v5 = vcombine.low %v826_v52, %v836_v62  ;;  %v840_v9 = vrot.slane %v838_v3, 4  ;;  %v1999_v52 = vshll.u32 %v10043_v20, 16  ;;  %v7194_v54 = vld [vmem:[%s9952_s30 + $0x30] sm:$0xf] }
  0xe8   : >> { %8105 = vmatpush3.bf16.msra.mxu1 %v9064_v47  ;;  %v1961_v47 = vrot.slane %v1959_v39, 5  ;;  %8236 = vmatprep.mubr.bf16.mxu0 %v7209_v40  ;;  %v1982_v39 = vrot.slane %v1980_v22, 4  ;;  %v1989_v40 = vshll.u32 %v10038_v14, 16  ;;  %v862_v53 = vshrl.u32 %v10046_v33, 16  ;;  %v10063_v62 = vld [vmem:[%s9952_s30 + $0x34] sm:$0xf] }
  0xe9   : >> { %8233 = vmatpush3.bf16.msra.mxu0 %v9065_v51  ;;  %8106 = vmatprep.subr.bf16.mxu1 %v9066_v57  ;;  %v865_v61 = vshll.u32 %v10046_v33, 16  ;;  %v2001_v4 = vrot.slane %v1999_v52, 5 }
  0xea   : >> { %8234 = vmatprep.subr.bf16.mxu0 %v9067_v8  ;;  %v1962_v55 = vor.u32 %v1961_v47, %v1958_v44  ;;  %v10053_v44 = vld [vmem:[%s9952_s30 + $0x28] sm:$0xf]  ;;  %v10056_v47 = vld [vmem:[%s9952_s30 + $0x2c] sm:$0x1]  ;;  %v1991_v49 = vrot.slane %v1989_v40, 5 }
  0xeb   : >> { %v867_v10 = vrot.slane %v865_v61, 5  ;;  %v10080_v40 = vld [vmem:[%s9952_s30 + $0x30] sm:$0xf] }
  0xec   : >> { %8107 = vmatpush3.bf16.msra.mxu1 %v9066_v57  ;;  %v1967_v57 = vrot.slane %v1965_v48, 5  ;;  %v1963_v28 = vrot.slane %v1962_v55, 4 }
  0xed   : >> { %8235 = vmatpush3.bf16.msra.mxu0 %v9067_v8  ;;  %8124 = vmatprep.subr.bf16.mxu1 %v9068_v26  ;;  %v841_v8 = vshll.u32 %v10018_v50, 16 }
  0xee   : >> { %8252 = vmatprep.subr.bf16.mxu0 %v10005_v27  ;;  %v1972_v6 = vor.u32 %v1971_v59, %v1967_v57  ;;  %v1968_v16 = vsel %vm9982_vm11, %v1963_v28, %v1967_v57  ;;  %v1986_v57 = vor.u32 %v1985_v42, %v1982_v39  ;;  %v1995_v59 = vrot.slane %v1993_v43, 4 }
  0xef   : >> { %8109 = vmatmul.mubr.bf16.vlgmr.msra.gmra.mrb[0].mxu1 %v7096_v5  ;;  %v843_v18 = vrot.slane %v841_v8, 5  ;;  %v864_v5 = vrot.slane %v862_v53, 4  ;;  %v871_v28 = vshll.u32 %v10053_v44, 16  ;;  %v2013_v39 = vshll.u32 %v10063_v62, 16 }
  0xf0   : >> { %v1973_v17 = vrot.slane %v1972_v6, 4  ;;  %8125 = vmatpush3.bf16.msra.mxu1 %v9068_v26  ;;  %v854_v26 = vor.u32 %v853_v29, %v849_v25  ;;  %v9074_v6 = vld [vmem:[#allocation7 + $0x18] sm:$0xff]   ;;  %v1987_v8 = vrot.slane %v1986_v57, 4  ;;  %v2004_v29 = vshrl.u32 %v7194_v54, 16 }
  0xf1   : >> { %8126 = vmatprep.subr.bf16.mxu1 %v9070_v7  ;;  %v844_v38 = vor.u32 %v843_v18, %v840_v9  ;;  %v1996_v9 = vor.u32 %v1995_v59, %v1991_v49  ;;  %v873_v13 = vrot.slane %v871_v28, 5  ;;  %v868_v22 = vor.u32 %v867_v10, %v864_v5 }
  0xf2   : >> { %v1978_v37 = vsel %vm9982_vm11, %v1973_v17, %v1977_v0  ;;  %v855_v55 = vrot.slane %v854_v26, 4  ;;  %v9073_v0 = vld [vmem:[#allocation7 + $0x150] sm:$0xff]   ;;  %v1992_v17 = vsel %vm9982_vm11, %v1987_v8, %v1991_v49  ;;  %v2006_v42 = vrot.slane %v2004_v29, 4 }
  0xf3   : >> { %v7210_v41 = vcombine.low %v1968_v16, %v1978_v37  ;;  %v845_v48 = vrot.slane %v844_v38, 4  ;;  %v881_v16 = vshll.u32 %v10056_v47, 16  ;;  %v1997_v18 = vrot.slane %v1996_v9, 4 }
  0xf4   : >> { %8127 = vmatpush3.bf16.msra.mxu1 %v9070_v7  ;;  %v860_v7 = vsel %vm9982_vm11, %v855_v55, %v859_v30  ;;  %v9075_v30 = vld [vmem:[#allocation7 + $0x158] sm:$0xff]   ;;  %v2007_v38 = vshll.u32 %v7194_v54, 16  ;;  %v869_v26 = vrot.slane %v868_v22, 4  ;;  %v2017_v43 = vshrl.u32 %v10063_v62, 16 }
  0xf5   : >> { %8237 = vmatmul.mubr.bf16.vlgmr.msra.gmra.mrb[0].mxu0 %v7210_v41  ;;  %v850_v3 = vsel %vm9982_vm11, %v845_v48, %v849_v25  ;;  %8128 = vmatprep.subr.bf16.mxu1 %v9072_v23  ;;  %v10076_v25 = vld [vmem:[%s9952_s30 + $0x38] sm:$0x1]  ;;  %v883_v37 = vrot.slane %v881_v16, 5  ;;  %v2002_v41 = vsel %vm9982_vm11, %v1997_v18, %v2001_v4  ;;  %v2015_v53 = vrot.slane %v2013_v39, 5  ;;  %v10102_v18 = vld [vmem:[%s9952_s30 + $0x40] sm:$0xf] }
  0xf6   : >> { %8253 = vmatpush3.bf16.msra.mxu0 %v10005_v27  ;;  %v7097_v11 = vcombine.low %v850_v3, %v860_v7  ;;  %v875_v27 = vshrl.u32 %v10053_v44, 16  ;;  %v7211_v48 = vcombine.low %v1992_v17, %v2002_v41  ;;  %v2009_v52 = vrot.slane %v2007_v38, 5  ;;  %v10093_v4 = vld [vmem:[%s9952_s30 + $0x38] sm:$0x1]  ;;  %v9080_v39 = vld [vmem:[#allocation7 + $0x30] sm:$0xff]  }
  0xf7   : >> { %8254 = vmatprep.subr.bf16.mxu0 %v9071_v24  ;;  %v874_v54 = vsel %vm9982_vm11, %v869_v26, %v873_v13  ;;  %v2019_v55 = vrot.slane %v2017_v43, 4  ;;  %v2023_v57 = vshll.u32 %v10076_v25, 16  ;;  %v886_v59 = vshrl.u32 %v10080_v40, 16  ;;  %v9078_v7 = vld [vmem:[#allocation7 + $0x28] sm:$0xff]  }
  0xf8   : >> { %8129 = vmatpush3.bf16.msra.mxu1 %v9072_v23  ;;  %8112 = vmatprep.mubr.bf16.mxu1 %v7097_v11  ;;  %v877_v31 = vrot.slane %v875_v27, 4  ;;  %v10086_v23 = vld [vmem:[%s9952_s30 + $0x34] sm:$0xf]  ;;  %v2010_v3 = vor.u32 %v2009_v52, %v2006_v42  ;;  %v889_v5 = vshll.u32 %v10080_v40, 16  ;;  %v7197_v11 = vld [vmem:[%s9952_s30 + $0x3c] sm:$0xf] }
  0xf9   : >> { %8130 = vmatprep.subr.bf16.mxu1 %v9074_v6  ;;  %8240 = vmatprep.mubr.bf16.mxu0 %v7211_v48  ;;  %v895_v28 = vshll.u32 %v10086_v23, 16  ;;  %v2020_v8 = vor.u32 %v2019_v55, %v2015_v53  ;;  %v2025_v9 = vrot.slane %v2023_v57, 5  ;;  %v888_v10 = vrot.slane %v886_v59, 4  ;;  %v9079_v48 = vld [vmem:[#allocation7 + $0x168] sm:$0xff]  }
  0xfa   : >> { %8255 = vmatpush3.bf16.msra.mxu0 %v9071_v24  ;;  %v9076_v24 = vld [vmem:[#allocation7 + $0x20] sm:$0xff]   ;;  %v878_v49 = vor.u32 %v877_v31, %v873_v13  ;;  %v2011_v27 = vrot.slane %v2010_v3, 4  ;;  %v891_v16 = vrot.slane %v889_v5, 5  ;;  %v905_v38 = vshll.u32 %v10093_v4, 16  ;;  %v10114_v55 = vld [vmem:[%s9952_s30 + $0x3c] sm:$0xf] }
  0xfb   : >> { %8256 = vmatprep.subr.bf16.mxu0 %v9073_v0  ;;  %v9077_v13 = vld [vmem:[#allocation7 + $0x160] sm:$0xff]   ;;  %v897_v17 = vrot.slane %v895_v28, 5  ;;  %v2021_v29 = vrot.slane %v2020_v8, 4  ;;  %v2028_v42 = vshrl.u32 %v7197_v11, 16  ;;  %v2031_v43 = vshll.u32 %v7197_v11, 16  ;;  %v9082_v5 = vld [vmem:[#allocation7 + $0x38] sm:$0xff]  }
  0xfc   : >> { %8131 = vmatpush3.bf16.msra.mxu1 %v9074_v6  ;;  %v879_v61 = vrot.slane %v878_v49, 4  ;;  %v899_v6 = vshrl.u32 %v10086_v23, 16  ;;  %v2016_v41 = vsel %vm9982_vm11, %v2011_v27, %v2015_v53  ;;  %v892_v26 = vor.u32 %v891_v16, %v888_v10  ;;  %v10120_v3 = vld [vmem:[%s9952_s30 + $0x44] sm:$0x1] }
  0xfd   : >> { %8132 = vmatprep.subr.bf16.mxu1 %v9076_v24  ;;  %v2026_v49 = vsel %vm9982_vm11, %v2021_v29, %v2025_v9  ;;  %v2030_v59 = vrot.slane %v2028_v42, 4  ;;  %11726 = vst [vmem:[#allocation17_spill] sm:$0xff] %v10120_v3  ;;  %v2041_v9 = vshrl.u32 %v10102_v18, 16  ;;  %v910_v27 = vshrl.u32 %v10114_v55, 16 }
  0xfe   : >> { %8257 = vmatpush3.bf16.msra.mxu0 %v9073_v0  ;;  %v884_v0 = vsel %vm9982_vm11, %v879_v61, %v883_v37  ;;  %v901_v31 = vrot.slane %v899_v6, 4  ;;  %v10108_v37 = vld [vmem:[%s9952_s30 + $0x44] sm:$0x1]  ;;  %v7212_v53 = vcombine.low %v2016_v41, %v2026_v49  ;;  %v893_v57 = vrot.slane %v892_v26, 4  ;;  %v7200_v6 = vld [vmem:[%s9952_s30 + $0x48] sm:$0xf] }
  0xff   : >> { %8258 = vmatprep.subr.bf16.mxu0 %v9075_v30  ;;  %v7098_v22 = vcombine.low %v874_v54, %v884_v0  ;;  %v2037_v54 = vshll.u32 %v10102_v18, 16  ;;  %v2033_v61 = vrot.slane %v2031_v43, 5  ;;  %v2047_v10 = vshll.u32 %v10108_v37, 16  ;;  %v9081_v43 = vld [vmem:[#allocation7 + $0x170] sm:$0xff]  }
 0x100   : >> { %8133 = vmatpush3.bf16.msra.mxu1 %v9076_v24  ;;  %v902_v52 = vor.u32 %v901_v31, %v897_v17  ;;  %v907_v24 = vrot.slane %v905_v38, 5  ;;  %8241 = vmatmul.mubr.bf16.gmra.mrb[4].mxu0 %v7212_v53  ;;  %v898_v11 = vsel %vm9982_vm11, %v893_v57, %v897_v17  ;;  %v913_v16 = vshll.u32 %v10114_v55, 16 }
 0x101   : >> { %8134 = vmatprep.subr.bf16.mxu1 %v9078_v7  ;;  %8113 = vmatmul.mubr.bf16.gmra.mrb[4].mxu1 %v7098_v22  ;;  %v2039_v8 = vrot.slane %v2037_v54, 5  ;;  %v2034_v0 = vor.u32 %v2033_v61, %v2030_v59  ;;  %v10130_v22 = vld [vmem:[%s9952_s30 + $0x4c] sm:$0xf]  ;;  %v2043_v31 = vrot.slane %v2041_v9, 4  ;;  %v2049_v38 = vrot.slane %v2047_v10, 5 }
 0x102   : >> { %8259 = vmatpush3.bf16.msra.mxu0 %v9075_v30  ;;  %v10117_v30 = vld [vmem:[%s9952_s30 + $0x40] sm:$0xf]  ;;  %v903_v28 = vrot.slane %v902_v52, 4  ;;  %v912_v17 = vrot.slane %v910_v27, 4  ;;  %v915_v42 = vrot.slane %v913_v16, 5  ;;  %v929_v53 = vshll.u32 %v10120_v3, 16 }
 0x103   : >> { %8260 = vmatprep.subr.bf16.mxu0 %v9077_v13  ;;  %v919_v41 = vshll.u32 %v10117_v30, 16  ;;  %v2035_v26 = vrot.slane %v2034_v0, 4  ;;  %v2044_v49 = vor.u32 %v2043_v31, %v2039_v8  ;;  %v923_v54 = vshrl.u32 %v10117_v30, 16  ;;  %v10147_v31 = vld [vmem:[%s9952_s30 + $0x48] sm:$0xf] }
 0x104   : >> { %8135 = vmatpush3.bf16.msra.mxu1 %v9078_v7  ;;  %v908_v29 = vsel %vm9982_vm11, %v903_v28, %v907_v24  ;;  %v916_v57 = vor.u32 %v915_v42, %v912_v17  ;;  %v2052_v59 = vshrl.u32 %v7200_v6, 16  ;;  %v2055_v61 = vshll.u32 %v7200_v6, 16  ;;  %v10142_v28 = vld [vmem:[#allocation7 + $0x80] sm:$0xff]   ;;  %v10153_v17 = vld [vmem:[%s9952_s30 + $0x4c] sm:$0xf] }
 0x105   : >> { %8136 = vmatprep.subr.bf16.mxu1 %v9080_v39  ;;  %v7099_v7 = vcombine.low %v898_v11, %v908_v29  ;;  %v921_v52 = vrot.slane %v919_v41, 5  ;;  %v2040_v24 = vsel %vm9982_vm11, %v2035_v26, %v2039_v8  ;;  %v2045_v9 = vrot.slane %v2044_v49, 4 }
 0x106   : >> { %8261 = vmatpush3.bf16.msra.mxu0 %v9077_v13  ;;  %v10140_v13 = vld [vmem:[%s9952_s30 + $0x50] sm:$0x1]  ;;  %v925_v10 = vrot.slane %v923_v54, 4  ;;  %v931_v11 = vrot.slane %v929_v53, 5  ;;  %v2061_v0 = vshll.u32 %v10130_v22, 16  ;;  %v917_v27 = vrot.slane %v916_v57, 4 }
 0x107   : >> { %8262 = vmatprep.subr.bf16.mxu0 %v9079_v48  ;;  %8116 = vmatprep.mubr.bf16.mxu1 %v7099_v7  ;;  %v2054_v8 = vrot.slane %v2052_v59, 4  ;;  %v2057_v16 = vrot.slane %v2055_v61, 5  ;;  %v2065_v29 = vshrl.u32 %v10130_v22, 16  ;;  %v2050_v6 = vsel %vm9982_vm11, %v2045_v9, %v2049_v38  ;;  %v10158_v53 = vld [vmem:[%s9952_s30 + $0x50] sm:$0x1] }
 0x108   : >> { %8137 = vmatpush3.bf16.msra.mxu1 %v9080_v39  ;;  %v9083_v39 = vld [vmem:[#allocation7 + $0x178] sm:$0xff]   ;;  %v926_v41 = vor.u32 %v925_v10, %v921_v52  ;;  %v2063_v7 = vrot.slane %v2061_v0, 5  ;;  %v2071_v26 = vshll.u32 %v10140_v13, 16  ;;  %v922_v42 = vsel %vm9982_vm11, %v917_v27, %v921_v52  ;;  %11727 = vst [vmem:[#allocation18_spill] sm:$0xff] %v10158_v53  ;;  %v7203_v57 = vld [vmem:[%s9952_s30 + $0x54] sm:$0xf] }
 0x109   : >> { %8138 = vmatprep.subr.bf16.mxu1 %v9082_v5  ;;  %v2058_v49 = vor.u32 %v2057_v16, %v2054_v8  ;;  %v2067_v54 = vrot.slane %v2065_v29, 4  ;;  %v934_v61 = vshrl.u32 %v10147_v31, 16  ;;  %v937_v9 = vshll.u32 %v10147_v31, 16  ;;  %v10166_v0 = vld [vmem:[#allocation7 + $0x180] sm:$0xff]   ;;  %v10172_v29 = vld [vmem:[%s9952_s30 + $0x58] sm:$0xf] }
 0x10a   : >> { %8263 = vmatpush3.bf16.msra.mxu0 %v9079_v48  ;;  %v7213_v48 = vcombine.low %v2040_v24, %v2050_v6  ;;  %v927_v59 = vrot.slane %v926_v41, 4  ;;  %v2073_v38 = vrot.slane %v2071_v26, 5  ;;  %v943_v24 = vshll.u32 %v10153_v17, 16 }
 0x10b   : >> { %8264 = vmatprep.subr.bf16.mxu0 %v9081_v43  ;;  %v2068_v52 = vor.u32 %v2067_v54, %v2063_v7  ;;  %v947_v10 = vshrl.u32 %v10153_v17, 16  ;;  %v936_v8 = vrot.slane %v934_v61, 4  ;;  %v939_v16 = vrot.slane %v937_v9, 5  ;;  %v10180_v54 = vld [vmem:[%s9952_s30 + $0x54] sm:$0xf] }
 0x10c   : >> { %8139 = vmatpush3.bf16.msra.mxu1 %v9082_v5  ;;  %8244 = vmatprep.mubr.bf16.mxu0 %v7213_v48  ;;  %v2059_v5 = vrot.slane %v2058_v49, 4  ;;  %v932_v27 = vsel %vm9982_vm11, %v927_v59, %v931_v11  ;;  %v945_v48 = vrot.slane %v943_v24, 5  ;;  %v10177_v49 = vld [vmem:[%s9952_s30 + $0x5c] sm:$0x1]  ;;  %v2076_v11 = vshrl.u32 %v7203_v57, 16 }
 0x10d   : >> { %8156 = vmatprep.subr.bf16.mxu1 %v10142_v28  ;;  %v7100_v6 = vcombine.low %v922_v42, %v932_v27  ;;  %v2069_v26 = vrot.slane %v2068_v52, 4  ;;  %v940_v51 = vor.u32 %v939_v16, %v936_v8  ;;  %v949_v2 = vrot.slane %v947_v10, 4  ;;  %v10183_v59 = vld [vmem:[%s9952_s30 + $0x58] sm:$0xf]  ;;  %v10192_v16 = vld [vmem:[%s9952_s30 + $0x5c] sm:$0x1] }
 0x10e   : >> { %8265 = vmatpush3.bf16.msra.mxu0 %v9081_v43  ;;  %v953_v43 = vshll.u32 %v10158_v53, 16  ;;  %v2064_v41 = vsel %vm9982_vm11, %v2059_v5, %v2063_v7  ;;  %v2079_v7 = vshll.u32 %v7203_v57, 16  ;;  %v2085_v61 = vshll.u32 %v10172_v29, 16  ;;  %v7206_v57 = vld [vmem:[%s9952_s30 + $0x60] sm:$0xf] }
 0x10f   : >> { %8266 = vmatprep.subr.bf16.mxu0 %v9083_v39  ;;  %8117 = vmatmul.mubr.bf16.gmra.mrb[8].mxu1 %v7100_v6  ;;  %v2074_v42 = vsel %vm9982_vm11, %v2069_v26, %v2073_v38  ;;  %v2089_v9 = vshrl.u32 %v10172_v29, 16  ;;  %v941_v52 = vrot.slane %v940_v51, 4  ;;  %v950_v24 = vor.u32 %v949_v2, %v945_v48  ;;  %v10207_v53 = vld [vmem:[%s9952_s30 + $0x68] sm:$0x1] }
 0x110   : >> { %v955_v1 = vrot.slane %v953_v43, 5  ;;  %v7214_v5 = vcombine.low %v2064_v41, %v2074_v42  ;;  %v2078_v10 = vrot.slane %v2076_v11, 4  ;;  %v2087_v27 = vrot.slane %v2085_v61, 5 }
 0x111   : >> { %v2091_v8 = vrot.slane %v2089_v9, 4  ;;  %v2095_v38 = vshll.u32 %v10177_v49, 16  ;;  %v946_v43 = vsel %vm9982_vm11, %v941_v52, %v945_v48  ;;  %v951_v6 = vrot.slane %v950_v24, 4 }
 0x112   : >> { %8267 = vmatpush3.bf16.msra.mxu0 %v9083_v39  ;;  %v2081_v39 = vrot.slane %v2079_v7, 5  ;;  %v958_v51 = vshrl.u32 %v10180_v54, 16  ;;  %v961_v2 = vshll.u32 %v10180_v54, 16  ;;  %v967_v42 = vshll.u32 %v10183_v59, 16  ;;  %v10201_v7 = vld [vmem:[%s9952_s30 + $0x64] sm:$0xf] }
 0x113   : >> { %8284 = vmatprep.subr.bf16.mxu0 %v10166_v0  ;;  %8245 = vmatmul.mubr.bf16.gmra.mrb[8].mxu0 %v7214_v5  ;;  %v2092_v26 = vor.u32 %v2091_v8, %v2087_v27  ;;  %v2097_v11 = vrot.slane %v2095_v38, 5  ;;  %v956_v61 = vsel %vm9982_vm11, %v951_v6, %v955_v1  ;;  %v971_v48 = vshrl.u32 %v10183_v59, 16 }
 0x114   : >> { %v2082_v41 = vor.u32 %v2081_v39, %v2078_v10  ;;  %v960_v9 = vrot.slane %v958_v51, 4  ;;  %v963_v5 = vrot.slane %v961_v2, 5  ;;  %v7101_v52 = vcombine.low %v946_v43, %v956_v61  ;;  %v7225_v10 = vld [vmem:[%s9952_s30 + $0xc] sm:$0xe] }
 0x115   : >> { %v2093_v19 = vrot.slane %v2092_v26, 4  ;;  %v969_v15 = vrot.slane %v967_v42, 5  ;;  %v973_v8 = vrot.slane %v971_v48, 4  ;;  %v977_v38 = vshll.u32 %v10192_v16, 16 }
 0x116   : >> { %v2083_v24 = vrot.slane %v2082_v41, 4  ;;  %v964_v39 = vor.u32 %v963_v5, %v960_v9  ;;  %v2100_v3 = vshrl.u32 %v7206_v57, 16  ;;  %8120 = vmatprep.mubr.bf16.mxu1 %v7101_v52  ;;  %v2103_v51 = vshll.u32 %v7206_v57, 16 }
 0x117   : >> { %v2098_v6 = vsel %vm9982_vm11, %v2093_v19, %v2097_v11  ;;  %v2109_v43 = vshll.u32 %v10201_v7, 16  ;;  %v974_v26 = vor.u32 %v973_v8, %v969_v15  ;;  %v979_v42 = vrot.slane %v977_v38, 5  ;;  %v7226_v38 = vld [vmem:[%s9952_s30 + $0x18] sm:$0xe] }
 0x118   : >> { %v2088_v1 = vsel %vm9982_vm11, %v2083_v24, %v2087_v27  ;;  %v965_v41 = vrot.slane %v964_v39, 4  ;;  %v2102_v61 = vrot.slane %v2100_v3, 4  ;;  %v2105_v9 = vrot.slane %v2103_v51, 5 }
 0x119   : >> { %v7215_v2 = vcombine.low %v2088_v1, %v2098_v6  ;;  %v2111_v5 = vrot.slane %v2109_v43, 5  ;;  %v2113_v48 = vshrl.u32 %v10201_v7, 16  ;;  %v975_v52 = vrot.slane %v974_v26, 4  ;;  %v7227_v1 = vld [vmem:[%s9952_s30 + $0x24] sm:$0xe] }
 0x11a   : >> { %v970_v27 = vsel %vm9982_vm11, %v965_v41, %v969_v15  ;;  %v2119_v19 = vshll.u32 %v10207_v53, 16  ;;  %v7233_v57 = vrot.slane %v7225_v10, 9  ;;  %v2106_v11 = vor.u32 %v2105_v9, %v2102_v61 }
 0x11b   : >> { %8248 = vmatprep.mubr.bf16.mxu0 %v7215_v2  ;;  %v2115_v24 = vrot.slane %v2113_v48, 4  ;;  %v2367_v3 = vrot.slane %v9970_v45, 5  ;;  %v980_v8 = vsel %vm9982_vm11, %v975_v52, %v979_v42  ;;  %v7111_v15 = vcombine.low %v9955_v34, %v9958_v35 }
 0x11c   : >> { %v7102_v6 = vcombine.low %v970_v27, %v980_v8  ;;  %v2107_v10 = vrot.slane %v2106_v11, 4  ;;  %v2121_v43 = vrot.slane %v2119_v19, 5  ;;  %v2381_v42 = vrot.slane %v10038_v14, 5 }
 0x11d   : >> { %v2116_v51 = vor.u32 %v2115_v24, %v2111_v5  ;;  %v2368_v2 = vsel %vm10222_vm14, %v7233_v57, %v2367_v3  ;;  %v2369_v41 = vrot.slane %v2367_v3, 4  ;;  %v11730_v34 = vrot.slane %v10003_v21, 5  ;;  %v7228_v57 = vld [vmem:[%s9952_s30 + $0x30] sm:$0xe] }
 0x11e   : >> { %8121 = vmatmul.mubr.bf16.gmra.mrb[12].mxu1 %v7102_v6  ;;  %v2112_v45 = vsel %vm9982_vm11, %v2107_v10, %v2111_v5  ;;  %v2377_v61 = vrot.slane %v10009_v32, 5  ;;  %v11731_v9 = vrot.slane %v9973_v46, 5  ;;  %v7234_v5 = vrot.slane %v7226_v38, 9  ;;  %v7229_v38 = vld [vmem:[%s9952_s30 + $0x3c] sm:$0xe] }
 0x11f   : >> { %v2117_v26 = vrot.slane %v2116_v51, 4  ;;  %v2376_v35 = vrot.slane %v11730_v34, 4  ;;  %8140 = vmatprep.mubr.bf16.mxu1 %v7111_v15  ;;  %v7235_v19 = vrot.slane %v7227_v1, 9  ;;  %v2383_v11 = vrot.slane %v2381_v42, 4  ;;  %v9088_v6 = vld [vmem:[#allocation7 + $0x88] sm:$0xff]  }
 0x120   : >> { %v2371_v48 = vsel %vm10222_vm14, %v2369_v41, %v11731_v9  ;;  %v2384_v24 = vrot.slane %v10043_v20, 5  ;;  %v1400_v32 = vrot.slane %v9961_v36, 5  ;;  %v1407_v46 = vrot.slane %v9995_v12, 5 }
 0x121   : >> { %v2122_v27 = vsel %vm9982_vm11, %v2117_v26, %v2121_v43  ;;  %v7241_v52 = vcombine.low %v2368_v2, %v2371_v48  ;;  %v7112_v3 = vcombine.low %v9978_v56, %v9988_v63  ;;  %v2378_v8 = vsel %vm10222_vm14, %v2376_v35, %v2377_v61  ;;  %v10279_v35 = vld [vmem:[%s9952_s30 + $0x60] sm:$0xe]  ;;  %v9094_v48 = vld [vmem:[#allocation7 + $0x98] sm:$0xff]  }
 0x122   : >> { %v7216_v14 = vcombine.low %v2112_v45, %v2122_v27  ;;  %v7113_v15 = vcombine.low %v10018_v50, %v10026_v60  ;;  %v11732_v1 = vmov %v11730_v34  ;;  %v7236_v10 = vrot.slane %v7228_v57, 9  ;;  %v10269_v60 = vld [vmem:[%s9952_s30 + $0x48] sm:$0xe]  ;;  %v10276_v45 = vld [vmem:[%s9952_s30 + $0x54] sm:$0xe] }
 0x123   : >> { %v2375_v20 = vsel %vm10222_vm14, %v7234_v5, %v11732_v1  ;;  %v2388_v51 = vrot.slane %v10063_v62, 5  ;;  %v2395_v56 = vrot.slane %v10102_v18, 5  ;;  %v2382_v63 = vsel %vm10222_vm14, %v7235_v19, %v2381_v42  ;;  %v9089_v18 = vld [vmem:[#allocation7 + $0x188] sm:$0xff]   ;;  %v9093_v19 = vld [vmem:[#allocation7 + $0x190] sm:$0xff]  }
 0x124   : >> { %8249 = vmatmul.mubr.bf16.gmra.mrb[12].mxu0 %v7216_v14  ;;  %v2385_v50 = vsel %vm10222_vm14, %v2383_v11, %v2384_v24  ;;  %v2391_v21 = vrot.slane %v10076_v25, 5  ;;  %v7237_v43 = vrot.slane %v7229_v38, 9  ;;  %v2398_v2 = vrot.slane %v10108_v37, 5  ;;  %v9092_v37 = vld [vmem:[#allocation7 + $0x90] sm:$0xff]   ;;  %v9098_v38 = vld [vmem:[#allocation7 + $0xa0] sm:$0xff]  }
 0x125   : >> { %8268 = vmatprep.mubr.bf16.mxu0 %v7241_v52  ;;  %v2402_v41 = vrot.slane %v10130_v22, 5  ;;  %v7242_v62 = vcombine.low %v2375_v20, %v2378_v8  ;;  %v7243_v26 = vcombine.low %v2382_v63, %v2385_v50  ;;  %v2390_v42 = vrot.slane %v2388_v51, 4  ;;  %v10297_v11 = vld [vmem:[%s9952_s30 + $0x4] sm:$0xf] }
 0x126   : >> { %8141 = vmatmul.mubr.bf16.vlgmr.msra.gmra.mrb[0].mxu1 %v7112_v3  ;;  %v2397_v34 = vrot.slane %v2395_v56, 4  ;;  %v7114_v25 = vcombine.low %v10046_v33, %v10053_v44  ;;  %v2389_v61 = vsel %vm10222_vm14, %v7236_v10, %v2388_v51  ;;  %v7238_v9 = vrot.slane %v10269_v60, 9  ;;  %v1368_v3 = vld [vmem:[%s9952_s30] sm:$0xe]  ;;  %v10314_v51 = vld [vmem:[%s9952_s30 + $0x10] sm:$0xf] }
 0x127   : >> { %8157 = vmatpush3.bf16.msra.mxu1 %v10142_v28  ;;  %8144 = vmatprep.mubr.bf16.mxu1 %v7113_v15  ;;  %v7115_v28 = vcombine.low %v10080_v40, %v10086_v23  ;;  %v2404_v27 = vrot.slane %v2402_v41, 4  ;;  %v2405_v52 = vrot.slane %v10140_v13, 5  ;;  %v7239_v5 = vrot.slane %v10276_v45, 9  ;;  %v9095_v15 = vld [vmem:[#allocation7 + $0x198] sm:$0xff]   ;;  %v1371_v60 = vld [vmem:[%s9952_s30 + $0x24] sm:$0xe] }
 0x128   : >> { %8158 = vmatprep.subr.bf16.mxu1 %v9088_v6  ;;  %v2409_v33 = vrot.slane %v10172_v29, 5  ;;  %v2412_v57 = vrot.slane %v10177_v49, 5  ;;  %v7240_v40 = vrot.slane %v10279_v35, 9  ;;  %v2416_v14 = vrot.slane %v10201_v7, 5 }
 0x129   : >> { %v1397_v24 = vrot.slane %v10297_v11, 5  ;;  %v2392_v13 = vsel %vm10222_vm14, %v2390_v42, %v2391_v21  ;;  %v2396_v29 = vsel %vm10222_vm14, %v7237_v43, %v2395_v56  ;;  %v2399_v49 = vsel %vm10222_vm14, %v2397_v34, %v2398_v2  ;;  %v9100_v2 = vld [vmem:[#allocation7 + $0xa8] sm:$0xff]   ;;  %v9099_v42 = vld [vmem:[#allocation7 + $0x1a0] sm:$0xff]   ;;  %v11733_v11 = vld [vmem:[#allocation17_spill] sm:$0xff] }
 0x12a   : >> { %v7244_v8 = vcombine.low %v2389_v61, %v2392_v13  ;;  %v2411_v1 = vrot.slane %v2409_v33, 4  ;;  %v2419_v20 = vrot.slane %v10207_v53, 5  ;;  %v7127_v10 = vrot.slane %v1368_v3, 9  ;;  %v10340_v34 = vld [vmem:[%s9952_s30 + $0x18] sm:$0xe]  ;;  %v9105_v53 = vld [vmem:[#allocation7 + $0x1b0] sm:$0xff]  }
 0x12b   : >> { %8159 = vmatpush3.bf16.msra.mxu1 %v9088_v6  ;;  %v10311_v6 = vrot.slane %v2416_v14, 4  ;;  %v1404_v56 = vrot.slane %v10314_v51, 5  ;;  %v1418_v63 = vrot.slane %v10053_v44, 5  ;;  %v1399_v50 = vrot.slane %v1397_v24, 4  ;;  %v9150_v13 = vld [vmem:[%s9952_s30 + $0x1c] sm:$0xf] }
 0x12c   : >> { %8269 = vmatmul.mubr.bf16.vlgmr.msra.gmra.mrb[0].mxu0 %v7242_v62  ;;  %8160 = vmatprep.subr.bf16.mxu1 %v9092_v37  ;;  %v1421_v21 = vrot.slane %v10056_v47, 5  ;;  %v7116_v43 = vcombine.low %v10114_v55, %v10117_v30  ;;  %v7117_v62 = vcombine.low %v10147_v31, %v10153_v17  ;;  %v7130_v45 = vrot.slane %v1371_v60, 9 }
 0x12d   : >> { %8285 = vmatpush3.bf16.msra.mxu0 %v10166_v0  ;;  %8272 = vmatprep.mubr.bf16.mxu0 %v7243_v26  ;;  %v7245_v0 = vcombine.low %v2396_v29, %v2399_v49  ;;  %v1420_v26 = vrot.slane %v1418_v63, 4  ;;  %v2403_v44 = vsel %vm10222_vm14, %v7238_v9, %v2402_v41  ;;  %v2406_v47 = vsel %vm10222_vm14, %v2404_v27, %v2405_v52  ;;  %v1372_v27 = vld [vmem:[%s9952_s30 + $0x30] sm:$0xe]  ;;  %v1373_v49 = vld [vmem:[%s9952_s30 + $0x3c] sm:$0xe] }
 0x12e   : >> { %8286 = vmatprep.subr.bf16.mxu0 %v9089_v18  ;;  %8145 = vmatmul.mubr.bf16.gmra.mrb[4].mxu1 %v7114_v25  ;;  %v2410_v55 = vsel %vm10222_vm14, %v7239_v5, %v2409_v33  ;;  %v2413_v31 = vsel %vm10222_vm14, %v2411_v1, %v2412_v57  ;;  %v10344_v22 = vsel %vm10222_vm14, %v7130_v45, %v1418_v63  ;;  %v1425_v61 = vrot.slane %v10086_v23, 5  ;;  %v9101_v5 = vld [vmem:[#allocation7 + $0x1a8] sm:$0xff]   ;;  %v9107_v45 = vld [vmem:[#allocation7 + $0x1b8] sm:$0xff]  }
 0x12f   : >> { %8161 = vmatpush3.bf16.msra.mxu1 %v9092_v37  ;;  %8148 = vmatprep.mubr.bf16.mxu1 %v7115_v28  ;;  %v10348_v41 = vsel %vm10222_vm14, %v1420_v26, %v1421_v21  ;;  %v7246_v28 = vcombine.low %v2403_v44, %v2406_v47  ;;  %v7118_v9 = vcombine.low %v10180_v54, %v10183_v59  ;;  %v1428_v52 = vrot.slane %v10093_v4, 5  ;;  %v9104_v54 = vld [vmem:[#allocation7 + $0xb0] sm:$0xff]   ;;  %v11734_v21 = vld [vmem:[#allocation18_spill] sm:$0xff] }
 0x130   : >> { %8162 = vmatprep.subr.bf16.mxu1 %v9094_v48  ;;  %v7138_v37 = vcombine.low %v10344_v22, %v10348_v41  ;;  %v7247_v33 = vcombine.low %v2410_v55, %v2413_v31  ;;  %v1398_v23 = vsel %vm10222_vm14, %v7127_v10, %v1397_v24  ;;  %v1427_v57 = vrot.slane %v1425_v61, 4  ;;  %v1375_v47 = vld [vmem:[%s9952_s30 + $0x54] sm:$0xe] }
 0x131   : >> { %8287 = vmatpush3.bf16.msra.mxu0 %v9089_v18  ;;  %v10327_v18 = vld [vmem:[%s9952_s30 + $0xc] sm:$0xe]  ;;  %v1401_v4 = vsel %vm10222_vm14, %v1399_v50, %v1400_v32  ;;  %v1411_v29 = vrot.slane %v9150_v13, 5  ;;  %v1432_v3 = vrot.slane %v10117_v30, 5  ;;  %v7129_v24 = vrot.slane %v10340_v34, 9  ;;  %v9109_v34 = vld [vmem:[#allocation7 + $0xc0] sm:$0xff]  }
 0x132   : >> { %8288 = vmatprep.subr.bf16.mxu0 %v9093_v19  ;;  %v7128_v25 = vrot.slane %v10327_v18, 9  ;;  %v10379_v36 = vsel %vm10222_vm14, %v1427_v57, %v1428_v52  ;;  %v2417_v30 = vsel %vm10222_vm14, %v7240_v40, %v2416_v14  ;;  %v9106_v32 = vld [vmem:[#allocation7 + $0xb8] sm:$0xff]   ;;  %v2420_v7 = vsel %vm10222_vm14, %v10311_v6, %v2419_v20  ;;  %v9111_v52 = vld [vmem:[#allocation7 + $0x1c0] sm:$0xff]  }
 0x133   : >> { %8163 = vmatpush3.bf16.msra.mxu1 %v9094_v48  ;;  %v1406_v48 = vrot.slane %v1404_v56, 4  ;;  %v1434_v63 = vrot.slane %v1432_v3, 4  ;;  %v7135_v35 = vcombine.low %v1398_v23, %v1401_v4  ;;  %v1413_v14 = vrot.slane %v1411_v29, 4  ;;  %v1374_v6 = vld [vmem:[%s9952_s30 + $0x48] sm:$0xe]  ;;  %v9121_v22 = vld [vmem:[#allocation7 + $0xe0] sm:$0xff]  }
 0x134   : >> { %8273 = vmatmul.mubr.bf16.gmra.mrb[4].mxu0 %v7244_v8  ;;  %8164 = vmatprep.subr.bf16.mxu1 %v9098_v38  ;;  %v1435_v8 = vrot.slane %v11733_v11, 5  ;;  %v1439_v60 = vrot.slane %v10153_v17, 5  ;;  %v7133_v18 = vrot.slane %v1374_v6, 9  ;;  %v1412_v44 = vsel %vm10222_vm14, %v7129_v24, %v1411_v29  ;;  %v9110_v57 = vld [vmem:[%s9952_s30 + $0x24] sm:$0xff]   ;;  %v10451_v4 = vld [vmem:[%s9952_s30 + $0x20] sm:$0x1] }
 0x135   : >> { %8289 = vmatpush3.bf16.msra.mxu0 %v9093_v19  ;;  %8276 = vmatprep.mubr.bf16.mxu0 %v7245_v0  ;;  %v7131_v19 = vrot.slane %v1372_v27, 9  ;;  %v7132_v0 = vrot.slane %v1373_v49, 9  ;;  %v1408_v26 = vsel %vm10222_vm14, %v1406_v48, %v1407_v46  ;;  %v1449_v51 = vrot.slane %v10192_v16, 5  ;;  %v9112_v48 = vld [vmem:[#allocation7 + $0xc8] sm:$0xff]   ;;  %v7294_v24 = vld [vmem:[%s9952_s30 + $0x24] sm:$0xf] }
 0x136   : >> { %8290 = vmatprep.subr.bf16.mxu0 %v9095_v15  ;;  %8149 = vmatmul.mubr.bf16.gmra.mrb[8].mxu1 %v7116_v43  ;;  %v10401_v50 = vsel %vm10222_vm14, %v1434_v63, %v1435_v8  ;;  %v1442_v43 = vrot.slane %v11734_v21, 5  ;;  %v1441_v17 = vrot.slane %v1439_v60, 4  ;;  %v10426_v12 = vsel %vm10222_vm14, %v7133_v18, %v1439_v60  ;;  %v9113_v49 = vld [vmem:[#allocation7 + $0x1c8] sm:$0xff]   ;;  %v10460_v63 = vld [vmem:[%s9952_s30 + $0x28] sm:$0xf] }
 0x137   : >> { %8165 = vmatpush3.bf16.msra.mxu1 %v9098_v38  ;;  %8152 = vmatprep.mubr.bf16.mxu1 %v7117_v62  ;;  %v9151_v38 = vld [vmem:[%s9952_s30 + $0x20] sm:$0x1]  ;;  %v10397_v40 = vsel %vm10222_vm14, %v7132_v0, %v1432_v3  ;;  %v1405_v62 = vsel %vm10222_vm14, %v7128_v25, %v1404_v56  ;;  %v9108_v56 = vld [vmem:[%s9952_s30 + $0x18] sm:$0xff]   ;;  %v7134_v31 = vrot.slane %v1375_v47, 9  ;;  %v9119_v21 = vld [vmem:[#allocation7 + $0x1d8] sm:$0xff]  }
 0x138   : >> { %8166 = vmatprep.subr.bf16.mxu1 %v9100_v2  ;;  %v1414_v1 = vrot.slane %v9151_v38, 5  ;;  %v7140_v20 = vcombine.low %v10397_v40, %v10401_v50  ;;  %v10430_v46 = vsel %vm10222_vm14, %v1441_v17, %v1442_v43  ;;  %v7136_v25 = vcombine.low %v1405_v62, %v1408_v26  ;;  %v9115_v3 = vld [vmem:[#allocation7 + $0xd0] sm:$0xff]   ;;  %v10476_v62 = vld [vmem:[%s9952_s30 + $0x34] sm:$0xf]  ;;  %v9120_v18 = vld [vmem:[%s9952_s30 + $0x48] sm:$0xff]  }
 0x139   : >> { %8291 = vmatpush3.bf16.msra.mxu0 %v9095_v15  ;;  %v10375_v15 = vsel %vm10222_vm14, %v7131_v19, %v1425_v61  ;;  %v9117_v0 = vld [vmem:[#allocation7 + $0x1d0] sm:$0xff]   ;;  %v2935_v43 = vshll.u32 %v10460_v63, 16  ;;  %v2959_v47 = vshll.u32 %v10476_v62, 16 }
 0x13a   : >> { %8292 = vmatprep.subr.bf16.mxu0 %v9099_v42  ;;  %v7139_v10 = vcombine.low %v10375_v15, %v10379_v36  ;;  %v1415_v55 = vsel %vm10222_vm14, %v1413_v14, %v1414_v1  ;;  %v2929_v14 = vshll.u32 %v7294_v24, 16  ;;  %v9116_v6 = vld [vmem:[%s9952_s30 + $0x3c] sm:$0xff]  }
 0x13b   : >> { %8167 = vmatpush3.bf16.msra.mxu1 %v9100_v2  ;;  %v7248_v2 = vcombine.low %v2417_v30, %v2420_v7  ;;  %v9118_v30 = vld [vmem:[#allocation7 + $0xd8] sm:$0xff]  }
 0x13c   : >> { %8277 = vmatmul.mubr.bf16.gmra.mrb[8].mxu0 %v7246_v28  ;;  %8168 = vmatprep.subr.bf16.mxu1 %v9104_v54  ;;  %v7137_v28 = vcombine.low %v1412_v44, %v1415_v55  ;;  %v10463_v7 = vld [vmem:[%s9952_s30 + $0x2c] sm:$0x1]  ;;  %v2931_v15 = vrot.slane %v2929_v14, 5 }
 0x13d   : >> { %8293 = vmatpush3.bf16.msra.mxu0 %v9099_v42  ;;  %8280 = vmatprep.mubr.bf16.mxu0 %v7247_v33  ;;  %v1446_v42 = vrot.slane %v10183_v59, 5  ;;  %v7141_v59 = vcombine.low %v10426_v12, %v10430_v46  ;;  %v10446_v33 = vld [vmem:[%s9952_s30 + $0x1c] sm:$0xf]  ;;  %v2945_v36 = vshll.u32 %v10463_v7, 16  ;;  %v9132_v14 = vld [vmem:[%s9952_s30 + $0xc] sm:$0xff]  }
 0x13e   : >> { %8294 = vmatprep.subr.bf16.mxu0 %v9101_v5  ;;  %8153 = vmatmul.mubr.bf16.gmra.mrb[12].mxu1 %v7118_v9  ;;  %v2911_v13 = vshll.u32 %v10446_v33, 16  ;;  %v2915_v29 = vshrl.u32 %v10446_v33, 16 }
 0x13f   : >> { %8169 = vmatpush3.bf16.msra.mxu1 %v9104_v54  ;;  %8172 = vmatprep.mubr.bf16.mxu1 %v7135_v35  ;;  %v1448_v16 = vrot.slane %v1446_v42, 4  ;;  %v10436_v61 = vsel %vm10222_vm14, %v7134_v31, %v1446_v42  ;;  %v9114_v54 = vld [vmem:[%s9952_s30 + $0x30] sm:$0xff]   ;;  %v2926_v35 = vshrl.u32 %v7294_v24, 16  ;;  %v2963_v42 = vshrl.u32 %v10476_v62, 16  ;;  %v10490_v31 = vld [vmem:[%s9952_s30 + $0x38] sm:$0x1] }
 0x140   : >> { %8170 = vmatprep.subr.bf16.mxu1 %v9106_v32  ;;  %v10457_v38 = vrot.slane %v2911_v13, 5  ;;  %v2917_v1 = vrot.slane %v2915_v29, 4  ;;  %v10528_v24 = vrot.slane %v2945_v36, 5 }
 0x141   : >> { %8295 = vmatpush3.bf16.msra.mxu0 %v9101_v5  ;;  %v10440_v9 = vsel %vm10222_vm14, %v1448_v16, %v1449_v51  ;;  %v7291_v5 = vld [vmem:[%s9952_s30 + $0x18] sm:$0xf]  ;;  %v9123_v51 = vld [vmem:[#allocation7 + $0x1e0] sm:$0xff]  }
 0x142   : >> { %8296 = vmatprep.subr.bf16.mxu0 %v9105_v53  ;;  %v7142_v27 = vcombine.low %v10436_v61, %v10440_v9  ;;  %v2902_v23 = vshrl.u32 %v7291_v5, 16  ;;  %v2905_v19 = vshll.u32 %v7291_v5, 16  ;;  %v2918_v41 = vor.u32 %v2917_v1, %v10457_v38  ;;  %v9126_v5 = vld [vmem:[%s9952_s30 + $0x60] sm:$0xff]  }
 0x143   : >> { %8171 = vmatpush3.bf16.msra.mxu1 %v9106_v32  ;;  %v2921_v32 = vshll.u32 %v10451_v4, 16 }
 0x144   : >> { %8281 = vmatmul.mubr.bf16.gmra.mrb[12].mxu0 %v7248_v2  ;;  %8188 = vmatprep.subr.bf16.mxu1 %v9109_v34  ;;  %v2904_v11 = vrot.slane %v2902_v23, 4  ;;  %v2907_v8 = vrot.slane %v2905_v19, 5  ;;  %v2939_v2 = vshrl.u32 %v10460_v63, 16  ;;  %v10505_v19 = vrot.slane %v2959_v47, 5 }
 0x145   : >> { %8297 = vmatpush3.bf16.msra.mxu0 %v9105_v53  ;;  %8300 = vmatprep.mubr.bf16.mxu0 %v9108_v56  ;;  %v7297_v53 = vld [vmem:[%s9952_s30 + $0x30] sm:$0xf]  ;;  %v10480_v17 = vrot.slane %v2921_v32, 5  ;;  %v10487_v56 = vrot.slane %v2935_v43, 5  ;;  %v10540_v43 = vld [vmem:[%s9952_s30 + $0x44] sm:$0x1] }
 0x146   : >> { %8298 = vmatprep.subr.bf16.mxu0 %v9107_v45  ;;  %8173 = vmatmul.mubr.bf16.vlgmr.msra.gmra.mrb[0].mxu1 %v7136_v25  ;;  %v2908_v60 = vor.u32 %v2907_v8, %v2904_v11  ;;  %v2953_v44 = vshll.u32 %v7297_v53, 16  ;;  %v2941_v55 = vrot.slane %v2939_v2, 4  ;;  %v7300_v25 = vld [vmem:[%s9952_s30 + $0x3c] sm:$0xf]  ;;  %v9127_v8 = vld [vmem:[#allocation7 + $0xf0] sm:$0xff]  }
 0x147   : >> { %8189 = vmatpush3.bf16.msra.mxu1 %v9109_v34  ;;  %8176 = vmatprep.mubr.bf16.mxu1 %v7137_v28  ;;  %v10492_v34 = vrot.slane %v2918_v41, 4  ;;  %v2974_v29 = vshrl.u32 %v7300_v25, 16  ;;  %v2977_v40 = vshll.u32 %v7300_v25, 16  ;;  %v9125_v11 = vld [vmem:[#allocation7 + $0x1e8] sm:$0xff]  }
 0x148   : >> { %8190 = vmatprep.subr.bf16.mxu1 %v9112_v48  ;;  %v10483_v26 = vrot.slane %v2908_v60, 4  ;;  %v2955_v23 = vrot.slane %v2953_v44, 5  ;;  %v2942_v13 = vor.u32 %v2941_v55, %v10487_v56 }
 0x149   : >> { %8299 = vmatpush3.bf16.msra.mxu0 %v9107_v45  ;;  %v2928_v45 = vrot.slane %v2926_v35, 4  ;;  %v2924_v46 = vsel %vm9982_vm11, %v10492_v34, %v10480_v17  ;;  %v9129_v35 = vld [vmem:[#allocation7 + $0x1f0] sm:$0xff]   ;;  %v2976_v2 = vrot.slane %v2974_v29, 4  ;;  %v10546_v17 = vld [vmem:[%s9952_s30 + $0x50] sm:$0x1] }
 0x14a   : >> { %8316 = vmatprep.subr.bf16.mxu0 %v9111_v52  ;;  %v2914_v12 = vsel %vm9982_vm11, %v10483_v26, %v10457_v38  ;;  %v9130_v38 = vld [vmem:[#allocation7 + $0xf8] sm:$0xff]   ;;  %v10533_v60 = vrot.slane %v2942_v13, 4  ;;  %v3017_v55 = vshll.u32 %v10546_v17, 16  ;;  %v10558_v34 = vld [vmem:[%s9952_s30 + $0x58] sm:$0xf] }
 0x14b   : >> { %8191 = vmatpush3.bf16.msra.mxu1 %v9112_v48  ;;  %v2932_v28 = vor.u32 %v2931_v15, %v2928_v45  ;;  %v10498_v48 = vld [vmem:[%s9952_s30 + $0x40] sm:$0xf]  ;;  %v9131_v26 = vld [vmem:[#allocation7 + $0x1f8] sm:$0xff]   ;;  %v7315_v44 = vcombine.low %v2914_v12, %v2924_v46  ;;  %v10572_v29 = vld [vmem:[%s9952_s30 + $0x64] sm:$0xf] }
 0x14c   : >> { %8301 = vmatmul.mubr.bf16.vlgmr.msra.gmra.mrb[0].mxu0 %v9110_v57  ;;  %8192 = vmatprep.subr.bf16.mxu1 %v9115_v3  ;;  %v2965_v57 = vrot.slane %v2963_v42, 4  ;;  %v2983_v50 = vshll.u32 %v10498_v48, 16  ;;  %v2993_v42 = vshll.u32 %v10540_v43, 16  ;;  %v7309_v13 = vld [vmem:[%s9952_s30 + $0x60] sm:$0xf] }
 0x14d   : >> { %8317 = vmatpush3.bf16.msra.mxu0 %v9111_v52  ;;  %8304 = vmatprep.mubr.bf16.mxu0 %v9114_v54  ;;  %v9122_v52 = vld [vmem:[%s9952_s30 + $0x54] sm:$0xff]   ;;  %v2969_v54 = vshll.u32 %v10490_v31, 16 }
 0x14e   : >> { %8318 = vmatprep.subr.bf16.mxu0 %v9113_v49  ;;  %8177 = vmatmul.mubr.bf16.gmra.mrb[4].mxu1 %v7138_v37  ;;  %v2950_v37 = vshrl.u32 %v7297_v53, 16 }
 0x14f   : >> { %8193 = vmatpush3.bf16.msra.mxu1 %v9115_v3  ;;  %8180 = vmatprep.mubr.bf16.mxu1 %v7139_v10  ;;  %v9124_v10 = vld [vmem:[#allocation7 + $0xe8] sm:$0xff]   ;;  %v10516_v3 = vld [vmem:[%s9952_s30 + $0x4c] sm:$0xf] }
 0x150   : >> { %8194 = vmatprep.subr.bf16.mxu1 %v9118_v30  ;;  %v10494_v16 = vrot.slane %v2950_v37, 4  ;;  %v3007_v32 = vshll.u32 %v10516_v3, 16  ;;  %v3011_v1 = vshrl.u32 %v10516_v3, 16  ;;  %v9128_v37 = vld [vmem:[%s9952_s30 + $0x6c] sm:$0xff]  }
 0x151   : >> { %8319 = vmatpush3.bf16.msra.mxu0 %v9113_v49  ;;  %v7303_v49 = vld [vmem:[%s9952_s30 + $0x48] sm:$0xf] }
 0x152   : >> { %8320 = vmatprep.subr.bf16.mxu0 %v9117_v0  ;;  %v2956_v53 = vor.u32 %v2955_v23, %v10494_v16  ;;  %v10551_v36 = vrot.slane %v3007_v32, 5  ;;  %v9133_v16 = vld [vmem:[%s9952_s30 + $0x18] sm:$0xff]  }
 0x153   : >> { %8195 = vmatpush3.bf16.msra.mxu1 %v9118_v30  ;;  %v3001_v30 = vshll.u32 %v7303_v49, 16 }
 0x154   : >> { %8305 = vmatmul.mubr.bf16.gmra.mrb[4].mxu0 %v9116_v6  ;;  %8196 = vmatprep.subr.bf16.mxu1 %v9121_v22  ;;  %v2966_v6 = vor.u32 %v2965_v57, %v10505_v19  ;;  %v2957_v47 = vrot.slane %v2956_v53, 4  ;;  %v10594_v53 = vld [vmem:[%s9952_s30 + $0x5c] sm:$0x1] }
 0x155   : >> { %8321 = vmatpush3.bf16.msra.mxu0 %v9117_v0  ;;  %8308 = vmatprep.mubr.bf16.mxu0 %v9120_v18  ;;  %v2998_v0 = vshrl.u32 %v7303_v49, 16  ;;  %v2979_v18 = vrot.slane %v2977_v40, 5  ;;  %v3003_v15 = vrot.slane %v3001_v30, 5  ;;  %v9136_v40 = vld [vmem:[%s9952_s30 + $0x24] sm:$0xff]   ;;  %v3035_v49 = vshrl.u32 %v10558_v34, 16 }
 0x156   : >> { %8322 = vmatprep.subr.bf16.mxu0 %v9119_v21  ;;  %8181 = vmatmul.mubr.bf16.gmra.mrb[8].mxu1 %v7140_v20  ;;  %v2987_v20 = vshrl.u32 %v10498_v48, 16  ;;  %v2967_v61 = vrot.slane %v2966_v6, 4  ;;  %v3059_v30 = vshrl.u32 %v10572_v29, 16 }
 0x157   : >> { %8197 = vmatpush3.bf16.msra.mxu1 %v9121_v22  ;;  %8184 = vmatprep.mubr.bf16.mxu1 %v7141_v59  ;;  %v10526_v59 = vrot.slane %v2932_v28, 4  ;;  %v10542_v22 = vrot.slane %v2983_v50, 5  ;;  %v3000_v45 = vrot.slane %v2998_v0, 4  ;;  %v2980_v9 = vor.u32 %v2979_v18, %v2976_v2  ;;  %v7312_v18 = vld [vmem:[%s9952_s30 + $0x6c] sm:$0xf] }
 0x158   : >> { %8198 = vmatprep.subr.bf16.mxu1 %v9124_v10  ;;  %v2989_v41 = vrot.slane %v2987_v20, 4  ;;  %v2948_v28 = vsel %vm9982_vm11, %v10533_v60, %v10528_v24  ;;  %v10578_v50 = vrot.slane %v2993_v42, 5  ;;  %v3031_v20 = vshll.u32 %v10558_v34, 16  ;;  %v10591_v60 = vld [vmem:[#allocation7 + $0x210] sm:$0xff]  }
 0x159   : >> { %8323 = vmatpush3.bf16.msra.mxu0 %v9119_v21  ;;  %v10537_v21 = vrot.slane %v2969_v54, 5  ;;  %v2938_v25 = vsel %vm9982_vm11, %v10526_v59, %v10487_v56  ;;  %v2962_v56 = vsel %vm9982_vm11, %v2957_v47, %v10505_v19  ;;  %v2981_v12 = vrot.slane %v2980_v9, 4 }
 0x15a   : >> { %8324 = vmatprep.subr.bf16.mxu0 %v9123_v51  ;;  %v10587_v59 = vrot.slane %v3017_v55, 5  ;;  %v3046_v19 = vshrl.u32 %v7309_v13, 16  ;;  %v3049_v24 = vshll.u32 %v7309_v13, 16  ;;  %v3055_v0 = vshll.u32 %v10572_v29, 16 }
 0x15b   : >> { %8199 = vmatpush3.bf16.msra.mxu1 %v9124_v10  ;;  %v3013_v10 = vrot.slane %v3011_v1, 4  ;;  %v10596_v6 = vrot.slane %v3031_v20, 5  ;;  %v2986_v47 = vsel %vm9982_vm11, %v2981_v12, %v10542_v22  ;;  %v3070_v9 = vshrl.u32 %v7312_v18, 16 }
 0x15c   : >> { %8309 = vmatmul.mubr.bf16.gmra.mrb[8].mxu0 %v9122_v52  ;;  %8200 = vmatprep.subr.bf16.mxu1 %v9127_v8  ;;  %v9134_v52 = vld [vmem:[#allocation7 + $0x200] sm:$0xff]  }
 0x15d   : >> { %8325 = vmatpush3.bf16.msra.mxu0 %v9123_v51  ;;  %8312 = vmatprep.mubr.bf16.mxu0 %v9126_v5  ;;  %v7306_v51 = vld [vmem:[%s9952_s30 + $0x54] sm:$0xf]  ;;  %v3004_v5 = vor.u32 %v3003_v15, %v3000_v45  ;;  %v3014_v23 = vor.u32 %v3013_v10, %v10551_v36  ;;  %v3051_v45 = vrot.slane %v3049_v24, 5  ;;  %v10603_v15 = vrot.slane %v3055_v0, 5 }
 0x15e   : >> { %8326 = vmatprep.subr.bf16.mxu0 %v9125_v11  ;;  %8185 = vmatmul.mubr.bf16.gmra.mrb[12].mxu1 %v7142_v27  ;;  %v2990_v27 = vor.u32 %v2989_v41, %v10542_v22  ;;  %v3022_v57 = vshrl.u32 %v7306_v51, 16  ;;  %v3025_v54 = vshll.u32 %v7306_v51, 16  ;;  %v10601_v41 = vld [vmem:[%s9952_s30 + $0x70] sm:$0xf]  ;;  %v3061_v10 = vrot.slane %v3059_v30, 4  ;;  %v10619_v22 = vld [vmem:[#allocation7 + $0x218] sm:$0xff]  }
 0x15f   : >> { %8201 = vmatpush3.bf16.msra.mxu1 %v9127_v8  ;;  %8204 = vmatprep.mubr.bf16.mxu1 %v9132_v14  ;;  %v2972_v8 = vsel %vm9982_vm11, %v2967_v61, %v10537_v21  ;;  %v3005_v32 = vrot.slane %v3004_v5, 4  ;;  %v3015_v1 = vrot.slane %v3014_v23, 4  ;;  %v7316_v14 = vcombine.low %v2938_v25, %v2948_v28  ;;  %v10613_v51 = vld [vmem:[%s9952_s30 + $0x68] sm:$0x1]  ;;  %v9140_v61 = vld [vmem:[%s9952_s30 + $0x3c] sm:$0xff]  }
 0x160   : >> { %8202 = vmatprep.subr.bf16.mxu1 %v9130_v38  ;;  %v2991_v46 = vrot.slane %v2990_v27, 4  ;;  %v3037_v21 = vrot.slane %v3035_v49, 4  ;;  %v7317_v2 = vcombine.low %v2962_v56, %v2972_v8  ;;  %v3073_v27 = vshll.u32 %v7312_v18, 16  ;;  %v9143_v18 = vld [vmem:[#allocation7 + $0x228] sm:$0xff]  }
 0x161   : >> { %8327 = vmatpush3.bf16.msra.mxu0 %v9125_v11  ;;  %v10582_v11 = vld [vmem:[#allocation7 + $0x208] sm:$0xff]   ;;  %v3079_v55 = vshll.u32 %v10601_v41, 16  ;;  %v3010_v25 = vsel %vm9982_vm11, %v3005_v32, %v10551_v36  ;;  %v3041_v5 = vshll.u32 %v10594_v53, 16  ;;  %v3020_v23 = vsel %vm9982_vm11, %v3015_v1, %v10587_v59  ;;  %v7335_v32 = vld [vmem:[%s9952_s30 + $0x48] sm:$0xe] }
 0x162   : >> { %8328 = vmatprep.subr.bf16.mxu0 %v9129_v35  ;;  %v3038_v28 = vor.u32 %v3037_v21, %v10596_v6  ;;  %v3075_v56 = vrot.slane %v3073_v27, 5  ;;  %v7319_v49 = vcombine.low %v3010_v25, %v3020_v23  ;;  %v3365_v59 = vrot.slane %v10516_v3, 5  ;;  %v9141_v1 = vld [vmem:[%s9952_s30 + $0x48] sm:$0xff]   ;;  %v9146_v25 = vld [vmem:[#allocation7 + $0x230] sm:$0xff]  }
 0x163   : >> { %8203 = vmatpush3.bf16.msra.mxu1 %v9130_v38  ;;  %v3027_v38 = vrot.slane %v3025_v54, 5  ;;  %v3065_v54 = vshll.u32 %v10613_v51, 16  ;;  %v3043_v12 = vrot.slane %v3041_v5, 5  ;;  %v3375_v23 = vrot.slane %v10594_v53, 5 }
 0x164   : >> { %8313 = vmatmul.mubr.bf16.gmra.mrb[12].mxu0 %v9128_v37  ;;  %8668 = vmatprep.subr.bf16.mxu1 %v9134_v52  ;;  %v3048_v37 = vrot.slane %v3046_v19, 4  ;;  %v3039_v8 = vrot.slane %v3038_v28, 4  ;;  %v9142_v19 = vld [vmem:[#allocation7 + $0x220] sm:$0xff]   ;;  %v7337_v28 = vld [vmem:[%s9952_s30 + $0x60] sm:$0xe] }
 0x165   : >> { %8329 = vmatpush3.bf16.msra.mxu0 %v9129_v35  ;;  %8332 = vmatprep.mubr.bf16.mxu0 %v7315_v44  ;;  %v3024_v35 = vrot.slane %v3022_v57, 4  ;;  %v9137_v44 = vld [vmem:[%s9952_s30 + $0x30] sm:$0xff]   ;;  %v3062_v57 = vor.u32 %v3061_v10, %v10603_v15  ;;  %v3067_v30 = vrot.slane %v3065_v54, 5  ;;  %v3368_v10 = vrot.slane %v10546_v17, 5 }
 0x166   : >> { %8330 = vmatprep.subr.bf16.mxu0 %v9131_v26  ;;  %8205 = vmatmul.mubr.bf16.vlgmr.msra.gmra.mrb[0].mxu1 %v9133_v16  ;;  %v3083_v16 = vshrl.u32 %v10601_v41, 16 }
 0x167   : >> { %8676 = vmatpush3.bf16.msra.mxu1 %v9134_v52  ;;  %8208 = vmatprep.mubr.bf16.mxu1 %v9136_v40  ;;  %v3028_v42 = vor.u32 %v3027_v38, %v3024_v35  ;;  %v3072_v40 = vrot.slane %v3070_v9, 4  ;;  %v3063_v0 = vrot.slane %v3062_v57, 4  ;;  %v9144_v38 = vld [vmem:[%s9952_s30 + $0x54] sm:$0xff]  }
 0x168   : >> { %8669 = vmatprep.subr.bf16.mxu1 %v10582_v11  ;;  %v3085_v20 = vrot.slane %v3083_v16, 4  ;;  %v3379_v16 = vrot.slane %v10572_v29, 5 }
 0x169   : >> { %8331 = vmatpush3.bf16.msra.mxu0 %v9131_v26  ;;  %v2996_v26 = vsel %vm9982_vm11, %v2991_v46, %v10578_v50  ;;  %v3029_v13 = vrot.slane %v3028_v42, 4  ;;  %v10634_v50 = vrot.slane %v3079_v55, 5  ;;  %v10639_v46 = vld [vmem:[%s9952_s30 + $0x74] sm:$0x1]  ;;  %v3076_v3 = vor.u32 %v3075_v56, %v3072_v40  ;;  %v9147_v40 = vld [vmem:[#allocation7 + $0x238] sm:$0xff]  }
 0x16a   : >> { %8348 = vmatprep.subr.bf16.mxu0 %v9134_v52  ;;  %v7318_v36 = vcombine.low %v2986_v47, %v2996_v26  ;;  %v3089_v21 = vshll.u32 %v10639_v46, 16  ;;  %v3340_v42 = vrot.slane %v10451_v4, 5  ;;  %v7336_v4 = vld [vmem:[%s9952_s30 + $0x54] sm:$0xe]  ;;  %v3344_v56 = vrot.slane %v10460_v63, 5 }
 0x16b   : >> { %8677 = vmatpush3.bf16.msra.mxu1 %v10582_v11  ;;  %v3034_v35 = vsel %vm9982_vm11, %v3029_v13, %v10596_v6  ;;  %v7332_v13 = vld [vmem:[%s9952_s30 + $0x24] sm:$0xe]  ;;  %v7344_v53 = vrot.slane %v7336_v4, 9 }
 0x16c   : >> { %8333 = vmatmul.mubr.bf16.vlgmr.msra.gmra.mrb[0].mxu0 %v7316_v14  ;;  %8670 = vmatprep.subr.bf16.mxu1 %v10591_v60  ;;  %v3086_v14 = vor.u32 %v3085_v20, %v10634_v50  ;;  %v3091_v27 = vrot.slane %v3089_v21, 5  ;;  %v7345_v20 = vrot.slane %v7337_v28, 9 }
 0x16d   : >> { %8349 = vmatpush3.bf16.msra.mxu0 %v9134_v52  ;;  %8336 = vmatprep.mubr.bf16.mxu0 %v7317_v2  ;;  %v3052_v52 = vor.u32 %v3051_v45, %v3048_v37  ;;  %v7331_v2 = vld [vmem:[%s9952_s30 + $0x18] sm:$0xe]  ;;  %v7343_v37 = vrot.slane %v7335_v32, 9  ;;  %v3367_v45 = vrot.slane %v3365_v59, 4 }
 0x16e   : >> { %8350 = vmatprep.subr.bf16.mxu0 %v10582_v11  ;;  %8209 = vmatmul.mubr.bf16.gmra.mrb[4].mxu1 %v9137_v44  ;;  %v3068_v44 = vsel %vm9982_vm11, %v3063_v0, %v3067_v30  ;;  %v7339_v47 = vrot.slane %v7331_v2, 9  ;;  %v3087_v9 = vrot.slane %v3086_v14, 4  ;;  %v3346_v30 = vrot.slane %v3344_v56, 4 }
 0x16f   : >> { %8678 = vmatpush3.bf16.msra.mxu1 %v10591_v60  ;;  %8212 = vmatprep.mubr.bf16.mxu1 %v9140_v61  ;;  %v3053_v24 = vrot.slane %v3052_v52, 4  ;;  %v3077_v61 = vrot.slane %v3076_v3, 4  ;;  %v3366_v55 = vsel %vm10222_vm14, %v7343_v37, %v3365_v59  ;;  %v9145_v52 = vld [vmem:[%s9952_s30 + $0x60] sm:$0xff]   ;;  %v3380_v32 = vsel %vm10222_vm14, %v7345_v20, %v3379_v16 }
 0x170   : >> { %8671 = vmatprep.subr.bf16.mxu1 %v10619_v22  ;;  %v3092_v29 = vsel %vm9982_vm11, %v3087_v9, %v3091_v27  ;;  %v3354_v3 = vrot.slane %v10490_v31, 5  ;;  %v3358_v37 = vrot.slane %v10498_v48, 5 }
 0x171   : >> { %8351 = vmatpush3.bf16.msra.mxu0 %v10582_v11  ;;  %v3337_v11 = vrot.slane %v10446_v33, 5  ;;  %v3044_v33 = vsel %vm9982_vm11, %v3039_v8, %v3043_v12  ;;  %v3058_v6 = vsel %vm9982_vm11, %v3053_v24, %v10603_v15  ;;  %v3082_v54 = vsel %vm9982_vm11, %v3077_v61, %v10634_v50  ;;  %v7333_v24 = vld [vmem:[%s9952_s30 + $0x30] sm:$0xe] }
 0x172   : >> { %8352 = vmatprep.subr.bf16.mxu0 %v10591_v60  ;;  %v7320_v17 = vcombine.low %v3034_v35, %v3044_v33  ;;  %v7321_v15 = vcombine.low %v3058_v6, %v3068_v44  ;;  %v3382_v8 = vrot.slane %v10613_v51, 5  ;;  %v3351_v50 = vrot.slane %v10476_v62, 5 }
 0x173   : >> { %8679 = vmatpush3.bf16.msra.mxu1 %v10619_v22  ;;  %v3339_v26 = vrot.slane %v3337_v11, 4  ;;  %v7340_v12 = vrot.slane %v7332_v13, 9  ;;  %v3386_v51 = vrot.slane %v10601_v41, 5  ;;  %v3347_v62 = vrot.slane %v10463_v7, 5 }
 0x174   : >> { %8337 = vmatmul.mubr.bf16.gmra.mrb[4].mxu0 %v7318_v36  ;;  %8672 = vmatprep.subr.bf16.mxu1 %v9142_v19  ;;  %v7341_v35 = vrot.slane %v7333_v24, 9  ;;  %v3389_v7 = vrot.slane %v10639_v46, 5 }
 0x175   : >> { %8353 = vmatpush3.bf16.msra.mxu0 %v10591_v60  ;;  %8340 = vmatprep.mubr.bf16.mxu0 %v7319_v49  ;;  %v3372_v60 = vrot.slane %v10558_v34, 5  ;;  %v3369_v34 = vsel %vm10222_vm14, %v3367_v45, %v3368_v10  ;;  %v3341_v57 = vsel %vm10222_vm14, %v3339_v26, %v3340_v42  ;;  %v3381_v49 = vrot.slane %v3379_v16, 4  ;;  %v7334_v10 = vld [vmem:[%s9952_s30 + $0x3c] sm:$0xe] }
 0x176   : >> { %8354 = vmatprep.subr.bf16.mxu0 %v10619_v22  ;;  %8213 = vmatmul.mubr.bf16.gmra.mrb[8].mxu1 %v9141_v1  ;;  %v7351_v36 = vcombine.low %v3366_v55, %v3369_v34  ;;  %v3388_v2 = vrot.slane %v3386_v51, 4  ;;  %v3345_v33 = vsel %vm10222_vm14, %v7340_v12, %v3344_v56  ;;  %v3352_v31 = vsel %vm10222_vm14, %v7341_v35, %v3351_v50 }
 0x177   : >> { %8680 = vmatpush3.bf16.msra.mxu1 %v9142_v19  ;;  %8216 = vmatprep.mubr.bf16.mxu1 %v9144_v38  ;;  %v3374_v5 = vrot.slane %v3372_v60, 4  ;;  %v3373_v63 = vsel %vm10222_vm14, %v7344_v53, %v3372_v60  ;;  %v3383_v1 = vsel %vm10222_vm14, %v3381_v49, %v3382_v8  ;;  %v3353_v38 = vrot.slane %v3351_v50, 4 }
 0x178   : >> { %8673 = vmatprep.subr.bf16.mxu1 %v9143_v18  ;;  %v7353_v41 = vcombine.low %v3380_v32, %v3383_v1  ;;  %v3390_v44 = vsel %vm10222_vm14, %v3388_v2, %v3389_v7  ;;  %v7342_v48 = vrot.slane %v7334_v10, 9  ;;  %v3361_v26 = vrot.slane %v10540_v43, 5 }
 0x179   : >> { %8355 = vmatpush3.bf16.msra.mxu0 %v10619_v22  ;;  %v3338_v22 = vsel %vm10222_vm14, %v7339_v47, %v3337_v11  ;;  %v3376_v59 = vsel %vm10222_vm14, %v3374_v5, %v3375_v23  ;;  %v7338_v11 = vld [vmem:[%s9952_s30 + $0x6c] sm:$0xe]  ;;  %v3355_v45 = vsel %vm10222_vm14, %v3353_v38, %v3354_v3  ;;  %v3360_v47 = vrot.slane %v3358_v37, 4 }
 0x17a   : >> { %8356 = vmatprep.subr.bf16.mxu0 %v9142_v19  ;;  %v7347_v0 = vcombine.low %v3338_v22, %v3341_v57  ;;  %v7352_v14 = vcombine.low %v3373_v63, %v3376_v59  ;;  %v7346_v21 = vrot.slane %v7338_v11, 9  ;;  %v7349_v60 = vcombine.low %v3352_v31, %v3355_v45 }
 0x17b   : >> { %8681 = vmatpush3.bf16.msra.mxu1 %v9143_v18  ;;  %v3362_v61 = vsel %vm10222_vm14, %v3360_v47, %v3361_v26 }
 0x17c   : >> { %8341 = vmatmul.mubr.bf16.gmra.mrb[8].mxu0 %v7320_v17  ;;  %8674 = vmatprep.subr.bf16.mxu1 %v9146_v25  ;;  %v3387_v6 = vsel %vm10222_vm14, %v7346_v21, %v3386_v51  ;;  %v3359_v17 = vsel %vm10222_vm14, %v7342_v48, %v3358_v37  ;;  %v10741_v51 = vld [vmem:[%s11683_s2] ss:$0 sm:$0xff] }
 0x17d   : >> { %8357 = vmatpush3.bf16.msra.mxu0 %v9142_v19  ;;  %8344 = vmatprep.mubr.bf16.mxu0 %v7321_v15  ;;  %v7322_v19 = vcombine.low %v3082_v54, %v3092_v29  ;;  %v7354_v42 = vcombine.low %v3387_v6, %v3390_v44  ;;  %v7350_v9 = vcombine.low %v3359_v17, %v3362_v61 }
 0x17e   : >> { %8358 = vmatprep.subr.bf16.mxu0 %v9143_v18  ;;  %8217 = vmatmul.mubr.bf16.gmra.mrb[12].mxu1 %v9145_v52 }
 0x17f   : >> { %8682 = vmatpush3.bf16.msra.mxu1 %v9146_v25  ;;  %8372 = vmatprep.mubr.bf16.mxu1 %v7351_v36 }
 0x180   : >> { %8675 = vmatprep.subr.bf16.mxu1 %v9147_v40 }
 0x181   : >> { %8359 = vmatpush3.bf16.msra.mxu0 %v9143_v18  ;;  %v3348_v18 = vsel %vm10222_vm14, %v3346_v30, %v3347_v62 }
 0x182   : >> { %8360 = vmatprep.subr.bf16.mxu0 %v9146_v25  ;;  %v7348_v46 = vcombine.low %v3345_v33, %v3348_v18 }
 0x183   : >> { %8683 = vmatpush3.bf16.msra.mxu1 %v9147_v40 }
 0x184   : >> { %8345 = vmatmul.mubr.bf16.gmra.mrb[12].mxu0 %v7322_v19 }
 0x185   : >> { %8361 = vmatpush3.bf16.msra.mxu0 %v9146_v25  ;;  %8364 = vmatprep.mubr.bf16.mxu0 %v7347_v0 }
 0x186   : >> { %8362 = vmatprep.subr.bf16.mxu0 %v9147_v40  ;;  %8373 = vmatmul.mubr.bf16.vlgmr.msra.gmra.mrb[16].mxu1 %v7352_v14 }
 0x187   : >> { %8376 = vmatprep.mubr.bf16.mxu1 %v7353_v41 }
 0x189   : >> { %8363 = vmatpush3.bf16.msra.mxu0 %v9147_v40 }
 0x18c   : >> { %8365 = vmatmul.mubr.bf16.vlgmr.msra.gmra.mrb[0].mxu0 %v7348_v46 }
 0x18d   : >> { %8368 = vmatprep.mubr.bf16.mxu0 %v7349_v60 }
 0x18e   : >> { %8377 = vmatmul.mubr.bf16.gmra.mrb[20].mxu1 %v7354_v42 }
 0x194   : >> { %8369 = vmatmul.mubr.bf16.gmra.mrb[4].mxu0 %v7350_v9 }
 0x239   : >> { %v8206_v27 = vpop.f32.mrb[0].mxu1 }
 0x23a   : >> { %v1828_v15 = vpop.f32.mrb[1].mxu1 }
 0x23b   : >> { %v8207_v55 = vpop.f32.mrb[2].mxu1 }
 0x23c   : >> { %v10722_v34 = vpop.f32.mrb[3].mxu1 }
 0x241   : >> { %v10724_v4 = vpop.f32.mrb[4].mxu1 }
 0x242   : >> { %v10726_v43 = vpop.f32.mrb[5].mxu1 }
 0x243   : >> { %v10728_v16 = vpop.f32.mrb[6].mxu1 }
 0x244   : >> { %v10730_v25 = vpop.f32.mrb[7].mxu1 }
 0x249   : >> { %v8214_v28 = vpop.f32.mrb[8].mxu1 }
 0x24a   : >> { %v1860_v5 = vpop.f32.mrb[9].mxu1 }
 0x24b   : >> { %v8215_v23 = vpop.f32.mrb[10].mxu1 }
 0x24c   : >> { %v1863_v52 = vpop.f32.mrb[11].mxu1 }
 0x24f   : >> { %v8342_v22 = vpop.f32.mrb[8].mxu0 }
 0x250   : >> { %v8692_v57 = vadd.f32 %v8342_v22, %v8214_v28  ;;  %v3256_v54 = vpop.f32.mrb[9].mxu0 }
 0x251   : >> { %v8694_v29 = vadd.f32 %v3256_v54, %v1860_v5  ;;  %v8343_v36 = vpop.f32.mrb[10].mxu0  ;;  %v8218_v40 = vpop.f32.mrb[12].mxu1 }
 0x252   : >> { %v8696_v13 = vadd.f32 %v8343_v36, %v8215_v23  ;;  %v3259_v53 = vpop.f32.mrb[11].mxu0  ;;  %v1876_v20 = vpop.f32.mrb[13].mxu1 }
 0x253   : >> { %v8698_v56 = vadd.f32 %v3259_v53, %v1863_v52  ;;  %v8219_v49 = vpop.f32.mrb[14].mxu1 }
 0x254   : >> { %v1879_v8 = vpop.f32.mrb[15].mxu1 }
 0x257   : >> { %v8346_v50 = vpop.f32.mrb[12].mxu0 }
 0x258   : >> { %v10732_v12 = vadd.f32 %v8346_v50, %v8218_v40  ;;  %v3272_v59 = vpop.f32.mrb[13].mxu0  ;;  %v7407_v40 = vld [vmem:[%s10765_s7 + $0x48] sm:$0xf] }
 0x259   : >> { %v10734_v24 = vadd.f32 %v3272_v59, %v1876_v20  ;;  %v8347_v19 = vpop.f32.mrb[14].mxu0  ;;  %v8374_v30 = vpop.f32.mrb[16].mxu1 }
 0x25a   : >> { %v10736_v0 = vadd.f32 %v8347_v19, %v8219_v49  ;;  %v3275_v63 = vpop.f32.mrb[15].mxu0  ;;  %v8693_v32 = vadd.f32 %v8692_v57, %v8374_v30  ;;  %v3554_v1 = vpop.f32.mrb[17].mxu1  ;;  %v7402_v19 = vld [vmem:[%s10765_s7 + $0x3c] sm:$0xf] }
 0x25b   : >> { %v10743_v62 = vadd.f32 %v3275_v63, %v1879_v8  ;;  %v8695_v11 = vadd.f32 %v8694_v29, %v3554_v1  ;;  %v8375_v35 = vpop.f32.mrb[18].mxu1 }
 0x25c   : >> { %v3618_v38 = vadd.f32 %v8693_v32, %v10741_v51  ;;  %v8697_v3 = vadd.f32 %v8696_v13, %v8375_v35  ;;  %v3557_v14 = vpop.f32.mrb[19].mxu1 }
 0x25d   : >> { %v3616_v41 = vadd.f32 %v8695_v11, %v10741_v51  ;;  %v8699_v21 = vadd.f32 %v8698_v56, %v3557_v14 }
 0x25e   : >> { %v3634_v7 = vmax.f32 %v3618_v38, 0.0  ;;  %v3619_v33 = vadd.f32 %v8697_v3, %v10741_v51 }
 0x25f   : >> { %v8366_v2 = vpop.f32.mrb[0].mxu0  ;;  %v3632_v31 = vmax.f32 %v3616_v41, 0.0  ;;  %v10749_v45 = vadd.f32 %v8699_v21, %v10741_v51 }
 0x260   : >> { %v8684_v18 = vadd.f32 %v8366_v2, %v8206_v27  ;;  %v3522_v37 = vpop.f32.mrb[1].mxu0  ;;  %v7731_v10 = vpack.c.bf16 %v3634_v7, %v3634_v7  ;;  %v3635_v44 = vmax.f32 %v3619_v33, 0.0  ;;  %v7410_v2 = vld [vmem:[%s10765_s7 + $0x50] sm:$0x1] }
 0x261   : >> { %v8685_v46 = vadd.f32 %v3522_v37, %v1828_v15  ;;  %v8367_v6 = vpop.f32.mrb[2].mxu0  ;;  %v7729_v48 = vpack.c.bf16 %v3632_v31, %v3632_v31  ;;  %v3633_v42 = vmax.f32 %v10749_v45, 0.0  ;;  %v10753_v17 = vpop.f32.mrb[20].mxu1 }
 0x262   : >> { %v3610_v60 = vadd.f32 %v8684_v18, %v10741_v51  ;;  %v8686_v47 = vadd.f32 %v8367_v6, %v8207_v55  ;;  %v3525_v26 = vpop.f32.mrb[3].mxu0  ;;  %v3776_v61 = vshrl.u32 %v7731_v10, 16  ;;  %v3779_v9 = vshll.u32 %v7731_v10, 16  ;;  %v10756_v5 = vpop.f32.mrb[21].mxu1 }
 0x263   : >> { %v3608_v27 = vadd.f32 %v8685_v46, %v10741_v51  ;;  %v7732_v28 = vpack.c.bf16 %v3635_v44, %v3635_v44  ;;  %v3759_v23 = vshrl.u32 %v7729_v48, 16  ;;  %v3762_v52 = vshll.u32 %v7729_v48, 16  ;;  %v10759_v57 = vpop.f32.mrb[22].mxu1  ;;  %v7387_v46 = vld [vmem:[%s10765_s7 + $0x18] sm:$0xf] }
 0x264   : >> { %v3626_v15 = vmax.f32 %v3610_v60, 0.0  ;;  %v3611_v22 = vadd.f32 %v8686_v47, %v10741_v51  ;;  %v3778_v55 = vrot.slane %v3776_v61, 7  ;;  %v10761_v13 = vpop.f32.mrb[23].mxu1  ;;  %v8687_v49 = vadd.f32 %v3525_v26, %v10722_v34  ;;  %v7382_v61 = vld [vmem:[%s10765_s7 + $0xc] sm:$0xf] }
 0x265   : >> { %v3624_v54 = vmax.f32 %v3608_v27, 0.0  ;;  %v3784_v29 = vshrl.u32 %v7732_v28, 16  ;;  %v3787_v36 = vshll.u32 %v7732_v28, 16  ;;  %v10768_v56 = vrot.slane %v3759_v23, 7 }
 0x266   : >> { %v7723_v53 = vpack.c.bf16 %v3626_v15, %v3626_v15  ;;  %v3627_v20 = vmax.f32 %v3611_v22, 0.0  ;;  %v3781_v8 = vor.u32 %v3779_v9, %v3778_v55  ;;  %v3782_v50 = vrot.slane %v3778_v55, 4 }
 0x267   : >> { %v7721_v59 = vpack.c.bf16 %v3624_v54, %v3624_v54  ;;  %v3786_v63 = vrot.slane %v3784_v29, 7  ;;  %v8370_v30 = vpop.f32.mrb[4].mxu0  ;;  %v3764_v11 = vor.u32 %v3762_v52, %v10768_v56  ;;  %v3765_v35 = vrot.slane %v10768_v56, 4  ;;  %v7390_v29 = vld [vmem:[%s10765_s7 + $0x20] sm:$0x1] }
 0x268   : >> { %v3708_v32 = vshrl.u32 %v7723_v53, 16  ;;  %v3711_v1 = vshll.u32 %v7723_v53, 16  ;;  %v3538_v38 = vpop.f32.mrb[5].mxu0  ;;  %v3890_v34 = vsel %vm9832_vm7, %v3781_v8, %v7407_v40  ;;  %v7724_v21 = vpack.c.bf16 %v3627_v20, %v3627_v20 }
 0x269   : >> { %v3691_v14 = vshrl.u32 %v7721_v59, 16  ;;  %v3694_v41 = vshll.u32 %v7721_v59, 16  ;;  %v8371_v7 = vpop.f32.mrb[6].mxu0  ;;  %7408 = vst [vmem:[%s10765_s7 + $0x48] sm:$0xf] %v3890_v34  ;;  %v3883_v18 = vsel %vm9832_vm7, %v3764_v11, %v7402_v19  ;;  %v3789_v37 = vor.u32 %v3787_v36, %v3786_v63 }
 0x26a   : >> { %v3710_v33 = vrot.slane %v3708_v32, 7  ;;  %v3791_v31 = vrot.slane %v3786_v63, 4  ;;  %v10780_v10 = vpop.f32.mrb[7].mxu0  ;;  %7403 = vst [vmem:[%s10765_s7 + $0x3c] sm:$0xf] %v3883_v18  ;;  %v3716_v44 = vshrl.u32 %v7724_v21, 16  ;;  %v3609_v48 = vadd.f32 %v8687_v49, %v10741_v51 }
 0x26b   : >> { %v3693_v6 = vrot.slane %v3691_v14, 7  ;;  %v3719_v60 = vshll.u32 %v7724_v21, 16  ;;  %v3790_v27 = vsel %vm9839_vm8, %v3782_v50, %v3789_v37  ;;  %v7730_v36 = vpack.c.bf16 %v3633_v42, %v3633_v42  ;;  %v7405_v14 = vld [vmem:[%s10765_s7 + $0x44] sm:$0x1] }
 0x26c   : >> { %v3713_v47 = vor.u32 %v3711_v1, %v3710_v33  ;;  %v3714_v26 = vrot.slane %v3710_v33, 4  ;;  %v3894_v15 = vsel %vm9672_vm2, %v3791_v31, %v7410_v2  ;;  %v3718_v22 = vrot.slane %v3716_v44, 7  ;;  %7409 = vst [vmem:[%s10765_s7 + $0x4c] sm:$0xf] %v3790_v27  ;;  %v7385_v33 = vld [vmem:[%s10765_s7 + $0x14] sm:$0x1] }
 0x26d   : >> { %v3696_v23 = vor.u32 %v3694_v41, %v3693_v6  ;;  %v3697_v52 = vrot.slane %v3693_v6, 4  ;;  %7411 = vst [vmem:[%s10765_s7 + $0x50] sm:$0x1] %v3894_v15  ;;  %v3625_v55 = vmax.f32 %v3609_v48, 0.0  ;;  %v8688_v53 = vadd.f32 %v8370_v30, %v10724_v4 }
 0x26e   : >> { %v3862_v54 = vsel %vm9832_vm7, %v3713_v47, %v7387_v46  ;;  %v8701_v40 = vadd.f32 %v10732_v12, %v10753_v17  ;;  %v3721_v49 = vor.u32 %v3719_v60, %v3718_v22  ;;  %v3723_v8 = vrot.slane %v3718_v22, 4 }
 0x26f   : >> { %7388 = vst [vmem:[%s10765_s7 + $0x18] sm:$0xf] %v3862_v54  ;;  %v3855_v20 = vsel %vm9832_vm7, %v3696_v23, %v7382_v61  ;;  %v7722_v50 = vpack.c.bf16 %v3625_v55, %v3625_v55  ;;  %v3767_v59 = vshrl.u32 %v7730_v36, 16  ;;  %v3770_v45 = vshll.u32 %v7730_v36, 16  ;;  %v7397_v61 = vld [vmem:[%s10765_s7 + $0x30] sm:$0xf] }
 0x270   : >> { %7383 = vst [vmem:[%s10765_s7 + $0xc] sm:$0xf] %v3855_v20  ;;  %v3614_v42 = vadd.f32 %v8688_v53, %v10741_v51  ;;  %v3622_v4 = vadd.f32 %v8701_v40, %v10741_v51  ;;  %v3722_v12 = vsel %vm9839_vm8, %v3714_v26, %v3721_v49  ;;  %v3866_v17 = vsel %vm9672_vm2, %v3723_v8, %v7390_v29  ;;  %v7417_v55 = vld [vmem:[%s10765_s7 + $0x60] sm:$0xf] }
 0x271   : >> { %v3699_v19 = vshrl.u32 %v7722_v50, 16  ;;  %v3702_v63 = vshll.u32 %v7722_v50, 16  ;;  %7389 = vst [vmem:[%s10765_s7 + $0x1c] sm:$0xf] %v3722_v12  ;;  %7391 = vst [vmem:[%s10765_s7 + $0x20] sm:$0x1] %v3866_v17  ;;  %v8689_v11 = vadd.f32 %v3538_v38, %v10726_v43  ;;  %v8703_v41 = vadd.f32 %v10734_v24, %v10756_v5 }
 0x272   : >> { %v3769_v30 = vrot.slane %v3767_v59, 7  ;;  %v3630_v32 = vmax.f32 %v3614_v42, 0.0  ;;  %v3638_v1 = vmax.f32 %v3622_v4, 0.0  ;;  %v8690_v21 = vadd.f32 %v8371_v7, %v10728_v16  ;;  %v7392_v12 = vld [vmem:[%s10765_s7 + $0x24] sm:$0xf] }
 0x273   : >> { %v3701_v34 = vrot.slane %v3699_v19, 7  ;;  %v8705_v2 = vadd.f32 %v10736_v0, %v10759_v57  ;;  %v3612_v6 = vadd.f32 %v8689_v11, %v10741_v51  ;;  %v3620_v24 = vadd.f32 %v8703_v41, %v10741_v51  ;;  %v7412_v17 = vld [vmem:[%s10765_s7 + $0x54] sm:$0xf] }
 0x274   : >> { %v3772_v18 = vor.u32 %v3770_v45, %v3769_v30  ;;  %v3774_v37 = vrot.slane %v3769_v30, 4  ;;  %v7727_v31 = vpack.c.bf16 %v3630_v32, %v3630_v32  ;;  %v7735_v46 = vpack.c.bf16 %v3638_v1, %v3638_v1 }
 0x275   : >> { %v3704_v43 = vor.u32 %v3702_v63, %v3701_v34  ;;  %v3706_v38 = vrot.slane %v3701_v34, 4  ;;  %v3628_v48 = vmax.f32 %v3612_v6, 0.0  ;;  %v3636_v47 = vmax.f32 %v3620_v24, 0.0 }
 0x276   : >> { %v3773_v16 = vsel %vm9839_vm8, %v3765_v35, %v3772_v18  ;;  %v3887_v0 = vsel %vm9672_vm2, %v3774_v37, %v7405_v14  ;;  %v3742_v5 = vshrl.u32 %v7727_v31, 16  ;;  %v3745_v57 = vshll.u32 %v7727_v31, 16  ;;  %v7400_v37 = vld [vmem:[%s10765_s7 + $0x38] sm:$0x1]  ;;  %v7420_v31 = vld [vmem:[%s10765_s7 + $0x68] sm:$0x1] }
 0x277   : >> { %v3705_v7 = vsel %vm9839_vm8, %v3697_v52, %v3704_v43  ;;  %v3859_v44 = vsel %vm9672_vm2, %v3706_v38, %v7385_v33  ;;  %7404 = vst [vmem:[%s10765_s7 + $0x40] sm:$0xf] %v3773_v16  ;;  %7406 = vst [vmem:[%s10765_s7 + $0x44] sm:$0x1] %v3887_v0  ;;  %v3810_v60 = vshrl.u32 %v7735_v46, 16  ;;  %v3813_v56 = vshll.u32 %v7735_v46, 16 }
 0x278   : >> { %7384 = vst [vmem:[%s10765_s7 + $0x10] sm:$0xf] %v3705_v7  ;;  %7386 = vst [vmem:[%s10765_s7 + $0x14] sm:$0x1] %v3859_v44  ;;  %v3744_v35 = vrot.slane %v3742_v5, 7  ;;  %v3615_v26 = vadd.f32 %v8690_v21, %v10741_v51  ;;  %v3623_v15 = vadd.f32 %v8705_v2, %v10741_v51  ;;  %v8691_v23 = vadd.f32 %v10780_v10, %v10730_v25 }
 0x279   : >> { %v3812_v27 = vrot.slane %v3810_v60, 7  ;;  %v8707_v52 = vadd.f32 %v10743_v62, %v10761_v13  ;;  %v7725_v54 = vpack.c.bf16 %v3628_v48, %v3628_v48  ;;  %v7733_v29 = vpack.c.bf16 %v3636_v47, %v3636_v47 }
 0x27a   : >> { %v3747_v22 = vor.u32 %v3745_v57, %v3744_v35  ;;  %v3631_v53 = vmax.f32 %v3615_v26, 0.0  ;;  %v3639_v40 = vmax.f32 %v3623_v15, 0.0  ;;  %v3613_v42 = vadd.f32 %v8691_v23, %v10741_v51  ;;  %v7415_v15 = vld [vmem:[%s10765_s7 + $0x5c] sm:$0x1] }
 0x27b   : >> { %v3815_v36 = vor.u32 %v3813_v56, %v3812_v27  ;;  %v3725_v49 = vshrl.u32 %v7725_v54, 16  ;;  %v3728_v8 = vshll.u32 %v7725_v54, 16  ;;  %v3793_v50 = vshrl.u32 %v7733_v29, 16 }
 0x27c   : >> { %v3876_v20 = vsel %vm9832_vm7, %v3747_v22, %v7397_v61  ;;  %v3796_v62 = vshll.u32 %v7733_v29, 16  ;;  %v7728_v13 = vpack.c.bf16 %v3631_v53, %v3631_v53  ;;  %v7736_v10 = vpack.c.bf16 %v3639_v40, %v3639_v40 }
 0x27d   : >> { %7398 = vst [vmem:[%s10765_s7 + $0x30] sm:$0xf] %v3876_v20  ;;  %v3904_v25 = vsel %vm9832_vm7, %v3815_v36, %v7417_v55  ;;  %v3727_v59 = vrot.slane %v3725_v49, 7  ;;  %v3795_v45 = vrot.slane %v3793_v50, 7  ;;  %v3621_v4 = vadd.f32 %v8707_v52, %v10741_v51 }
 0x27e   : >> { %7418 = vst [vmem:[%s10765_s7 + $0x60] sm:$0xf] %v3904_v25  ;;  %v3750_v19 = vshrl.u32 %v7728_v13, 16  ;;  %v3818_v63 = vshrl.u32 %v7736_v10, 16  ;;  %v3753_v1 = vshll.u32 %v7728_v13, 16  ;;  %v3821_v11 = vshll.u32 %v7736_v10, 16 }
 0x27f   : >> { %v3730_v30 = vor.u32 %v3728_v8, %v3727_v59  ;;  %v3798_v32 = vor.u32 %v3796_v62, %v3795_v45  ;;  %v3629_v41 = vmax.f32 %v3613_v42, 0.0  ;;  %v3637_v21 = vmax.f32 %v3621_v4, 0.0 }
 0x280   : >> { %v3752_v34 = vrot.slane %v3750_v19, 7  ;;  %v3820_v14 = vrot.slane %v3818_v63, 7  ;;  %v3748_v2 = vrot.slane %v3744_v35, 4  ;;  %v3816_v33 = vrot.slane %v3812_v27, 4  ;;  %v7395_v27 = vld [vmem:[%s10765_s7 + $0x2c] sm:$0x1] }
 0x281   : >> { %v3869_v51 = vsel %vm9832_vm7, %v3730_v30, %v7392_v12  ;;  %v3897_v18 = vsel %vm9832_vm7, %v3798_v32, %v7412_v17  ;;  %v7726_v24 = vpack.c.bf16 %v3629_v41, %v3629_v41  ;;  %v7734_v16 = vpack.c.bf16 %v3637_v21, %v3637_v21 }
 0x282   : >> { %7393 = vst [vmem:[%s10765_s7 + $0x24] sm:$0xf] %v3869_v51  ;;  %7413 = vst [vmem:[%s10765_s7 + $0x54] sm:$0xf] %v3897_v18  ;;  %v3755_v46 = vor.u32 %v3753_v1, %v3752_v34  ;;  %v3757_v43 = vrot.slane %v3752_v34, 4  ;;  %v3823_v38 = vor.u32 %v3821_v11, %v3820_v14  ;;  %v3825_v6 = vrot.slane %v3820_v14, 4 }
 0x283   : >> { %v3733_v44 = vshrl.u32 %v7726_v24, 16  ;;  %v3801_v60 = vshrl.u32 %v7734_v16, 16  ;;  %v3736_v35 = vshll.u32 %v7726_v24, 16  ;;  %v3804_v47 = vshll.u32 %v7734_v16, 16 }
 0x284   : >> { %v3756_v0 = vsel %vm9839_vm8, %v3748_v2, %v3755_v46  ;;  %v3880_v5 = vsel %vm9672_vm2, %v3757_v43, %v7400_v37  ;;  %v3824_v57 = vsel %vm9839_vm8, %v3816_v33, %v3823_v38  ;;  %v3908_v7 = vsel %vm9672_vm2, %v3825_v6, %v7420_v31 }
 0x285   : >> { %7399 = vst [vmem:[%s10765_s7 + $0x34] sm:$0xf] %v3756_v0  ;;  %7401 = vst [vmem:[%s10765_s7 + $0x38] sm:$0x1] %v3880_v5  ;;  %v3735_v56 = vrot.slane %v3733_v44, 7  ;;  %v3803_v48 = vrot.slane %v3801_v60, 7 }
 0x286   : >> { %7419 = vst [vmem:[%s10765_s7 + $0x64] sm:$0xf] %v3824_v57  ;;  %7421 = vst [vmem:[%s10765_s7 + $0x68] sm:$0x1] %v3908_v7  ;;  %v3731_v26 = vrot.slane %v3727_v59, 4  ;;  %v3799_v61 = vrot.slane %v3795_v45, 4 }
 0x287   : >> { %v3738_v23 = vor.u32 %v3736_v35, %v3735_v56  ;;  %v3740_v52 = vrot.slane %v3735_v56, 4  ;;  %v3806_v22 = vor.u32 %v3804_v47, %v3803_v48  ;;  %v3808_v55 = vrot.slane %v3803_v48, 4  ;;  %740 = sbr.rel (!%p738_p0) target bundleno = 206 (0xce), region = 155 }
 0x289   : >> { %v3739_v54 = vsel %vm9839_vm8, %v3731_v26, %v3738_v23  ;;  %v3873_v29 = vsel %vm9672_vm2, %v3740_v52, %v7395_v27  ;;  %v3807_v36 = vsel %vm9839_vm8, %v3799_v61, %v3806_v22  ;;  %v3901_v53 = vsel %vm9672_vm2, %v3808_v55, %v7415_v15 }
 0x28a   : >> { %7394 = vst [vmem:[%s10765_s7 + $0x28] sm:$0xf] %v3739_v54  ;;  %7396 = vst [vmem:[%s10765_s7 + $0x2c] sm:$0x1] %v3873_v29 }
 0x28b   : >> { %7414 = vst [vmem:[%s10765_s7 + $0x58] sm:$0xf] %v3807_v36  ;;  %7416 = vst [vmem:[%s10765_s7 + $0x5c] sm:$0x1] %v3901_v53 }
 0x28e LB: >> { %v9152_v40 = vld [vmem:[#allocation9 + $0x40] sm:$0xff]   ;;  %v9154_v49 = vld [vmem:[#allocation9 + $0x48] sm:$0xff]   ;;  %v9156_v50 = vld [vmem:[#allocation9 + $0x50] sm:$0xff]   ;;  %s7737_s8 = smul.u32 96, %s9432_s6  ;;  %s7755_s16 = sshll.u32 %s9432_s6, 6  ;;  %s9432_s6 = sphi %s10892_s6, %s3915_s6  }
 0x28f   : >> { %v9153_v20 = vld [vmem:[#allocation9 + $0x100] sm:$0xff]   ;;  %8380 = vmatprep.subr.bf16.mxu1 %v9152_v40  ;;  %v9155_v8 = vld [vmem:[#allocation9 + $0x108] sm:$0xff]   ;;  %v9157_v25 = vld [vmem:[#allocation9 + $0x110] sm:$0xff]   ;;  %s11613_s10 = scalar_lea.vmem %s9812_s24, %s7755_s16 [#allocation10]  ;;  %s3915_s6 = sadd.s32 1, %s9432_s6  }
 0x290   : >> { %8508 = vmatprep.subr.bf16.mxu0 %v9153_v20  ;;  %8381 = vmatpush3.bf16.msra.mxu1 %v9152_v40  ;;  %v9158_v3 = vld [vmem:[#allocation9 + $0x58] sm:$0xff]   ;;  %v9160_v28 = vld [vmem:[#allocation9 + $0x60] sm:$0xff]   ;;  %v9162_v13 = vld [vmem:[#allocation9 + $0x68] sm:$0xff]   ;;  %s10898_s12 = scalar_lea.vmem [#allocation3], %s7737_s8  ;;  %p3912_p2 = scmp.ge.s32.totalorder %s3915_s6, 2  }
 0x291   : >> { %8509 = vmatpush3.bf16.msra.mxu0 %v9153_v20  ;;  %8382 = vmatprep.subr.bf16.mxu1 %v9154_v49  ;;  %v9159_v9 = vld [vmem:[#allocation9 + $0x118] sm:$0xff]   ;;  %v9161_v62 = vld [vmem:[#allocation9 + $0x120] sm:$0xff]   ;;  %v9163_v10 = vld [vmem:[#allocation9 + $0x128] sm:$0xff]   ;;  %s7756_s28 = sshll.u32 (%p3912_p2), %s9494_s22, 11  ;;  %s6895_s11 = sshll.u32 (%p3912_p2), %s9812_s24, 4  ;;  %s11637_s11 = int_to_ptr.vmem [resolvable:$true] %s6895_s11 }
 0x292   : >> { %8510 = vmatprep.subr.bf16.mxu0 %v9155_v8  ;;  %v10901_v59 = vld [vmem:[%s10898_s12] sm:$0xf]  ;;  %v10904_v45 = vld [vmem:[%s10898_s12 + $0x4] sm:$0xf]  ;;  %v3952_v42 = vld [vmem:[%s10898_s12 + $0x8] sm:$0x1]  ;;  %s11634_s30 = scalar_lea.hbm (%p3912_p2), %s11686_s5, %s7756_s28 }
 0x293   : >> { %v3964_v4 = vshrl.u32 %v10901_v59, 16  ;;  %v3967_v12 = vshll.u32 %v10901_v59, 16  ;;  %v3973_v17 = vshll.u32 %v10904_v45, 16  ;;  %v3977_v19 = vshrl.u32 %v10904_v45, 16  ;;  %v7515_v63 = vld [vmem:[%s10898_s12 + $0xc] sm:$0xf] }
 0x294   : >> { %8383 = vmatpush3.bf16.msra.mxu1 %v9154_v49  ;;  %v3983_v30 = vshll.u32 %v3952_v42, 16  ;;  %v10913_v32 = vld [vmem:[%s10898_s12 + $0x10] sm:$0xf]  ;;  %v10916_v1 = vld [vmem:[%s10898_s12 + $0x14] sm:$0x1]  ;;  %v9164_v11 = vld [vmem:[#allocation9 + $0x70] sm:$0xff]  }
 0x295   : >> { %8511 = vmatpush3.bf16.msra.mxu0 %v9155_v8  ;;  %8384 = vmatprep.subr.bf16.mxu1 %v9156_v50  ;;  %v9165_v34 = vld [vmem:[#allocation9 + $0x130] sm:$0xff]   ;;  %v3966_v14 = vrot.slane %v3964_v4, 4  ;;  %v3969_v41 = vrot.slane %v3967_v12, 5  ;;  %v3975_v21 = vrot.slane %v3973_v17, 5  ;;  %v3979_v2 = vrot.slane %v3977_v19, 4  ;;  %v9166_v56 = vld [vmem:[#allocation9 + $0x78] sm:$0xff]  }
 0x296   : >> { %8512 = vmatprep.subr.bf16.mxu0 %v9157_v25  ;;  %v3985_v33 = vrot.slane %v3983_v30, 5  ;;  %v5106_v51 = vshrl.u32 %v7515_v63, 16  ;;  %v5109_v18 = vshll.u32 %v7515_v63, 16  ;;  %v5115_v37 = vshll.u32 %v10913_v32, 16  ;;  %v10920_v31 = vld [vmem:[%s10898_s12 + $0xc] sm:$0xf] }
 0x297   : >> { %v3970_v46 = vor.u32 %v3969_v41, %v3966_v14  ;;  %v3980_v43 = vor.u32 %v3979_v2, %v3975_v21  ;;  %v5119_v38 = vshrl.u32 %v10913_v32, 16  ;;  %v5125_v6 = vshll.u32 %v10916_v1, 16  ;;  %v10925_v24 = vld [vmem:[%s10898_s12 + $0x10] sm:$0xf]  ;;  %v3953_v48 = vld [vmem:[%s10898_s12 + $0x14] sm:$0x1] }
 0x298   : >> { %8385 = vmatpush3.bf16.msra.mxu1 %v9156_v50  ;;  %v5108_v16 = vrot.slane %v5106_v51, 4  ;;  %v5111_v0 = vrot.slane %v5109_v18, 5  ;;  %v5117_v5 = vrot.slane %v5115_v37, 5  ;;  %v3988_v47 = vshrl.u32 %v10920_v31, 16  ;;  %v9167_v27 = vld [vmem:[#allocation9 + $0x138] sm:$0xff]   ;;  %s6882_s17 = scalar_lea.sflag (%p3912_p2), [#allocation6], %s9654_s14 }
 0x299   : >> { %8513 = vmatpush3.bf16.msra.mxu0 %v9157_v25  ;;  %8386 = vmatprep.subr.bf16.mxu1 %v9158_v3  ;;  %v3971_v57 = vrot.slane %v3970_v46, 4  ;;  %v3981_v7 = vrot.slane %v3980_v43, 4  ;;  %v5121_v44 = vrot.slane %v5119_v38, 4  ;;  %v5127_v60 = vrot.slane %v5125_v6, 5  ;;  %v7518_v55 = vld [vmem:[%s10898_s12 + $0x18] sm:$0xf] }
 0x29a   : >> { %8514 = vmatprep.subr.bf16.mxu0 %v9159_v9  ;;  %v5112_v35 = vor.u32 %v5111_v0, %v5108_v16  ;;  %v3991_v26 = vshll.u32 %v10920_v31, 16  ;;  %v3997_v61 = vshll.u32 %v10925_v24, 16  ;;  %v4001_v22 = vshrl.u32 %v10925_v24, 16  ;;  %v10938_v40 = vld [vmem:[%s10898_s12 + $0x1c] sm:$0xf]  ;;  %v9168_v25 = vld [vmem:[#allocation9] sm:$0xff]  }
 0x29b   : >> { %v3976_v15 = vsel %vm9982_vm11, %v3971_v57, %v3975_v21  ;;  %v3986_v23 = vsel %vm9982_vm11, %v3981_v7, %v3985_v33  ;;  %v5122_v52 = vor.u32 %v5121_v44, %v5117_v5  ;;  %v3990_v36 = vrot.slane %v3988_v47, 4  ;;  %v10962_v37 = vld [vmem:[%s10898_s12 + $0x18] sm:$0xf]  ;;  %v10968_v6 = vld [vmem:[%s10898_s12 + $0x1c] sm:$0xf]  ;;  %s9338_s7 = scalar_lea.vmem (%p3912_p2), %s11637_s11, 2048 }
 0x29c   : >> { %8387 = vmatpush3.bf16.msra.mxu1 %v9158_v3  ;;  %v7425_v54 = vcombine.low %v3976_v15, %v3986_v23  ;;  %v5113_v29 = vrot.slane %v5112_v35, 4  ;;  %v3993_v53 = vrot.slane %v3991_v26, 5  ;;  %v3999_v49 = vrot.slane %v3997_v61, 5  ;;  %v10941_v3 = vld [vmem:[%s10898_s12 + $0x20] sm:$0x1]  ;;  %p9339_p3 = scmp.ne.s32.totalorder (%p3912_p2), %s11637_s11, %s9338_s7  ;;  %p11752_p7 = scmp.ne.s32.totalorder (%p3912_p2), %s11708_s23, 0 }
 0x29d   : >> { %8515 = vmatpush3.bf16.msra.mxu0 %v9159_v9  ;;  %8388 = vmatprep.subr.bf16.mxu1 %v9160_v28  ;;  %v5123_v20 = vrot.slane %v5122_v52, 4  ;;  %v4003_v8 = vrot.slane %v4001_v22, 4  ;;  %v4007_v50 = vshll.u32 %v3953_v48, 16  ;;  %v10943_v9 = vld [vmem:[#allocation9 + $0x140] sm:$0xff]   ;;  %v5130_v17 = vshrl.u32 %v7518_v55, 16  ;;  %s9440_s6 = smov (%p3912_p2), [#allocation10]  }
 0x29e   : >> { %8516 = vmatprep.subr.bf16.mxu0 %v9161_v62  ;;  %8396 = vmatprep.mubr.bf16.mxu1 %v7425_v54  ;;  %v5139_v41 = vshll.u32 %v10938_v40, 16  ;;  %v5143_v21 = vshrl.u32 %v10938_v40, 16  ;;  %v5149_v18 = vshll.u32 %v10941_v3, 16  ;;  %v3954_v16 = vld [vmem:[%s10898_s12 + $0x20] sm:$0x1]  ;;  %v4012_v47 = vshrl.u32 %v10962_v37, 16  ;;  %p9340_p9 = pnand (%p3912_p2), %p9339_p3, %p11752_p7 }
 0x29f   : >> { %v5128_v42 = vsel %vm9982_vm11, %v5123_v20, %v5127_v60  ;;  %v4004_v4 = vor.u32 %v4003_v8, %v3999_v49  ;;  %v4009_v12 = vrot.slane %v4007_v50, 5  ;;  %v5132_v14 = vrot.slane %v5130_v17, 4  ;;  %v9170_v60 = vld [vmem:[#allocation9 + $0x8] sm:$0xff]   ;;  %v10979_v61 = vld [vmem:[%s10898_s12 + $0x28] sm:$0xf]  ;;  %v9172_v50 = vld [vmem:[#allocation9 + $0x10] sm:$0xff]  }
 0x2a0   : >> { %8389 = vmatpush3.bf16.msra.mxu1 %v9160_v28  ;;  %v5118_v28 = vsel %vm9982_vm11, %v5113_v29, %v5117_v5  ;;  %v5141_v43 = vrot.slane %v5139_v41, 5  ;;  %v5145_v38 = vrot.slane %v5143_v21, 4  ;;  %v4015_v26 = vshll.u32 %v10962_v37, 16  ;;  %v10984_v22 = vld [vmem:[%s10898_s12 + $0x2c] sm:$0x1]  ;;  %p9341_p12 = pneg (%p3912_p2), %p9340_p9  ;;  %s9342_s8 = sshll.u32 (%p3912_p2), %s9440_s6, 4  ;;  %s9343_s8 = int_to_ptr.vmem [resolvable:$false] %s9342_s8 }
 0x2a1   : >> { %8517 = vmatpush3.bf16.msra.mxu0 %v9161_v62  ;;  %8390 = vmatprep.subr.bf16.mxu1 %v9162_v13  ;;  %v3994_v62 = vor.u32 %v3993_v53, %v3990_v36  ;;  %v7539_v19 = vcombine.low %v5118_v28, %v5128_v42  ;;  %v4021_v15 = vshll.u32 %v10968_v6, 16  ;;  %v4025_v23 = vshrl.u32 %v10968_v6, 16  ;;  %s9344_s22 = scalar_lea.vmem (%p3912_p2), %s9343_s8, 4096  ;;  %p9345_p1 = scmp.lt.s32.totalorder (%p3912_p2), %s11637_s11, %s9343_s8 }
 0x2a2   : >> { %8518 = vmatprep.subr.bf16.mxu0 %v9163_v10  ;;  %v5146_v35 = vor.u32 %v5145_v38, %v5141_v43  ;;  %v4031_v52 = vshll.u32 %v3954_v16, 16  ;;  %v4014_v29 = vrot.slane %v4012_v47, 4  ;;  %v4017_v36 = vrot.slane %v4015_v26, 5  ;;  %v9173_v26 = vld [vmem:[#allocation9 + $0x150] sm:$0xff]   ;;  %p9346_p13 = scmp.lt.s32.totalorder (%p3912_p2), %s9344_s22, %s9338_s7 }
 0x2a3   : >> { %v3995_v63 = vrot.slane %v3994_v62, 4  ;;  %8524 = vmatprep.mubr.bf16.mxu0 %v7539_v19  ;;  %v4023_v20 = vrot.slane %v4021_v15, 5  ;;  %v9171_v62 = vld [vmem:[#allocation9 + $0x148] sm:$0xff]   ;;  %v5163_v19 = vshll.u32 %v10979_v61, 16  ;;  %v5173_v21 = vshll.u32 %v10984_v22, 16 }
 0x2a4   : >> { %8391 = vmatpush3.bf16.msra.mxu1 %v9162_v13  ;;  %v11698_v13 = vrot.slane %v10925_v24, 5  ;;  %v4033_v8 = vrot.slane %v4031_v52, 5  ;;  %v11014_v52 = vld [vmem:[%s10898_s12 + $0x34] sm:$0xf]  ;;  %p9347_p6 = por (%p3912_p2), %p9346_p13, %p9345_p1 }
 0x2a5   : >> { %8519 = vmatpush3.bf16.msra.mxu0 %v9163_v10  ;;  %8392 = vmatprep.subr.bf16.mxu1 %v9164_v11  ;;  %v4581_v10 = vrot.slane %v3953_v48, 5  ;;  %v4000_v2 = vsel %vm9982_vm11, %v3995_v63, %v3999_v49  ;;  %v5151_v48 = vrot.slane %v5149_v18, 5  ;;  %v4027_v49 = vrot.slane %v4025_v23, 4 }
 0x2a6   : >> { %8520 = vmatprep.subr.bf16.mxu0 %v9165_v34  ;;  %v4580_v30 = vrot.slane %v11698_v13, 4  ;;  %v5167_v63 = vshrl.u32 %v10979_v61, 16  ;;  %p9348_p10 = pnand (%p3912_p2), %p9347_p6, %p9341_p12 }
 0x2a7   : >> { %v4028_v17 = vor.u32 %v4027_v49, %v4023_v20 }
 0x2a8   : >> { %8393 = vmatpush3.bf16.msra.mxu1 %v9164_v11  ;;  %v5133_v11 = vshll.u32 %v7518_v55, 16  ;;  %v10958_v33 = vsel %vm10222_vm14, %v4580_v30, %v4581_v10  ;;  %v5147_v55 = vrot.slane %v5146_v35, 4  ;;  %v4018_v10 = vor.u32 %v4017_v36, %v4014_v29  ;;  %v10997_v30 = vld [vmem:[%s10898_s12 + $0x28] sm:$0xf] }
 0x2a9   : >> { %8521 = vmatpush3.bf16.msra.mxu0 %v9165_v34  ;;  %8394 = vmatprep.subr.bf16.mxu1 %v9166_v56  ;;  %v4005_v34 = vrot.slane %v4004_v4, 4  ;;  %v10992_v4 = vld [vmem:[%s10898_s12 + $0x24] sm:$0xf]  ;;  %v4029_v18 = vrot.slane %v4028_v17, 4  ;;  %v4045_v47 = vshll.u32 %v10997_v30, 16  ;;  %v4049_v23 = vshrl.u32 %v10997_v30, 16 }
 0x2aa   : >> { %8522 = vmatprep.subr.bf16.mxu0 %v9167_v27  ;;  %v5135_v51 = vrot.slane %v5133_v11, 5  ;;  %v5152_v28 = vsel %vm9982_vm11, %v5147_v55, %v5151_v48  ;;  %v9174_v11 = vld [vmem:[#allocation9 + $0x18] sm:$0xff]   ;;  %v4036_v38 = vshrl.u32 %v10992_v4, 16 }
 0x2ab   : >> { %v4010_v46 = vsel %vm9982_vm11, %v4005_v34, %v4009_v12  ;;  %v4019_v34 = vrot.slane %v4018_v10, 4  ;;  %v4047_v29 = vrot.slane %v4045_v47, 5  ;;  %v11020_v10 = vld [vmem:[%s10898_s12 + $0x38] sm:$0x1] }
 0x2ac   : >> { %8395 = vmatpush3.bf16.msra.mxu1 %v9166_v56  ;;  %v7426_v57 = vcombine.low %v4000_v2, %v4010_v46  ;;  %v5136_v7 = vor.u32 %v5135_v51, %v5132_v14  ;;  %v7521_v56 = vld [vmem:[%s10898_s12 + $0x24] sm:$0xf]  ;;  %v11001_v2 = vld [vmem:[%s10898_s12 + $0x2c] sm:$0x1]  ;;  %v7524_v51 = vld [vmem:[%s10898_s12 + $0x30] sm:$0xf] }
 0x2ad   : >> { %8523 = vmatpush3.bf16.msra.mxu0 %v9167_v27  ;;  %8412 = vmatprep.subr.bf16.mxu1 %v9168_v25  ;;  %v5154_v42 = vshrl.u32 %v7521_v56, 16  ;;  %v5165_v46 = vrot.slane %v5163_v19, 5  ;;  %v4024_v16 = vsel %vm9982_vm11, %v4019_v34, %v4023_v20  ;;  %v4038_v48 = vrot.slane %v4036_v38, 4  ;;  %v9176_v20 = vld [vmem:[#allocation9 + $0x20] sm:$0xff]   ;;  %v9175_v19 = vld [vmem:[#allocation9 + $0x158] sm:$0xff]  }
 0x2ae   : >> { %8540 = vmatprep.subr.bf16.mxu0 %v10943_v9  ;;  %v5137_v27 = vrot.slane %v5136_v7, 4  ;;  %v5175_v7 = vrot.slane %v5173_v21, 5  ;;  %v4055_v36 = vshll.u32 %v11001_v2, 16  ;;  %v5197_v38 = vshll.u32 %v11020_v10, 16 }
 0x2af   : >> { %8397 = vmatmul.mubr.bf16.vlgmr.msra.gmra.mrb[0].mxu1 %v7426_v57  ;;  %v5156_v14 = vrot.slane %v5154_v42, 4  ;;  %v5181_v42 = vshll.u32 %v7524_v51, 16 }
 0x2b0   : >> { %8413 = vmatpush3.bf16.msra.mxu1 %v9168_v25  ;;  %v5142_v53 = vsel %vm9982_vm11, %v5137_v27, %v5141_v43  ;;  %v5157_v25 = vshll.u32 %v7521_v56, 16  ;;  %v5169_v43 = vrot.slane %v5167_v63, 4  ;;  %v4034_v56 = vsel %vm9982_vm11, %v4029_v18, %v4033_v8  ;;  %v11029_v63 = vld [vmem:[%s10898_s12 + $0x34] sm:$0xf]  ;;  %v9178_v18 = vld [vmem:[#allocation9 + $0x28] sm:$0xff]  }
 0x2b1   : >> { %8414 = vmatprep.subr.bf16.mxu1 %v9170_v60  ;;  %v7540_v12 = vcombine.low %v5142_v53, %v5152_v28  ;;  %v7427_v27 = vcombine.low %v4024_v16, %v4034_v56  ;;  %v5178_v53 = vshrl.u32 %v7524_v51, 16  ;;  %v4051_v28 = vrot.slane %v4049_v23, 4  ;;  %v11032_v51 = vld [vmem:[%s10898_s12 + $0x38] sm:$0x1] }
 0x2b2   : >> { %v5159_v41 = vrot.slane %v5157_v25, 5  ;;  %v5170_v35 = vor.u32 %v5169_v43, %v5165_v46  ;;  %v5183_v21 = vrot.slane %v5181_v42, 5  ;;  %v5191_v43 = vshrl.u32 %v11014_v52, 16  ;;  %v9179_v42 = vld [vmem:[#allocation9 + $0x168] sm:$0xff]  }
 0x2b3   : >> { %8525 = vmatmul.mubr.bf16.vlgmr.msra.gmra.mrb[0].mxu0 %v7540_v12  ;;  %8400 = vmatprep.mubr.bf16.mxu1 %v7427_v27  ;;  %v4057_v12 = vrot.slane %v4055_v36, 5  ;;  %v5180_v17 = vrot.slane %v5178_v53, 4  ;;  %v5199_v47 = vrot.slane %v5197_v38, 5  ;;  %v11049_v53 = vld [vmem:[%s10898_s12 + $0x44] sm:$0x1] }
 0x2b4   : >> { %8415 = vmatpush3.bf16.msra.mxu1 %v9170_v60  ;;  %8541 = vmatpush3.bf16.msra.mxu0 %v10943_v9  ;;  %v5160_v57 = vor.u32 %v5159_v41, %v5156_v14  ;;  %v4039_v60 = vshll.u32 %v10992_v4, 16  ;;  %v5171_v55 = vrot.slane %v5170_v35, 4  ;;  %v4052_v41 = vor.u32 %v4051_v28, %v4047_v29  ;;  %v11059_v38 = vld [vmem:[%s10898_s12 + $0x40] sm:$0xf] }
 0x2b5   : >> { %8416 = vmatprep.subr.bf16.mxu1 %v9172_v50  ;;  %8542 = vmatprep.subr.bf16.mxu0 %v9171_v62  ;;  %v5184_v56 = vor.u32 %v5183_v21, %v5180_v17  ;;  %v4079_v28 = vshll.u32 %v11032_v51, 16 }
 0x2b6   : >> { %v5161_v15 = vrot.slane %v5160_v57, 4  ;;  %v4041_v9 = vrot.slane %v4039_v60, 5  ;;  %v5176_v25 = vsel %vm9982_vm11, %v5171_v55, %v5175_v7  ;;  %v7527_v57 = vld [vmem:[%s10898_s12 + $0x3c] sm:$0xf]  ;;  %v9177_v7 = vld [vmem:[#allocation9 + $0x160] sm:$0xff]  }
 0x2b7   : >> { %v5185_v55 = vrot.slane %v5184_v56, 4  ;;  %v5205_v21 = vshll.u32 %v7527_v57, 16 }
 0x2b8   : >> { %8417 = vmatpush3.bf16.msra.mxu1 %v9172_v50  ;;  %8543 = vmatpush3.bf16.msra.mxu0 %v9171_v62  ;;  %v5166_v49 = vsel %vm9982_vm11, %v5161_v15, %v5165_v46  ;;  %v4042_v8 = vor.u32 %v4041_v9, %v4038_v48  ;;  %v11023_v50 = vld [vmem:[%s10898_s12 + $0x30] sm:$0xf]  ;;  %v5187_v62 = vshll.u32 %v11014_v52, 16  ;;  %v5193_v48 = vrot.slane %v5191_v43, 4  ;;  %v11043_v9 = vld [vmem:[%s10898_s12 + $0x40] sm:$0xf] }
 0x2b9   : >> { %8418 = vmatprep.subr.bf16.mxu1 %v9174_v11  ;;  %8544 = vmatprep.subr.bf16.mxu0 %v9173_v26  ;;  %v7541_v34 = vcombine.low %v5166_v49, %v5176_v25  ;;  %v4060_v16 = vshrl.u32 %v11023_v50, 16  ;;  %v4063_v35 = vshll.u32 %v11023_v50, 16  ;;  %v4069_v15 = vshll.u32 %v11029_v63, 16  ;;  %v9180_v25 = vld [vmem:[#allocation9 + $0x30] sm:$0xff]  }
 0x2ba   : >> { %v4043_v14 = vrot.slane %v4042_v8, 4  ;;  %v5189_v46 = vrot.slane %v5187_v62, 5  ;;  %v5211_v43 = vshll.u32 %v11043_v9, 16  ;;  %v5207_v56 = vrot.slane %v5205_v21, 5 }
 0x2bb   : >> { %8528 = vmatprep.mubr.bf16.mxu0 %v7541_v34  ;;  %v4062_v27 = vrot.slane %v4060_v16, 4  ;;  %v4065_v36 = vrot.slane %v4063_v35, 5  ;;  %v4071_v8 = vrot.slane %v4069_v15, 5  ;;  %v5202_v34 = vshrl.u32 %v7527_v57, 16  ;;  %v9182_v57 = vld [vmem:[#allocation9 + $0x38] sm:$0xff]  }
 0x2bc   : >> { %8419 = vmatpush3.bf16.msra.mxu1 %v9174_v11  ;;  %v4048_v60 = vsel %vm9982_vm11, %v4043_v14, %v4047_v29  ;;  %v4053_v11 = vrot.slane %v4052_v41, 4  ;;  %8545 = vmatpush3.bf16.msra.mxu0 %v9173_v26  ;;  %v4073_v29 = vshrl.u32 %v11029_v63, 16  ;;  %v5194_v49 = vor.u32 %v5193_v48, %v5189_v46  ;;  %v11055_v14 = vld [vmem:[%s10898_s12 + $0x3c] sm:$0xf] }
 0x2bd   : >> { %8420 = vmatprep.subr.bf16.mxu1 %v9176_v20  ;;  %8546 = vmatprep.subr.bf16.mxu0 %v9175_v19  ;;  %v4066_v17 = vor.u32 %v4065_v36, %v4062_v27  ;;  %v4081_v41 = vrot.slane %v4079_v28, 5  ;;  %v5213_v35 = vrot.slane %v5211_v43, 5  ;;  %v5221_v48 = vshll.u32 %v11049_v53, 16 }
 0x2be   : >> { %v4058_v23 = vsel %vm9982_vm11, %v4053_v11, %v4057_v12  ;;  %v5190_v12 = vsel %vm9982_vm11, %v5185_v55, %v5189_v46  ;;  %v4075_v62 = vrot.slane %v4073_v29, 4  ;;  %v5204_v11 = vrot.slane %v5202_v34, 4  ;;  %v11068_v29 = vld [vmem:[%s10898_s12 + $0x44] sm:$0x1] }
 0x2bf   : >> { %v7428_v26 = vcombine.low %v4048_v60, %v4058_v23  ;;  %v4067_v16 = vrot.slane %v4066_v17, 4  ;;  %11738 = vst [vmem:[#allocation19_spill] sm:$0xff] %v11068_v29  ;;  %v7530_v17 = vld [vmem:[%s10898_s12 + $0x48] sm:$0xf] }
 0x2c0   : >> { %8421 = vmatpush3.bf16.msra.mxu1 %v9176_v20  ;;  %8547 = vmatpush3.bf16.msra.mxu0 %v9175_v19  ;;  %v5195_v20 = vrot.slane %v5194_v49, 4  ;;  %v4076_v60 = vor.u32 %v4075_v62, %v4071_v8  ;;  %v5215_v19 = vshrl.u32 %v11043_v9, 16  ;;  %v5208_v36 = vor.u32 %v5207_v56, %v5204_v11  ;;  %v9181_v49 = vld [vmem:[#allocation9 + $0x170] sm:$0xff]   ;;  %v11078_v62 = vld [vmem:[%s10898_s12 + $0x4c] sm:$0xf] }
 0x2c1   : >> { %8422 = vmatprep.subr.bf16.mxu1 %v9178_v18  ;;  %8401 = vmatmul.mubr.bf16.gmra.mrb[4].mxu1 %v7428_v26  ;;  %v4072_v15 = vsel %vm9982_vm11, %v4067_v16, %v4071_v8  ;;  %v4087_v26 = vshll.u32 %v11055_v14, 16  ;;  %v11081_v16 = vld [vmem:[%s10898_s12 + $0x50] sm:$0x1]  ;;  %v11087_v56 = vld [vmem:[%s10898_s12 + $0x48] sm:$0xf] }
 0x2c2   : >> { %8548 = vmatprep.subr.bf16.mxu0 %v9177_v7  ;;  %v5200_v46 = vsel %vm9982_vm11, %v5195_v20, %v5199_v47  ;;  %v4077_v23 = vrot.slane %v4076_v60, 4  ;;  %v5217_v55 = vrot.slane %v5215_v19, 4  ;;  %v4084_v47 = vshrl.u32 %v11055_v14, 16  ;;  %v11083_v60 = vld [vmem:[#allocation9 + $0x80] sm:$0xff]  }
 0x2c3   : >> { %v7542_v27 = vcombine.low %v5190_v12, %v5200_v46  ;;  %v4093_v12 = vshll.u32 %v11059_v38, 16  ;;  %v5209_v20 = vrot.slane %v5208_v36, 4  ;;  %v4089_v43 = vrot.slane %v4087_v26, 5 }
 0x2c4   : >> { %8423 = vmatpush3.bf16.msra.mxu1 %v9178_v18  ;;  %8549 = vmatpush3.bf16.msra.mxu0 %v9177_v7  ;;  %v5223_v18 = vrot.slane %v5221_v48, 5  ;;  %v4082_v8 = vsel %vm9982_vm11, %v4077_v23, %v4081_v41  ;;  %v5218_v28 = vor.u32 %v5217_v55, %v5213_v35  ;;  %v4097_v7 = vshrl.u32 %v11059_v38, 16  ;;  %v11092_v23 = vld [vmem:[%s10898_s12 + $0x4c] sm:$0xf] }
 0x2c5   : >> { %8424 = vmatprep.subr.bf16.mxu1 %v9180_v25  ;;  %8550 = vmatprep.subr.bf16.mxu0 %v9179_v42  ;;  %v7429_v34 = vcombine.low %v4072_v15, %v4082_v8  ;;  %v4086_v21 = vrot.slane %v4084_v47, 4  ;;  %v4095_v11 = vrot.slane %v4093_v12, 5  ;;  %v4103_v46 = vshll.u32 %v11068_v29, 16  ;;  %v9183_v55 = vld [vmem:[#allocation9 + $0x178] sm:$0xff]  }
 0x2c6   : >> { %8529 = vmatmul.mubr.bf16.gmra.mrb[4].mxu0 %v7542_v27  ;;  %v5219_v41 = vrot.slane %v5218_v28, 4  ;;  %v4099_v19 = vrot.slane %v4097_v7, 4  ;;  %v5226_v27 = vshrl.u32 %v7530_v17, 16  ;;  %v5229_v15 = vshll.u32 %v7530_v17, 16  ;;  %v11098_v7 = vld [vmem:[%s10898_s12 + $0x50] sm:$0x1] }
 0x2c7   : >> { %8404 = vmatprep.mubr.bf16.mxu1 %v7429_v34  ;;  %v4090_v48 = vor.u32 %v4089_v43, %v4086_v21  ;;  %v5235_v26 = vshll.u32 %v11078_v62, 16  ;;  %11739 = vst [vmem:[#allocation20_spill] sm:$0xff] %v11098_v7  ;;  %v7533_v21 = vld [vmem:[%s10898_s12 + $0x54] sm:$0xf]  ;;  %v4127_v13 = vshll.u32 %v11098_v7, 16 }
 0x2c8   : >> { %8425 = vmatpush3.bf16.msra.mxu1 %v9180_v25  ;;  %8551 = vmatpush3.bf16.msra.mxu0 %v9179_v42  ;;  %v5214_v25 = vsel %vm9982_vm11, %v5209_v20, %v5213_v35  ;;  %v5224_v36 = vsel %vm9982_vm11, %v5219_v41, %v5223_v18  ;;  %v4100_v47 = vor.u32 %v4099_v19, %v4095_v11  ;;  %v4105_v42 = vrot.slane %v4103_v46, 5  ;;  %v11109_v46 = vld [vmem:[%s10898_s12 + $0x58] sm:$0xf] }
 0x2c9   : >> { %8426 = vmatprep.subr.bf16.mxu1 %v9182_v57  ;;  %8552 = vmatprep.subr.bf16.mxu0 %v9181_v49  ;;  %v7543_v8 = vcombine.low %v5214_v25, %v5224_v36  ;;  %v4091_v28 = vrot.slane %v4090_v48, 4  ;;  %v5228_v35 = vrot.slane %v5226_v27, 4  ;;  %v5231_v12 = vrot.slane %v5229_v15, 5  ;;  %v11111_v25 = vld [vmem:[#allocation9 + $0x180] sm:$0xff]  }
 0x2ca   : >> { %v4101_v17 = vrot.slane %v4100_v47, 4  ;;  %v5237_v34 = vrot.slane %v5235_v26, 5  ;;  %v5239_v20 = vshrl.u32 %v11078_v62, 16  ;;  %v5245_v18 = vshll.u32 %v11081_v16, 16 }
 0x2cb   : >> { %8532 = vmatprep.mubr.bf16.mxu0 %v7543_v8  ;;  %v5232_v43 = vor.u32 %v5231_v12, %v5228_v35  ;;  %v4108_v41 = vshrl.u32 %v11087_v56, 16  ;;  %v4111_v19 = vshll.u32 %v11087_v56, 16  ;;  %v4117_v15 = vshll.u32 %v11092_v23, 16  ;;  %v11117_v8 = vld [vmem:[%s10898_s12 + $0x5c] sm:$0x1] }
 0x2cc   : >> { %8427 = vmatpush3.bf16.msra.mxu1 %v9182_v57  ;;  %8553 = vmatpush3.bf16.msra.mxu0 %v9181_v49  ;;  %v4096_v57 = vsel %vm9982_vm11, %v4091_v28, %v4095_v11  ;;  %v4106_v48 = vsel %vm9982_vm11, %v4101_v17, %v4105_v42  ;;  %v5241_v27 = vrot.slane %v5239_v20, 4  ;;  %v5247_v49 = vrot.slane %v5245_v18, 5 }
 0x2cd   : >> { %8444 = vmatprep.subr.bf16.mxu1 %v11083_v60  ;;  %8554 = vmatprep.subr.bf16.mxu0 %v9183_v55  ;;  %v7430_v36 = vcombine.low %v4096_v57, %v4106_v48  ;;  %v5233_v11 = vrot.slane %v5232_v43, 4  ;;  %v4110_v47 = vrot.slane %v4108_v41, 4  ;;  %v4113_v26 = vrot.slane %v4111_v19, 5  ;;  %v11124_v57 = vld [vmem:[%s10898_s12 + $0x54] sm:$0xf] }
 0x2ce   : >> { %v5242_v28 = vor.u32 %v5241_v27, %v5237_v34  ;;  %v4119_v35 = vrot.slane %v4117_v15, 5  ;;  %v4121_v12 = vshrl.u32 %v11092_v23, 16  ;;  %v5250_v20 = vshrl.u32 %v7533_v21, 16  ;;  %11740 = vst [vmem:[#allocation21_spill] sm:$0xff] %v11124_v57  ;;  %v11129_v27 = vld [vmem:[%s10898_s12 + $0x58] sm:$0xf] }
 0x2cf   : >> { %8405 = vmatmul.mubr.bf16.gmra.mrb[8].mxu1 %v7430_v36  ;;  %v5238_v42 = vsel %vm9982_vm11, %v5233_v11, %v5237_v34  ;;  %v4114_v17 = vor.u32 %v4113_v26, %v4110_v47  ;;  %v5253_v18 = vshll.u32 %v7533_v21, 16  ;;  %v4129_v19 = vrot.slane %v4127_v13, 5 }
 0x2d0   : >> { %8555 = vmatpush3.bf16.msra.mxu0 %v9183_v55  ;;  %v5243_v43 = vrot.slane %v5242_v28, 4  ;;  %v4123_v41 = vrot.slane %v4121_v12, 4  ;;  %v5259_v48 = vshll.u32 %v11109_v46, 16  ;;  %v5252_v15 = vrot.slane %v5250_v20, 4  ;;  %v11136_v28 = vld [vmem:[%s10898_s12 + $0x5c] sm:$0x1] }
 0x2d1   : >> { %8572 = vmatprep.subr.bf16.mxu0 %v11111_v25  ;;  %v4115_v55 = vrot.slane %v4114_v17, 4  ;;  %v5255_v36 = vrot.slane %v5253_v18, 5  ;;  %v5263_v34 = vshrl.u32 %v11109_v46, 16  ;;  %v5269_v26 = vshll.u32 %v11117_v8, 16  ;;  %11741 = vst [vmem:[#allocation22_spill] sm:$0xff] %v11136_v28 }
 0x2d2   : >> { %v5248_v21 = vsel %vm9982_vm11, %v5243_v43, %v5247_v49  ;;  %v4124_v11 = vor.u32 %v4123_v41, %v4119_v35  ;;  %v5261_v47 = vrot.slane %v5259_v48, 5  ;;  %v7536_v20 = vld [vmem:[%s10898_s12 + $0x60] sm:$0xf]  ;;  %v4132_v5 = vshrl.u32 %v11124_v57, 16  ;;  %v11144_v43 = vld [vmem:[%s10898_s12 + $0x64] sm:$0xf] }
 0x2d3   : >> { %v7544_v13 = vcombine.low %v5238_v42, %v5248_v21  ;;  %v4120_v12 = vsel %vm9982_vm11, %v4115_v55, %v4119_v35  ;;  %v5256_v54 = vor.u32 %v5255_v36, %v5252_v15  ;;  %v5265_v17 = vrot.slane %v5263_v34, 4  ;;  %v11152_v21 = vld [vmem:[%s10898_s12 + $0x68] sm:$0x1] }
 0x2d4   : >> { %v4125_v18 = vrot.slane %v4124_v11, 4  ;;  %v5271_v0 = vrot.slane %v5269_v26, 5  ;;  %v4135_v49 = vshll.u32 %v11124_v57, 16  ;;  %v4141_v42 = vshll.u32 %v11129_v27, 16 }
 0x2d5   : >> { %8533 = vmatmul.mubr.bf16.gmra.mrb[8].mxu0 %v7544_v13  ;;  %v5257_v41 = vrot.slane %v5256_v54, 4  ;;  %v5266_v48 = vor.u32 %v5265_v17, %v5261_v47  ;;  %v4145_v35 = vshrl.u32 %v11129_v27, 16  ;;  %v4134_v15 = vrot.slane %v4132_v5, 4  ;;  %v7555_v17 = vld [vmem:[%s10898_s12 + $0xc] sm:$0xe] }
 0x2d6   : >> { %v4130_v55 = vsel %vm9982_vm11, %v4125_v18, %v4129_v19  ;;  %v4137_v36 = vrot.slane %v4135_v49, 5  ;;  %v4151_v34 = vshll.u32 %v11136_v28, 16  ;;  %v4143_v54 = vrot.slane %v4141_v42, 5 }
 0x2d7   : >> { %v7431_v11 = vcombine.low %v4120_v12, %v4130_v55  ;;  %v5262_v26 = vsel %vm9982_vm11, %v5257_v41, %v5261_v47  ;;  %v5267_v13 = vrot.slane %v5266_v48, 4  ;;  %v4147_v7 = vrot.slane %v4145_v35, 4 }
 0x2d8   : >> { %v4138_v44 = vor.u32 %v4137_v36, %v4134_v15  ;;  %v4153_v29 = vrot.slane %v4151_v34, 5  ;;  %v5274_v57 = vshrl.u32 %v7536_v20, 16  ;;  %v5277_v19 = vshll.u32 %v7536_v20, 16  ;;  %v7556_v36 = vld [vmem:[%s10898_s12 + $0x18] sm:$0xe] }
 0x2d9   : >> { %8408 = vmatprep.mubr.bf16.mxu1 %v7431_v11  ;;  %v5272_v5 = vsel %vm9982_vm11, %v5267_v13, %v5271_v0  ;;  %v5283_v18 = vshll.u32 %v11144_v43, 16  ;;  %v5287_v12 = vshrl.u32 %v11144_v43, 16  ;;  %v4148_v41 = vor.u32 %v4147_v7, %v4143_v54  ;;  %v7557_v34 = vld [vmem:[%s10898_s12 + $0x24] sm:$0xe] }
 0x2da   : >> { %v7545_v49 = vcombine.low %v5262_v26, %v5272_v5  ;;  %v4139_v47 = vrot.slane %v4138_v44, 4  ;;  %v5276_v48 = vrot.slane %v5274_v57, 4  ;;  %v5279_v42 = vrot.slane %v5277_v19, 5 }
 0x2db   : >> { %v5285_v55 = vrot.slane %v5283_v18, 5  ;;  %v5289_v35 = vrot.slane %v5287_v12, 4  ;;  %v5293_v15 = vshll.u32 %v11152_v21, 16  ;;  %v4149_v20 = vrot.slane %v4148_v41, 4 }
 0x2dc   : >> { %8536 = vmatprep.mubr.bf16.mxu0 %v7545_v49  ;;  %v4144_v0 = vsel %vm9982_vm11, %v4139_v47, %v4143_v54  ;;  %v7563_v11 = vrot.slane %v7555_v17, 9  ;;  %v5541_v13 = vrot.slane %v10913_v32, 5  ;;  %v5280_v28 = vor.u32 %v5279_v42, %v5276_v48 }
 0x2dd   : >> { %v5290_v26 = vor.u32 %v5289_v35, %v5285_v55  ;;  %v5295_v44 = vrot.slane %v5293_v15, 5  ;;  %v7442_v7 = vcombine.low %v10920_v31, %v10925_v24  ;;  %v11742_v57 = vrot.slane %v10938_v40, 5  ;;  %v9188_v40 = vld [vmem:[#allocation9 + $0x88] sm:$0xff]  }
 0x2de   : >> { %v4154_v19 = vsel %vm9982_vm11, %v4149_v20, %v4153_v29  ;;  %v5542_v18 = vsel %vm10222_vm14, %v7563_v11, %v5541_v13  ;;  %v5543_v54 = vrot.slane %v5541_v13, 4  ;;  %v5281_v17 = vrot.slane %v5280_v28, 4  ;;  %v7558_v20 = vld [vmem:[%s10898_s12 + $0x30] sm:$0xe] }
 0x2df   : >> { %v5550_v5 = vrot.slane %v11742_v57, 4  ;;  %v7432_v12 = vcombine.low %v4144_v0, %v4154_v19  ;;  %v5291_v49 = vrot.slane %v5290_v26, 4  ;;  %v11743_v32 = vrot.slane %v10916_v1, 5 }
 0x2e0   : >> { %v7564_v31 = vrot.slane %v7556_v36, 9  ;;  %v7565_v41 = vrot.slane %v7557_v34, 9  ;;  %v5555_v48 = vrot.slane %v10979_v61, 5  ;;  %v5286_v29 = vsel %vm9982_vm11, %v5281_v17, %v5285_v55  ;;  %v4543_v17 = vld [vmem:[%s10898_s12 + $0xc] sm:$0xe] }
 0x2e1   : >> { %v5545_v47 = vsel %vm10222_vm14, %v5543_v54, %v11743_v32  ;;  %8409 = vmatmul.mubr.bf16.gmra.mrb[12].mxu1 %v7432_v12  ;;  %v5296_v42 = vsel %vm9982_vm11, %v5291_v49, %v5295_v44  ;;  %v11744_v1 = vcombine.low %v10901_v59, %v10904_v45  ;;  %v5558_v36 = vrot.slane %v10984_v22, 5  ;;  %v7559_v22 = vld [vmem:[%s10898_s12 + $0x3c] sm:$0xe]  ;;  %v7560_v54 = vld [vmem:[%s10898_s12 + $0x48] sm:$0xe]  ;;  %v9193_v32 = vld [vmem:[#allocation9 + $0x190] sm:$0xff]  }
 0x2e2   : >> { %v7571_v28 = vcombine.low %v5542_v18, %v5545_v47  ;;  %v7546_v35 = vcombine.low %v5286_v29, %v5296_v42  ;;  %v5557_v15 = vrot.slane %v5555_v48, 4  ;;  %v11745_v61 = vrot.slane %v10941_v3, 5  ;;  %v7561_v12 = vld [vmem:[%s10898_s12 + $0x54] sm:$0xe] }
 0x2e3   : >> { %8428 = vmatprep.mubr.bf16.mxu1 %v11744_v1  ;;  %v11746_v55 = vmov %v11742_v57  ;;  %v5562_v11 = vrot.slane %v11014_v52, 5  ;;  %v7443_v59 = vcombine.low %v10962_v37, %v10968_v6  ;;  %v5556_v45 = vsel %vm10222_vm14, %v7565_v41, %v5555_v48  ;;  %v9189_v52 = vld [vmem:[#allocation9 + $0x188] sm:$0xff]  }
 0x2e4   : >> { %8537 = vmatmul.mubr.bf16.gmra.mrb[12].mxu0 %v7546_v35  ;;  %v5552_v34 = vsel %vm10222_vm14, %v5550_v5, %v11745_v61  ;;  %v5549_v0 = vsel %vm10222_vm14, %v7564_v31, %v11746_v55  ;;  %v5559_v3 = vsel %vm10222_vm14, %v5557_v15, %v5558_v36  ;;  %v5569_v13 = vrot.slane %v11043_v9, 5  ;;  %v9192_v5 = vld [vmem:[#allocation9 + $0x90] sm:$0xff]   ;;  %v11222_v31 = vld [vmem:[%s10898_s12 + $0x8] sm:$0x1]  ;;  %v9198_v55 = vld [vmem:[#allocation9 + $0xa0] sm:$0xff]  }
 0x2e5   : >> { %8556 = vmatprep.mubr.bf16.mxu0 %v7571_v28  ;;  %v7572_v26 = vcombine.low %v5549_v0, %v5552_v34  ;;  %v7566_v44 = vrot.slane %v7558_v20, 9  ;;  %v7573_v57 = vcombine.low %v5556_v45, %v5559_v3  ;;  %v5564_v37 = vrot.slane %v5562_v11, 4  ;;  %v11239_v35 = vld [vmem:[%s10898_s12 + $0x60] sm:$0xe]  ;;  %v9195_v15 = vld [vmem:[#allocation9 + $0x198] sm:$0xff]  }
 0x2e6   : >> { %v5565_v6 = vrot.slane %v11020_v10, 5  ;;  %v7567_v19 = vrot.slane %v7559_v22, 9  ;;  %v5571_v18 = vrot.slane %v5569_v13, 4  ;;  %v5572_v9 = vrot.slane %v11049_v53, 5  ;;  %v4542_v20 = vld [vmem:[%s10898_s12] sm:$0xe] }
 0x2e7   : >> { %v7458_v49 = vrot.slane %v4543_v17, 9  ;;  %v7444_v10 = vcombine.low %v10992_v4, %v10997_v30  ;;  %v5583_v47 = vrot.slane %v11109_v46, 5  ;;  %v11747_v48 = vrot.slane %v10925_v24, 5  ;;  %v9201_v17 = vld [vmem:[#allocation9 + $0x1a8] sm:$0xff]  }
 0x2e8   : >> { %v5566_v53 = vsel %vm10222_vm14, %v5564_v37, %v5565_v6  ;;  %v5570_v4 = vsel %vm10222_vm14, %v7567_v19, %v5569_v13  ;;  %v5573_v41 = vsel %vm10222_vm14, %v5571_v18, %v5572_v9  ;;  %v7445_v46 = vcombine.low %v11023_v50, %v11029_v63 }
 0x2e9   : >> { %8429 = vmatmul.mubr.bf16.vlgmr.msra.gmra.mrb[0].mxu1 %v7442_v7  ;;  %v5576_v7 = vrot.slane %v11078_v62, 5  ;;  %v4574_v62 = vrot.slane %v11222_v31, 5  ;;  %v11233_v29 = vsel %vm10222_vm14, %v7458_v49, %v11747_v48  ;;  %v7568_v42 = vrot.slane %v7560_v54, 9 }
 0x2ea   : >> { %8445 = vmatpush3.bf16.msra.mxu1 %v11083_v60  ;;  %8432 = vmatprep.mubr.bf16.mxu1 %v7443_v59  ;;  %v5563_v60 = vsel %vm10222_vm14, %v7566_v44, %v5562_v11  ;;  %v5579_v28 = vrot.slane %v11081_v16, 5  ;;  %v7466_v1 = vcombine.low %v11233_v29, %v10958_v33  ;;  %v7569_v61 = vrot.slane %v7561_v12, 9  ;;  %v9249_v16 = vld [vmem:[%s10898_s12 + $0x4] sm:$0xf] }
 0x2eb   : >> { %8446 = vmatprep.subr.bf16.mxu1 %v9188_v40  ;;  %v7574_v24 = vcombine.low %v5563_v60, %v5566_v53  ;;  %v5578_v36 = vrot.slane %v5576_v7, 4  ;;  %v7575_v34 = vcombine.low %v5570_v4, %v5573_v41  ;;  %v5585_v0 = vrot.slane %v5583_v47, 4  ;;  %v4545_v59 = vld [vmem:[%s10898_s12 + $0x24] sm:$0xe]  ;;  %v4546_v60 = vld [vmem:[%s10898_s12 + $0x30] sm:$0xe] }
 0x2ec   : >> { %8557 = vmatmul.mubr.bf16.vlgmr.msra.gmra.mrb[0].mxu0 %v7572_v26  ;;  %v5586_v50 = vrot.slane %v11117_v8, 5  ;;  %v4571_v11 = vrot.slane %v9249_v16, 5  ;;  %v4592_v45 = vrot.slane %v10997_v30, 5  ;;  %v7446_v3 = vcombine.low %v11055_v14, %v11059_v38  ;;  %v9200_v14 = vld [vmem:[#allocation9 + $0xa8] sm:$0xff]   ;;  %v9204_v53 = vld [vmem:[#allocation9 + $0xb0] sm:$0xff]   ;;  %v11750_v16 = vld [vmem:[#allocation20_spill] sm:$0xff] }
 0x2ed   : >> { %8573 = vmatpush3.bf16.msra.mxu0 %v11111_v25  ;;  %8560 = vmatprep.mubr.bf16.mxu0 %v7573_v57  ;;  %v9194_v25 = vld [vmem:[#allocation9 + $0x98] sm:$0xff]   ;;  %v7460_v22 = vrot.slane %v4545_v59, 9  ;;  %v4595_v13 = vrot.slane %v11001_v2, 5  ;;  %v5577_v8 = vsel %vm10222_vm14, %v7568_v42, %v5576_v7  ;;  %v5584_v26 = vsel %vm10222_vm14, %v7569_v61, %v5583_v47  ;;  %v11748_v7 = vld [vmem:[#allocation21_spill] sm:$0xff]  ;;  %v9251_v59 = vld [vmem:[%s10898_s12 + $0x20] sm:$0x1] }
 0x2ee   : >> { %8574 = vmatprep.subr.bf16.mxu0 %v9189_v52  ;;  %8447 = vmatpush3.bf16.msra.mxu1 %v9188_v40  ;;  %v9199_v40 = vld [vmem:[#allocation9 + $0x1a0] sm:$0xff]   ;;  %v7570_v44 = vrot.slane %v11239_v35, 9  ;;  %v5580_v30 = vsel %vm10222_vm14, %v5578_v36, %v5579_v28  ;;  %v5590_v57 = vrot.slane %v11144_v43, 5  ;;  %v5587_v37 = vsel %vm10222_vm14, %v5585_v0, %v5586_v50  ;;  %v4547_v4 = vld [vmem:[%s10898_s12 + $0x3c] sm:$0xe]  ;;  %v11749_v42 = vld [vmem:[#allocation19_spill] sm:$0xff] }
 0x2ef   : >> { %8448 = vmatprep.subr.bf16.mxu1 %v9192_v5  ;;  %v11261_v2 = vsel %vm10222_vm14, %v7460_v22, %v4592_v45  ;;  %v7457_v6 = vrot.slane %v4542_v20, 9  ;;  %v4602_v18 = vrot.slane %v11032_v51, 5  ;;  %v7447_v43 = vcombine.low %v11087_v56, %v11092_v23  ;;  %v9250_v41 = vld [vmem:[%s10898_s12 + $0x1c] sm:$0xf]  ;;  %v9205_v36 = vld [vmem:[#allocation9 + $0x1b0] sm:$0xff]   ;;  %v9206_v50 = vld [vmem:[#allocation9 + $0xb8] sm:$0xff]  }
 0x2f0   : >> { %v4573_v9 = vrot.slane %v4571_v11, 4  ;;  %v7576_v12 = vcombine.low %v5577_v8, %v5580_v30  ;;  %v7448_v49 = vcombine.low %v11748_v7, %v11129_v27  ;;  %v4606_v51 = vrot.slane %v11059_v38, 5 }
 0x2f1   : >> { %8575 = vmatpush3.bf16.msra.mxu0 %v9189_v52  ;;  %8433 = vmatmul.mubr.bf16.gmra.mrb[4].mxu1 %v7444_v10  ;;  %v4594_v52 = vrot.slane %v4592_v45, 4  ;;  %v5593_v10 = vrot.slane %v11152_v21, 5  ;;  %v7577_v56 = vcombine.low %v5584_v26, %v5587_v37  ;;  %v7461_v47 = vrot.slane %v4546_v60, 9  ;;  %v9207_v26 = vld [vmem:[#allocation9 + $0x1b8] sm:$0xff]   ;;  %v9212_v60 = vld [vmem:[#allocation9 + $0xc8] sm:$0xff]  }
 0x2f2   : >> { %8576 = vmatprep.subr.bf16.mxu0 %v9193_v32  ;;  %8449 = vmatpush3.bf16.msra.mxu1 %v9192_v5  ;;  %v4599_v5 = vrot.slane %v11029_v63, 5  ;;  %v4585_v48 = vrot.slane %v9250_v41, 5  ;;  %v7462_v21 = vrot.slane %v4547_v4, 9  ;;  %v4609_v38 = vrot.slane %v11749_v42, 5  ;;  %v11358_v42 = vld [vmem:[%s10898_s12 + $0x20] sm:$0x1] }
 0x2f3   : >> { %8450 = vmatprep.subr.bf16.mxu1 %v9194_v25  ;;  %8436 = vmatprep.mubr.bf16.mxu1 %v7445_v46  ;;  %v11268_v19 = vsel %vm10222_vm14, %v4594_v52, %v4595_v13  ;;  %v4608_v46 = vrot.slane %v4606_v51, 4  ;;  %v4572_v28 = vsel %vm10222_vm14, %v7457_v6, %v4571_v11  ;;  %v4575_v35 = vsel %vm10222_vm14, %v4573_v9, %v4574_v62  ;;  %v4548_v13 = vld [vmem:[%s10898_s12 + $0x48] sm:$0xe]  ;;  %v11751_v6 = vld [vmem:[#allocation22_spill] sm:$0xff] }
 0x2f4   : >> { %8561 = vmatmul.mubr.bf16.gmra.mrb[4].mxu0 %v7574_v24  ;;  %v7468_v63 = vcombine.low %v11261_v2, %v11268_v19  ;;  %v4601_v54 = vrot.slane %v4599_v5, 4  ;;  %v4544_v24 = vld [vmem:[%s10898_s12 + $0x18] sm:$0xe]  ;;  %v4613_v62 = vrot.slane %v11092_v23, 5  ;;  %v4616_v11 = vrot.slane %v11750_v16, 5  ;;  %v9223_v19 = vld [vmem:[#allocation9 + $0x1e0] sm:$0xff]  }
 0x2f5   : >> { %8577 = vmatpush3.bf16.msra.mxu0 %v9193_v32  ;;  %8564 = vmatprep.mubr.bf16.mxu0 %v7575_v34  ;;  %v5592_v32 = vrot.slane %v5590_v57, 4  ;;  %v11302_v34 = vsel %vm10222_vm14, %v7462_v21, %v4606_v51  ;;  %v11306_v31 = vsel %vm10222_vm14, %v4608_v46, %v4609_v38  ;;  %v4588_v23 = vrot.slane %v9251_v59, 5  ;;  %v9213_v46 = vld [vmem:[#allocation9 + $0x1c8] sm:$0xff]   ;;  %v7624_v38 = vld [vmem:[%s10898_s12 + $0x24] sm:$0xf]  ;;  %v9218_v59 = vld [vmem:[#allocation9 + $0xd8] sm:$0xff]  }
 0x2f6   : >> { %8578 = vmatprep.subr.bf16.mxu0 %v9195_v15  ;;  %8451 = vmatpush3.bf16.msra.mxu1 %v9194_v25  ;;  %v11282_v25 = vsel %vm10222_vm14, %v4601_v54, %v4602_v18  ;;  %v7470_v20 = vcombine.low %v11302_v34, %v11306_v31  ;;  %v4615_v45 = vrot.slane %v4613_v62, 4  ;;  %v4587_v22 = vrot.slane %v4585_v48, 4  ;;  %v11369_v16 = vld [vmem:[%s10898_s12 + $0x2c] sm:$0x1] }
 0x2f7   : >> { %8452 = vmatprep.subr.bf16.mxu1 %v9198_v55  ;;  %v5594_v0 = vsel %vm10222_vm14, %v5592_v32, %v5593_v10  ;;  %v4620_v8 = vrot.slane %v11129_v27, 5  ;;  %v7463_v52 = vrot.slane %v4548_v13, 9  ;;  %v4623_v18 = vrot.slane %v11751_v6, 5  ;;  %v9211_v10 = vld [vmem:[#allocation9 + $0x1c0] sm:$0xff]   ;;  %v9210_v32 = vld [vmem:[%s10898_s12 + $0x24] sm:$0xff]  }
 0x2f8   : >> { %v11321_v30 = vsel %vm10222_vm14, %v4615_v45, %v4616_v11  ;;  %v4589_v7 = vsel %vm10222_vm14, %v4587_v22, %v4588_v23  ;;  %v6100_v33 = vshrl.u32 %v7624_v38, 16  ;;  %v6103_v29 = vshll.u32 %v7624_v38, 16  ;;  %v9216_v11 = vld [vmem:[%s10898_s12 + $0x3c] sm:$0xff]  }
 0x2f9   : >> { %8579 = vmatpush3.bf16.msra.mxu0 %v9195_v15  ;;  %8437 = vmatmul.mubr.bf16.gmra.mrb[8].mxu1 %v7446_v3  ;;  %v11296_v15 = vsel %vm10222_vm14, %v7461_v47, %v4599_v5  ;;  %v7465_v3 = vcombine.low %v4572_v28, %v4575_v35  ;;  %v4622_v37 = vrot.slane %v4620_v8, 4  ;;  %v11328_v27 = vsel %vm10222_vm14, %v7463_v52, %v4613_v62  ;;  %v9214_v47 = vld [vmem:[%s10898_s12 + $0x30] sm:$0xff]   ;;  %v9215_v28 = vld [vmem:[#allocation9 + $0xd0] sm:$0xff]  }
 0x2fa   : >> { %8580 = vmatprep.subr.bf16.mxu0 %v9199_v40  ;;  %8453 = vmatpush3.bf16.msra.mxu1 %v9198_v55  ;;  %v7469_v61 = vcombine.low %v11296_v15, %v11282_v25  ;;  %v5591_v55 = vsel %vm10222_vm14, %v7570_v44, %v5590_v57  ;;  %v7459_v44 = vrot.slane %v4544_v24, 9  ;;  %v4549_v57 = vld [vmem:[%s10898_s12 + $0x54] sm:$0xe]  ;;  %v7471_v9 = vcombine.low %v11328_v27, %v11321_v30  ;;  %v7627_v52 = vld [vmem:[%s10898_s12 + $0x30] sm:$0xf]  ;;  %v9224_v25 = vld [vmem:[#allocation9 + $0xe8] sm:$0xff]  }
 0x2fb   : >> { %8454 = vmatprep.subr.bf16.mxu1 %v9200_v14  ;;  %8440 = vmatprep.mubr.bf16.mxu1 %v7447_v43  ;;  %v7464_v5 = vrot.slane %v4549_v57, 9  ;;  %v9209_v43 = vld [vmem:[#allocation9 + $0xc0] sm:$0xff]   ;;  %v6095_v45 = vshll.u32 %v11358_v42, 16  ;;  %v6105_v22 = vrot.slane %v6103_v29, 5  ;;  %v9219_v57 = vld [vmem:[#allocation9 + $0x1d8] sm:$0xff]  }
 0x2fc   : >> { %8565 = vmatmul.mubr.bf16.gmra.mrb[8].mxu0 %v7576_v12  ;;  %v11338_v12 = vsel %vm10222_vm14, %v4622_v37, %v4623_v18  ;;  %v6124_v18 = vshrl.u32 %v7627_v52, 16 }
 0x2fd   : >> { %8581 = vmatpush3.bf16.msra.mxu0 %v9199_v40  ;;  %8568 = vmatprep.mubr.bf16.mxu0 %v7577_v56  ;;  %v7578_v40 = vcombine.low %v5591_v55, %v5594_v0  ;;  %v11334_v54 = vsel %vm10222_vm14, %v7464_v5, %v4620_v8  ;;  %v7621_v56 = vld [vmem:[%s10898_s12 + $0x18] sm:$0xf]  ;;  %v9221_v5 = vld [vmem:[#allocation9 + $0xe0] sm:$0xff]   ;;  %v11390_v2 = vrot.slane %v6095_v45, 5 }
 0x2fe   : >> { %8582 = vmatprep.subr.bf16.mxu0 %v9201_v17  ;;  %8455 = vmatpush3.bf16.msra.mxu1 %v9200_v14  ;;  %v9208_v14 = vld [vmem:[%s10898_s12 + $0x18] sm:$0xff]   ;;  %v6076_v4 = vshrl.u32 %v7621_v56, 16  ;;  %v6079_v41 = vshll.u32 %v7621_v56, 16 }
 0x2ff   : >> { %8456 = vmatprep.subr.bf16.mxu1 %v9204_v53  ;;  %v11403_v56 = vld [vmem:[%s10898_s12 + $0x38] sm:$0x1] }
 0x300   : >> { %v6078_v35 = vrot.slane %v6076_v4, 4  ;;  %v6081_v24 = vrot.slane %v6079_v41, 5  ;;  %v6143_v27 = vshll.u32 %v11403_v56, 16 }
 0x301   : >> { %8583 = vmatpush3.bf16.msra.mxu0 %v9201_v17  ;;  %8441 = vmatmul.mubr.bf16.gmra.mrb[12].mxu1 %v7448_v49  ;;  %v4586_v17 = vsel %vm10222_vm14, %v7459_v44, %v4585_v48  ;;  %v7472_v49 = vcombine.low %v11334_v54, %v11338_v12  ;;  %v6119_v44 = vshll.u32 %v11369_v16, 16 }
 0x302   : >> { %8584 = vmatprep.subr.bf16.mxu0 %v9205_v36  ;;  %8457 = vmatpush3.bf16.msra.mxu1 %v9204_v53  ;;  %v7467_v51 = vcombine.low %v4586_v17, %v4589_v7  ;;  %v11348_v53 = vld [vmem:[%s10898_s12 + $0x1c] sm:$0xf]  ;;  %v6082_v23 = vor.u32 %v6081_v24, %v6078_v35  ;;  %v7633_v35 = vld [vmem:[%s10898_s12 + $0x48] sm:$0xf] }
 0x303   : >> { %8458 = vmatprep.subr.bf16.mxu1 %v9206_v50  ;;  %8460 = vmatprep.mubr.bf16.mxu1 %v7465_v3  ;;  %v6085_v48 = vshll.u32 %v11348_v53, 16  ;;  %v6089_v21 = vshrl.u32 %v11348_v53, 16  ;;  %v6102_v3 = vrot.slane %v6100_v33, 4  ;;  %v6172_v34 = vshrl.u32 %v7633_v35, 16 }
 0x304   : >> { %8569 = vmatmul.mubr.bf16.gmra.mrb[12].mxu0 %v7578_v40  ;;  %v9220_v40 = vld [vmem:[%s10898_s12 + $0x48] sm:$0xff]   ;;  %v11388_v37 = vrot.slane %v6082_v23, 4  ;;  %v6175_v31 = vshll.u32 %v7633_v35, 16  ;;  %v9235_v35 = vld [vmem:[#allocation9 + $0x208] sm:$0xff]  }
 0x305   : >> { %8585 = vmatpush3.bf16.msra.mxu0 %v9205_v36  ;;  %8588 = vmatprep.mubr.bf16.mxu0 %v9208_v14  ;;  %v11362_v36 = vld [vmem:[%s10898_s12 + $0x28] sm:$0xf]  ;;  %v11365_v62 = vrot.slane %v6085_v48, 5  ;;  %v6091_v55 = vrot.slane %v6089_v21, 4  ;;  %v11383_v14 = vld [vmem:[%s10898_s12 + $0x34] sm:$0xf] }
 0x306   : >> { %8586 = vmatprep.subr.bf16.mxu0 %v9207_v26  ;;  %8459 = vmatpush3.bf16.msra.mxu1 %v9206_v50  ;;  %v6113_v0 = vshrl.u32 %v11362_v36, 16  ;;  %v9217_v50 = vld [vmem:[#allocation9 + $0x1d0] sm:$0xff]   ;;  %v6133_v17 = vshll.u32 %v11383_v14, 16  ;;  %v6137_v7 = vshrl.u32 %v11383_v14, 16  ;;  %v6126_v48 = vrot.slane %v6124_v18, 4 }
 0x307   : >> { %8476 = vmatprep.subr.bf16.mxu1 %v9209_v43 }
 0x308   : >> { %v6115_v8 = vrot.slane %v6113_v0, 4  ;;  %v11412_v24 = vrot.slane %v6133_v17, 5  ;;  %v6139_v33 = vrot.slane %v6137_v7, 4  ;;  %v11462_v17 = vld [vmem:[#allocation9 + $0x200] sm:$0xff]  }
 0x309   : >> { %8587 = vmatpush3.bf16.msra.mxu0 %v9207_v26  ;;  %8461 = vmatmul.mubr.bf16.vlgmr.msra.gmra.mrb[0].mxu1 %v7466_v1  ;;  %v6109_v1 = vshll.u32 %v11362_v36, 16  ;;  %v6092_v26 = vor.u32 %v6091_v55, %v11365_v62  ;;  %v11417_v55 = vld [vmem:[%s10898_s12 + $0x4c] sm:$0xf] }
 0x30a   : >> { %8604 = vmatprep.subr.bf16.mxu0 %v9211_v10  ;;  %8477 = vmatpush3.bf16.msra.mxu1 %v9209_v43  ;;  %v6127_v43 = vshll.u32 %v7627_v52, 16  ;;  %v6185_v0 = vshrl.u32 %v11417_v55, 16  ;;  %v6174_v52 = vrot.slane %v6172_v34, 4 }
 0x30b   : >> { %8478 = vmatprep.subr.bf16.mxu1 %v9212_v60  ;;  %8464 = vmatprep.mubr.bf16.mxu1 %v7467_v51  ;;  %v11373_v13 = vrot.slane %v6109_v1, 5  ;;  %v11393_v15 = vrot.slane %v6092_v26, 4  ;;  %v9226_v51 = vld [vmem:[%s10898_s12 + $0x60] sm:$0xff]  }
 0x30c   : >> { %8589 = vmatmul.mubr.bf16.vlgmr.msra.gmra.mrb[0].mxu0 %v9210_v32  ;;  %v11406_v32 = vld [vmem:[%s10898_s12 + $0x40] sm:$0xf]  ;;  %v6129_v21 = vrot.slane %v6127_v43, 5 }
 0x30d   : >> { %8605 = vmatpush3.bf16.msra.mxu0 %v9211_v10  ;;  %8592 = vmatprep.mubr.bf16.mxu0 %v9214_v47  ;;  %v6116_v6 = vor.u32 %v6115_v8, %v11373_v13  ;;  %v9222_v10 = vld [vmem:[%s10898_s12 + $0x54] sm:$0xff]   ;;  %v6157_v29 = vshll.u32 %v11406_v32, 16  ;;  %v6161_v1 = vshrl.u32 %v11406_v32, 16  ;;  %v6098_v30 = vsel %vm9982_vm11, %v11393_v15, %v11390_v2  ;;  %v9228_v2 = vld [vmem:[%s10898_s12 + $0x6c] sm:$0xff]  }
 0x30e   : >> { %8606 = vmatprep.subr.bf16.mxu0 %v9213_v46  ;;  %8479 = vmatpush3.bf16.msra.mxu1 %v9212_v60  ;;  %v7630_v60 = vld [vmem:[%s10898_s12 + $0x3c] sm:$0xf]  ;;  %v6130_v45 = vor.u32 %v6129_v21, %v6126_v48  ;;  %v11460_v15 = vld [vmem:[%s10898_s12 + $0x58] sm:$0xf] }
 0x30f   : >> { %8480 = vmatprep.subr.bf16.mxu1 %v9215_v28  ;;  %v9225_v47 = vld [vmem:[#allocation9 + $0x1e8] sm:$0xff]   ;;  %v6117_v41 = vrot.slane %v6116_v6, 4  ;;  %v6148_v38 = vshrl.u32 %v7630_v60, 16  ;;  %v11444_v26 = vrot.slane %v6157_v29, 5  ;;  %v6205_v48 = vshll.u32 %v11460_v15, 16 }
 0x310   : >> { %v6131_v43 = vrot.slane %v6130_v45, 4  ;;  %v6209_v21 = vshrl.u32 %v11460_v15, 16 }
 0x311   : >> { %8607 = vmatpush3.bf16.msra.mxu0 %v9213_v46  ;;  %8465 = vmatmul.mubr.bf16.gmra.mrb[4].mxu1 %v7468_v63  ;;  %v6106_v63 = vor.u32 %v6105_v22, %v6102_v3  ;;  %v9227_v46 = vld [vmem:[#allocation9 + $0xf0] sm:$0xff]   ;;  %v11486_v45 = vrot.slane %v6205_v48, 5 }
 0x312   : >> { %8608 = vmatprep.subr.bf16.mxu0 %v9217_v50  ;;  %8481 = vmatpush3.bf16.msra.mxu1 %v9215_v28  ;;  %v6151_v28 = vshll.u32 %v7630_v60, 16  ;;  %v11438_v3 = vld [vmem:[%s10898_s12 + $0x44] sm:$0x1] }
 0x313   : >> { %8482 = vmatprep.subr.bf16.mxu1 %v9218_v59  ;;  %8468 = vmatprep.mubr.bf16.mxu1 %v7469_v61  ;;  %v11395_v61 = vrot.slane %v6119_v44, 5  ;;  %v6107_v4 = vrot.slane %v6106_v63, 4  ;;  %v6163_v44 = vrot.slane %v6161_v1, 4  ;;  %v7636_v63 = vld [vmem:[%s10898_s12 + $0x54] sm:$0xf] }
 0x314   : >> { %8593 = vmatmul.mubr.bf16.gmra.mrb[4].mxu0 %v9216_v11  ;;  %v6088_v11 = vsel %vm9982_vm11, %v11388_v37, %v11365_v62  ;;  %v6150_v62 = vrot.slane %v6148_v38, 4  ;;  %v6153_v22 = vrot.slane %v6151_v28, 5  ;;  %v6187_v37 = vrot.slane %v6185_v0, 4 }
 0x315   : >> { %8609 = vmatpush3.bf16.msra.mxu0 %v9217_v50  ;;  %8596 = vmatprep.mubr.bf16.mxu0 %v9220_v40  ;;  %v9229_v50 = vld [vmem:[#allocation9 + $0x1f0] sm:$0xff]   ;;  %v6112_v23 = vsel %vm9982_vm11, %v6107_v4, %v11373_v13  ;;  %v6122_v8 = vsel %vm9982_vm11, %v6117_v41, %v11395_v61  ;;  %v6140_v40 = vor.u32 %v6139_v33, %v11412_v24  ;;  %v11447_v13 = vld [vmem:[%s10898_s12 + $0x50] sm:$0x1]  ;;  %v9231_v61 = vld [vmem:[#allocation9 + $0x1f8] sm:$0xff]   ;;  %v6199_v4 = vshll.u32 %v7636_v63, 16 }
 0x316   : >> { %8610 = vmatprep.subr.bf16.mxu0 %v9219_v57  ;;  %8483 = vmatpush3.bf16.msra.mxu1 %v9218_v59  ;;  %v9232_v59 = vld [vmem:[%s10898_s12 + $0xc] sm:$0xff]   ;;  %v7645_v6 = vcombine.low %v6088_v11, %v6098_v30  ;;  %v11456_v18 = vcombine.low %v6112_v23, %v6122_v8  ;;  %v6164_v54 = vor.u32 %v6163_v44, %v11444_v26  ;;  %v6191_v12 = vshll.u32 %v11447_v13, 16  ;;  %v7639_v41 = vld [vmem:[%s10898_s12 + $0x60] sm:$0xf] }
 0x317   : >> { %8484 = vmatprep.subr.bf16.mxu1 %v9221_v5  ;;  %v6141_v7 = vrot.slane %v6140_v40, 4  ;;  %v6220_v38 = vshrl.u32 %v7639_v41, 16  ;;  %v6223_v28 = vshll.u32 %v7639_v41, 16  ;;  %v6136_v33 = vsel %vm9982_vm11, %v6131_v43, %v11412_v24  ;;  %v11484_v24 = vld [vmem:[%s10898_s12 + $0x5c] sm:$0x1] }
 0x318   : >> { %v6193_v11 = vrot.slane %v6191_v12, 5  ;;  %v6201_v23 = vrot.slane %v6199_v4, 5  ;;  %v9240_v4 = vld [vmem:[%s10898_s12 + $0x3c] sm:$0xff]  }
 0x319   : >> { %8611 = vmatpush3.bf16.msra.mxu0 %v9219_v57  ;;  %8469 = vmatmul.mubr.bf16.gmra.mrb[8].mxu1 %v7470_v20  ;;  %v6181_v20 = vshll.u32 %v11417_v55, 16  ;;  %v6177_v57 = vrot.slane %v6175_v31, 5  ;;  %v9236_v31 = vld [vmem:[%s10898_s12 + $0x24] sm:$0xff]  }
 0x31a   : >> { %8612 = vmatprep.subr.bf16.mxu0 %v9223_v19  ;;  %8485 = vmatpush3.bf16.msra.mxu1 %v9221_v5 }
 0x31b   : >> { %8486 = vmatprep.subr.bf16.mxu1 %v9224_v25  ;;  %8472 = vmatprep.mubr.bf16.mxu1 %v7471_v9  ;;  %v9230_v9 = vld [vmem:[#allocation9 + $0xf8] sm:$0xff]   ;;  %v11449_v5 = vrot.slane %v6181_v20, 5  ;;  %v6178_v60 = vor.u32 %v6177_v57, %v6174_v52  ;;  %v11494_v57 = vld [vmem:[%s10898_s12 + $0x70] sm:$0xf] }
 0x31c   : >> { %8597 = vmatmul.mubr.bf16.gmra.mrb[8].mxu0 %v9222_v10  ;;  %v6154_v10 = vor.u32 %v6153_v22, %v6150_v62  ;;  %v6222_v62 = vrot.slane %v6220_v38, 4  ;;  %v6225_v22 = vrot.slane %v6223_v28, 5  ;;  %v7642_v52 = vld [vmem:[%s10898_s12 + $0x6c] sm:$0xf]  ;;  %v6253_v12 = vshll.u32 %v11494_v57, 16 }
 0x31d   : >> { %8613 = vmatpush3.bf16.msra.mxu0 %v9223_v19  ;;  %8600 = vmatprep.mubr.bf16.mxu0 %v9226_v51  ;;  %v6145_v19 = vrot.slane %v6143_v27, 5  ;;  %v6188_v51 = vor.u32 %v6187_v37, %v11449_v5  ;;  %v6179_v30 = vrot.slane %v6178_v60, 4 }
 0x31e   : >> { %8614 = vmatprep.subr.bf16.mxu0 %v9225_v47  ;;  %8487 = vmatpush3.bf16.msra.mxu1 %v9224_v25  ;;  %v6167_v25 = vshll.u32 %v11438_v3, 16  ;;  %v6155_v0 = vrot.slane %v6154_v10, 4  ;;  %v6244_v10 = vshrl.u32 %v7642_v52, 16 }
 0x31f   : >> { %8488 = vmatprep.subr.bf16.mxu1 %v9227_v46  ;;  %v6146_v20 = vsel %vm9982_vm11, %v6141_v7, %v6145_v19  ;;  %v6189_v27 = vrot.slane %v6188_v51, 4  ;;  %v9238_v19 = vld [vmem:[#allocation9 + $0x210] sm:$0xff]   ;;  %v6184_v43 = vsel %vm9982_vm11, %v6179_v30, %v11449_v5  ;;  %v9237_v7 = vld [vmem:[%s10898_s12 + $0x30] sm:$0xff]   ;;  %v6226_v5 = vor.u32 %v6225_v22, %v6222_v62  ;;  %v9243_v22 = vld [vmem:[#allocation9 + $0x228] sm:$0xff]  }
 0x320   : >> { %v6169_v29 = vrot.slane %v6167_v25, 5  ;;  %v7647_v8 = vcombine.low %v6136_v33, %v6146_v20  ;;  %v6160_v37 = vsel %vm9982_vm11, %v6155_v0, %v11444_v26  ;;  %v6246_v38 = vrot.slane %v6244_v10, 4  ;;  %v11522_v20 = vld [vmem:[%s10898_s12 + $0x74] sm:$0x1]  ;;  %v7666_v10 = vld [vmem:[%s10898_s12 + $0x54] sm:$0xe] }
 0x321   : >> { %8615 = vmatpush3.bf16.msra.mxu0 %v9225_v47  ;;  %8473 = vmatmul.mubr.bf16.gmra.mrb[12].mxu1 %v7472_v49  ;;  %v9233_v49 = vld [vmem:[%s10898_s12 + $0x18] sm:$0xff]   ;;  %v6196_v47 = vshrl.u32 %v7636_v63, 16  ;;  %v6215_v63 = vshll.u32 %v11484_v24, 16  ;;  %v6194_v25 = vsel %vm9982_vm11, %v6189_v27, %v6193_v11  ;;  %v11519_v33 = vrot.slane %v6253_v12, 5  ;;  %v9242_v0 = vld [vmem:[#allocation9 + $0x220] sm:$0xff]   ;;  %v9241_v11 = vld [vmem:[%s10898_s12 + $0x48] sm:$0xff]  }
 0x322   : >> { %8616 = vmatprep.subr.bf16.mxu0 %v9229_v50  ;;  %8489 = vmatpush3.bf16.msra.mxu1 %v9227_v46  ;;  %v11472_v46 = vld [vmem:[%s10898_s12 + $0x64] sm:$0xf]  ;;  %v6511_v62 = vrot.slane %v11348_v53, 5 }
 0x323   : >> { %8490 = vmatprep.subr.bf16.mxu1 %v9230_v9  ;;  %8492 = vmatprep.mubr.bf16.mxu1 %v9232_v59  ;;  %v6229_v1 = vshll.u32 %v11472_v46, 16  ;;  %v6233_v34 = vshrl.u32 %v11472_v46, 16  ;;  %v6198_v59 = vrot.slane %v6196_v47, 4  ;;  %v9239_v47 = vld [vmem:[#allocation9 + $0x218] sm:$0xff]  }
 0x324   : >> { %8601 = vmatmul.mubr.bf16.gmra.mrb[12].mxu0 %v9228_v2 }
 0x325   : >> { %8617 = vmatpush3.bf16.msra.mxu0 %v9229_v50  ;;  %8620 = vmatprep.mubr.bf16.mxu0 %v7645_v6  ;;  %v6165_v50 = vrot.slane %v6164_v54, 4  ;;  %v11488_v40 = vrot.slane %v6229_v1, 5  ;;  %v6235_v44 = vrot.slane %v6233_v34, 4  ;;  %v11503_v6 = vld [vmem:[%s10898_s12 + $0x68] sm:$0x1]  ;;  %v6247_v54 = vshll.u32 %v7642_v52, 16 }
 0x326   : >> { %8618 = vmatprep.subr.bf16.mxu0 %v9231_v61  ;;  %8491 = vmatpush3.bf16.msra.mxu1 %v9230_v9  ;;  %v6211_v9 = vrot.slane %v6209_v21, 4  ;;  %v6239_v60 = vshll.u32 %v11503_v6, 16  ;;  %v6217_v21 = vrot.slane %v6215_v63, 5  ;;  %v6227_v1 = vrot.slane %v6226_v5, 4  ;;  %v7667_v5 = vld [vmem:[%s10898_s12 + $0x60] sm:$0xe] }
 0x327   : >> { %8812 = vmatprep.subr.bf16.mxu1 %v11462_v17  ;;  %v6170_v2 = vsel %vm9982_vm11, %v6165_v50, %v6169_v29  ;;  %v6249_v28 = vrot.slane %v6247_v54, 5  ;;  %v6539_v50 = vrot.slane %v11417_v55, 5  ;;  %v6553_v54 = vrot.slane %v11472_v46, 5 }
 0x328   : >> { %v6212_v26 = vor.u32 %v6211_v9, %v11486_v45  ;;  %v7648_v51 = vcombine.low %v6160_v37, %v6170_v2  ;;  %v7665_v9 = vld [vmem:[%s10898_s12 + $0x48] sm:$0xe]  ;;  %v6232_v55 = vsel %vm9982_vm11, %v6227_v1, %v11488_v40 }
 0x329   : >> { %8619 = vmatpush3.bf16.msra.mxu0 %v9231_v61  ;;  %8493 = vmatmul.mubr.bf16.vlgmr.msra.gmra.mrb[0].mxu1 %v9233_v49  ;;  %v6202_v61 = vor.u32 %v6201_v23, %v6198_v59  ;;  %v6236_v49 = vor.u32 %v6235_v44, %v11488_v40  ;;  %v6250_v27 = vor.u32 %v6249_v28, %v6246_v38  ;;  %v6263_v23 = vshll.u32 %v11522_v20, 16  ;;  %v7661_v44 = vld [vmem:[%s10898_s12 + $0x18] sm:$0xe] }
 0x32a   : >> { %8636 = vmatprep.subr.bf16.mxu0 %v11462_v17  ;;  %8820 = vmatpush3.bf16.msra.mxu1 %v11462_v17  ;;  %v6213_v48 = vrot.slane %v6212_v26, 4  ;;  %v7673_v37 = vrot.slane %v7665_v9, 9  ;;  %v6541_v2 = vrot.slane %v6539_v50, 4  ;;  %v7669_v53 = vrot.slane %v7661_v44, 9 }
 0x32b   : >> { %8813 = vmatprep.subr.bf16.mxu1 %v9235_v35  ;;  %8496 = vmatprep.mubr.bf16.mxu1 %v9236_v31  ;;  %v6203_v41 = vrot.slane %v6202_v61, 4  ;;  %v6237_v34 = vrot.slane %v6236_v49, 4  ;;  %v6241_v31 = vrot.slane %v6239_v60, 5  ;;  %v6546_v61 = vrot.slane %v11460_v15, 5  ;;  %v9245_v49 = vld [vmem:[%s10898_s12 + $0x60] sm:$0xff]  }
 0x32c   : >> { %8621 = vmatmul.mubr.bf16.vlgmr.msra.gmra.mrb[0].mxu0 %v11456_v18  ;;  %v6257_v18 = vshrl.u32 %v11494_v57, 16  ;;  %v6218_v30 = vsel %vm9982_vm11, %v6213_v48, %v6217_v21  ;;  %v6513_v26 = vrot.slane %v6511_v62, 4  ;;  %v6540_v12 = vsel %vm10222_vm14, %v7673_v37, %v6539_v50  ;;  %v9247_v48 = vld [vmem:[#allocation9 + $0x238] sm:$0xff]  }
 0x32d   : >> { %8637 = vmatpush3.bf16.msra.mxu0 %v11462_v17  ;;  %8624 = vmatprep.mubr.bf16.mxu0 %v7647_v8  ;;  %v7649_v17 = vcombine.low %v6184_v43, %v6194_v25  ;;  %v9244_v8 = vld [vmem:[%s10898_s12 + $0x54] sm:$0xff]   ;;  %v6251_v43 = vrot.slane %v6250_v27, 4  ;;  %v6265_v25 = vrot.slane %v6263_v23, 5  ;;  %v7675_v38 = vrot.slane %v7667_v5, 9 }
 0x32e   : >> { %8638 = vmatprep.subr.bf16.mxu0 %v9235_v35  ;;  %8821 = vmatpush3.bf16.msra.mxu1 %v9235_v35  ;;  %v6259_v29 = vrot.slane %v6257_v18, 4  ;;  %v6518_v18 = vrot.slane %v11362_v36, 5  ;;  %v6512_v36 = vsel %vm10222_vm14, %v7669_v53, %v6511_v62  ;;  %v6555_v28 = vrot.slane %v6553_v54, 4 }
 0x32f   : >> { %8814 = vmatprep.subr.bf16.mxu1 %v9238_v19  ;;  %v6256_v46 = vsel %vm9982_vm11, %v6251_v43, %v11519_v33  ;;  %v6528_v50 = vrot.slane %v11403_v56, 5  ;;  %v7668_v56 = vld [vmem:[%s10898_s12 + $0x6c] sm:$0xe]  ;;  %v6535_v43 = vrot.slane %v11438_v3, 5 }
 0x330   : >> { %v6260_v59 = vor.u32 %v6259_v29, %v11519_v33  ;;  %v6556_v33 = vrot.slane %v11503_v6, 5  ;;  %v6520_v1 = vrot.slane %v6518_v18, 4 }
 0x331   : >> { %8639 = vmatpush3.bf16.msra.mxu0 %v9235_v35  ;;  %8497 = vmatmul.mubr.bf16.gmra.mrb[4].mxu1 %v9237_v7  ;;  %v6208_v35 = vsel %vm9982_vm11, %v6203_v41, %v11486_v45  ;;  %v6242_v45 = vsel %vm9982_vm11, %v6237_v34, %v6241_v31  ;;  %v6514_v7 = vrot.slane %v11358_v42, 5  ;;  %v6549_v42 = vrot.slane %v11484_v24, 5  ;;  %v7663_v41 = vld [vmem:[%s10898_s12 + $0x30] sm:$0xe] }
 0x332   : >> { %8640 = vmatprep.subr.bf16.mxu0 %v9238_v19  ;;  %8822 = vmatpush3.bf16.msra.mxu1 %v9238_v19  ;;  %v7650_v52 = vcombine.low %v6208_v35, %v6218_v30  ;;  %v7651_v63 = vcombine.low %v6232_v55, %v6242_v45  ;;  %v6261_v40 = vrot.slane %v6260_v59, 4  ;;  %v6521_v34 = vrot.slane %v11369_v16, 5 }
 0x333   : >> { %8815 = vmatprep.subr.bf16.mxu1 %v9239_v47  ;;  %8500 = vmatprep.mubr.bf16.mxu1 %v9240_v4  ;;  %v6548_v4 = vrot.slane %v6546_v61, 4  ;;  %v6515_v24 = vsel %vm10222_vm14, %v6513_v26, %v6514_v7  ;;  %v6560_v30 = vrot.slane %v11494_v57, 5  ;;  %v6554_v16 = vsel %vm10222_vm14, %v7675_v38, %v6553_v54 }
 0x334   : >> { %8625 = vmatmul.mubr.bf16.gmra.mrb[4].mxu0 %v7648_v51  ;;  %v6266_v60 = vsel %vm9982_vm11, %v6261_v40, %v6265_v25  ;;  %v7662_v51 = vld [vmem:[%s10898_s12 + $0x24] sm:$0xe]  ;;  %v7677_v31 = vcombine.low %v6512_v36, %v6515_v24  ;;  %v6557_v27 = vsel %vm10222_vm14, %v6555_v28, %v6556_v33  ;;  %v6522_v23 = vsel %vm10222_vm14, %v6520_v1, %v6521_v34 }
 0x335   : >> { %8641 = vmatpush3.bf16.msra.mxu0 %v9238_v19  ;;  %8628 = vmatprep.mubr.bf16.mxu0 %v7649_v17  ;;  %v6542_v19 = vrot.slane %v11447_v13, 5  ;;  %v9246_v13 = vld [vmem:[#allocation9 + $0x230] sm:$0xff]   ;;  %v7674_v17 = vrot.slane %v7666_v10, 9  ;;  %v7652_v29 = vcombine.low %v6256_v46, %v6266_v60  ;;  %v6532_v45 = vrot.slane %v11406_v32, 5 }
 0x336   : >> { %8642 = vmatprep.subr.bf16.mxu0 %v9239_v47  ;;  %8823 = vmatpush3.bf16.msra.mxu1 %v9239_v47  ;;  %v7683_v62 = vcombine.low %v6554_v16, %v6557_v27  ;;  %v6562_v44 = vrot.slane %v6560_v30, 4 }
 0x337   : >> { %8816 = vmatprep.subr.bf16.mxu1 %v9242_v0  ;;  %v6543_v15 = vsel %vm10222_vm14, %v6541_v2, %v6542_v19  ;;  %v6547_v6 = vsel %vm10222_vm14, %v7674_v17, %v6546_v61 }
 0x338   : >> { %v7681_v21 = vcombine.low %v6540_v12, %v6543_v15 }
 0x339   : >> { %8643 = vmatpush3.bf16.msra.mxu0 %v9239_v47  ;;  %8501 = vmatmul.mubr.bf16.gmra.mrb[8].mxu1 %v9241_v11  ;;  %v6525_v47 = vrot.slane %v11383_v14, 5  ;;  %v7670_v14 = vrot.slane %v7662_v51, 9  ;;  %v6550_v11 = vsel %vm10222_vm14, %v6548_v4, %v6549_v42 }
 0x33a   : >> { %8644 = vmatprep.subr.bf16.mxu0 %v9242_v0  ;;  %8824 = vmatpush3.bf16.msra.mxu1 %v9242_v0  ;;  %v7682_v57 = vcombine.low %v6547_v6, %v6550_v11  ;;  %v7693_v6 = vld [vmem:[%s11685_s4] ss:$0 sm:$0xff] }
 0x33b   : >> { %8817 = vmatprep.subr.bf16.mxu1 %v9243_v22  ;;  %8504 = vmatprep.mubr.bf16.mxu1 %v9244_v8  ;;  %v6527_v35 = vrot.slane %v6525_v47, 4  ;;  %v6519_v59 = vsel %vm10222_vm14, %v7670_v14, %v6518_v18  ;;  %v7676_v8 = vrot.slane %v7668_v56, 9 }
 0x33c   : >> { %8629 = vmatmul.mubr.bf16.gmra.mrb[8].mxu0 %v7650_v52  ;;  %v6563_v52 = vrot.slane %v11522_v20, 5  ;;  %v7678_v37 = vcombine.low %v6519_v59, %v6522_v23 }
 0x33d   : >> { %8645 = vmatpush3.bf16.msra.mxu0 %v9242_v0  ;;  %8632 = vmatprep.mubr.bf16.mxu0 %v7651_v63  ;;  %v7671_v0 = vrot.slane %v7663_v41, 9  ;;  %v6529_v55 = vsel %vm10222_vm14, %v6527_v35, %v6528_v50  ;;  %v6534_v63 = vrot.slane %v6532_v45, 4  ;;  %v6561_v32 = vsel %vm10222_vm14, %v7676_v8, %v6560_v30 }
 0x33e   : >> { %8646 = vmatprep.subr.bf16.mxu0 %v9243_v22  ;;  %8825 = vmatpush3.bf16.msra.mxu1 %v9243_v22  ;;  %v6564_v40 = vsel %vm10222_vm14, %v6562_v44, %v6563_v52 }
 0x33f   : >> { %8818 = vmatprep.subr.bf16.mxu1 %v9246_v13  ;;  %v6526_v9 = vsel %vm10222_vm14, %v7671_v0, %v6525_v47  ;;  %v6536_v25 = vsel %vm10222_vm14, %v6534_v63, %v6535_v43  ;;  %v7684_v61 = vcombine.low %v6561_v32, %v6564_v40 }
 0x340   : >> { %v7679_v2 = vcombine.low %v6526_v9, %v6529_v55 }
 0x341   : >> { %8647 = vmatpush3.bf16.msra.mxu0 %v9243_v22  ;;  %8505 = vmatmul.mubr.bf16.gmra.mrb[12].mxu1 %v9245_v49  ;;  %v7664_v22 = vld [vmem:[%s10898_s12 + $0x3c] sm:$0xe] }
 0x342   : >> { %8648 = vmatprep.subr.bf16.mxu0 %v9246_v13  ;;  %8826 = vmatpush3.bf16.msra.mxu1 %v9246_v13  ;;  %v7672_v19 = vrot.slane %v7664_v22, 9 }
 0x343   : >> { %8819 = vmatprep.subr.bf16.mxu1 %v9247_v48  ;;  %8660 = vmatprep.mubr.bf16.mxu1 %v7681_v21 }
 0x344   : >> { %8633 = vmatmul.mubr.bf16.gmra.mrb[12].mxu0 %v7652_v29  ;;  %v6533_v20 = vsel %vm10222_vm14, %v7672_v19, %v6532_v45 }
 0x345   : >> { %8649 = vmatpush3.bf16.msra.mxu0 %v9246_v13  ;;  %8652 = vmatprep.mubr.bf16.mxu0 %v7677_v31  ;;  %v7680_v53 = vcombine.low %v6533_v20, %v6536_v25 }
 0x346   : >> { %8650 = vmatprep.subr.bf16.mxu0 %v9247_v48  ;;  %8827 = vmatpush3.bf16.msra.mxu1 %v9247_v48 }
 0x349   : >> { %8651 = vmatpush3.bf16.msra.mxu0 %v9247_v48  ;;  %8661 = vmatmul.mubr.bf16.vlgmr.msra.gmra.mrb[16].mxu1 %v7682_v57 }
 0x34a   : >> { %8664 = vmatprep.mubr.bf16.mxu1 %v7683_v62 }
 0x34c   : >> { %8653 = vmatmul.mubr.bf16.vlgmr.msra.gmra.mrb[0].mxu0 %v7678_v37 }
 0x34d   : >> { %8656 = vmatprep.mubr.bf16.mxu0 %v7679_v2 }
 0x351   : >> { %8665 = vmatmul.mubr.bf16.gmra.mrb[20].mxu1 %v7684_v61 }
 0x354   : >> { %8657 = vmatmul.mubr.bf16.gmra.mrb[4].mxu0 %v7680_v53 }
 0x3fc   : >> { %v8494_v3 = vpop.f32.mrb[0].mxu1 }
 0x3fd   : >> { %v5002_v26 = vpop.f32.mrb[1].mxu1 }
 0x3fe   : >> { %v8495_v7 = vpop.f32.mrb[2].mxu1 }
 0x3ff   : >> { %v5005_v13 = vpop.f32.mrb[3].mxu1 }
 0x404   : >> { %v11600_v10 = vpop.f32.mrb[4].mxu1 }
 0x405   : >> { %v11602_v54 = vpop.f32.mrb[5].mxu1 }
 0x406   : >> { %v11604_v12 = vpop.f32.mrb[6].mxu1 }
 0x407   : >> { %v11606_v15 = vpop.f32.mrb[7].mxu1 }
 0x40c   : >> { %v8502_v18 = vpop.f32.mrb[8].mxu1 }
 0x40d   : >> { %v5034_v5 = vpop.f32.mrb[9].mxu1 }
 0x40e   : >> { %v8503_v42 = vpop.f32.mrb[10].mxu1 }
 0x40f   : >> { %v8630_v49 = vpop.f32.mrb[8].mxu0  ;;  %v5037_v46 = vpop.f32.mrb[11].mxu1 }
 0x410   : >> { %v8836_v60 = vadd.f32 %v8630_v49, %v8502_v18  ;;  %v6430_v51 = vpop.f32.mrb[9].mxu0 }
 0x411   : >> { %v8838_v47 = vadd.f32 %v6430_v51, %v5034_v5  ;;  %v8631_v4 = vpop.f32.mrb[10].mxu0 }
 0x412   : >> { %v8840_v36 = vadd.f32 %v8631_v4, %v8503_v42  ;;  %v6433_v24 = vpop.f32.mrb[11].mxu0 }
 0x413   : >> { %v8842_v17 = vadd.f32 %v6433_v24, %v5037_v46 }
 0x414   : >> { %v8506_v41 = vpop.f32.mrb[12].mxu1 }
 0x415   : >> { %v5050_v48 = vpop.f32.mrb[13].mxu1 }
 0x416   : >> { %v8507_v21 = vpop.f32.mrb[14].mxu1 }
 0x417   : >> { %v8634_v38 = vpop.f32.mrb[12].mxu0  ;;  %v5053_v28 = vpop.f32.mrb[15].mxu1 }
 0x418   : >> { %v8844_v33 = vadd.f32 %v8634_v38, %v8506_v41  ;;  %v6446_v29 = vpop.f32.mrb[13].mxu0 }
 0x419   : >> { %v8846_v14 = vadd.f32 %v6446_v29, %v5050_v48  ;;  %v8635_v1 = vpop.f32.mrb[14].mxu0 }
 0x41a   : >> { %v8848_v34 = vadd.f32 %v8635_v1, %v8507_v21  ;;  %v6449_v31 = vpop.f32.mrb[15].mxu0 }
 0x41b   : >> { %v8850_v0 = vadd.f32 %v6449_v31, %v5053_v28 }
 0x41c   : >> { %v8662_v35 = vpop.f32.mrb[16].mxu1 }
 0x41d   : >> { %v8837_v50 = vadd.f32 %v8836_v60, %v8662_v35  ;;  %v6728_v11 = vpop.f32.mrb[17].mxu1 }
 0x41e   : >> { %v8839_v30 = vadd.f32 %v8838_v47, %v6728_v11  ;;  %v8663_v16 = vpop.f32.mrb[18].mxu1 }
 0x41f   : >> { %v8654_v27 = vpop.f32.mrb[0].mxu0  ;;  %v8841_v56 = vadd.f32 %v8840_v36, %v8663_v16  ;;  %v6731_v59 = vpop.f32.mrb[19].mxu1  ;;  %v6792_v55 = vadd.f32 %v8837_v50, %v7693_v6 }
 0x420   : >> { %v8828_v23 = vadd.f32 %v8654_v27, %v8494_v3  ;;  %v6696_v57 = vpop.f32.mrb[1].mxu0  ;;  %v8843_v9 = vadd.f32 %v8842_v17, %v6731_v59  ;;  %v6790_v8 = vadd.f32 %v8839_v30, %v7693_v6 }
 0x421   : >> { %v8829_v45 = vadd.f32 %v6696_v57, %v5002_v26  ;;  %v8655_v62 = vpop.f32.mrb[2].mxu0  ;;  %v6793_v22 = vadd.f32 %v8841_v56, %v7693_v6 }
 0x422   : >> { %v8830_v44 = vadd.f32 %v8655_v62, %v8495_v7  ;;  %v6699_v52 = vpop.f32.mrb[3].mxu0  ;;  %v6791_v37 = vadd.f32 %v8843_v9, %v7693_v6  ;;  %v6784_v63 = vadd.f32 %v8828_v23, %v7693_v6 }
 0x423   : >> { %v7785_v2 = vpack.c.bf16 %v6793_v22, %v6792_v55  ;;  %v8831_v19 = vadd.f32 %v6699_v52, %v5005_v13  ;;  %v6782_v20 = vadd.f32 %v8829_v45, %v7693_v6 }
 0x424   : >> { %v6785_v43 = vadd.f32 %v8830_v44, %v7693_v6  ;;  %v7780_v32 = vpack.c.bf16 %v6791_v37, %v6790_v8  ;;  %v8666_v40 = vpop.f32.mrb[20].mxu1 }
 0x425   : >> { %7801 = vst [vmem:[%s11613_s10 + $0x28] sm:$0xff] %v7785_v2   ;;  %v6783_v25 = vadd.f32 %v8831_v19, %v7693_v6  ;;  %v8845_v61 = vadd.f32 %v8844_v33, %v8666_v40  ;;  %v6744_v53 = vpop.f32.mrb[21].mxu1 }
 0x426   : >> { %v7765_v3 = vpack.c.bf16 %v6785_v43, %v6784_v63  ;;  %7800 = vst [vmem:[%s11613_s10 + $0x20] sm:$0xff] %v7780_v32   ;;  %v8847_v26 = vadd.f32 %v8846_v14, %v6744_v53  ;;  %v8667_v7 = vpop.f32.mrb[22].mxu1 }
 0x427   : >> { %v7760_v18 = vpack.c.bf16 %v6783_v25, %v6782_v20  ;;  %v8658_v5 = vpop.f32.mrb[4].mxu0  ;;  %v8849_v42 = vadd.f32 %v8848_v34, %v8667_v7  ;;  %v6747_v49 = vpop.f32.mrb[23].mxu1  ;;  %v6796_v51 = vadd.f32 %v8845_v61, %v7693_v6 }
 0x428   : >> { %7797 = vst [vmem:[%s11613_s10 + $0x8] sm:$0xff] %v7765_v3   ;;  %v8832_v13 = vadd.f32 %v8658_v5, %v11600_v10  ;;  %v6712_v46 = vpop.f32.mrb[5].mxu0  ;;  %v8851_v60 = vadd.f32 %v8850_v0, %v6747_v49  ;;  %v6794_v24 = vadd.f32 %v8847_v26, %v7693_v6 }
 0x429   : >> { %7761 = vst [vmem:[%s11613_s10] sm:$0xff] %v7760_v18   ;;  %v8833_v47 = vadd.f32 %v6712_v46, %v11602_v54  ;;  %v8659_v4 = vpop.f32.mrb[6].mxu0  ;;  %v6797_v36 = vadd.f32 %v8849_v42, %v7693_v6 }
 0x42a   : >> { %v8834_v17 = vadd.f32 %v8659_v4, %v11604_v12  ;;  %v6715_v41 = vpop.f32.mrb[7].mxu0  ;;  %v6795_v48 = vadd.f32 %v8851_v60, %v7693_v6  ;;  %v6788_v38 = vadd.f32 %v8832_v13, %v7693_v6 }
 0x42b   : >> { %v7795_v21 = vpack.c.bf16 %v6797_v36, %v6796_v51  ;;  %v8835_v10 = vadd.f32 %v6715_v41, %v11606_v15  ;;  %v6786_v29 = vadd.f32 %v8833_v47, %v7693_v6  ;;  %3914 = sbr.rel (!%p3912_p2) target bundleno = 654 (0x28e), region = 166 }
 0x42c   : >> { %v6789_v28 = vadd.f32 %v8834_v17, %v7693_v6  ;;  %v7790_v33 = vpack.c.bf16 %v6795_v48, %v6794_v24 }
 0x42d   : >> { %7803 = vst [vmem:[%s11613_s10 + $0x38] sm:$0xff] %v7795_v21   ;;  %v6787_v14 = vadd.f32 %v8835_v10, %v7693_v6 }
 0x42e   : >> { %v7775_v54 = vpack.c.bf16 %v6789_v28, %v6788_v38  ;;  %7802 = vst [vmem:[%s11613_s10 + $0x30] sm:$0xff] %v7790_v33  }
 0x42f   : >> { %v7770_v1 = vpack.c.bf16 %v6787_v14, %v6786_v29 }
 0x430   : >> { %7799 = vst [vmem:[%s11613_s10 + $0x18] sm:$0xff] %v7775_v54  }
 0x431   : >> { %7798 = vst [vmem:[%s11613_s10 + $0x10] sm:$0xff] %v7770_v1  }
 0x432   : > { %9351 = shalt.err (!%p9348_p10)
}
 0x433   : > { %s9352_s24 = scalar_lea.hbm %s11634_s30, 2048  ;;  %s9356_s15 = scalar_lea.hbm %s11686_s5, 4096 }
 0x434   : > { %p9353_p4 = scmp.ne.s32.totalorder %s11634_s30, %s9352_s24  ;;  %p9357_p11 = scmp.lt.u32.totalorder %s11634_s30, %s11686_s5 }
 0x435   : > { %p9358_p0 = scmp.lt.u32.totalorder %s9356_s15, %s9352_s24  ;;  %p9360_p3 = scmp.lt.u32.totalorder %s9352_s24, %s11634_s30 }
 0x436   : > { %p9354_p5 = pnand %p9353_p4, %p11752_p7 }
 0x437   : > { %p9359_p2 = por %p9358_p0, %p9357_p11 }
 0x438   : > { %p9355_p8 = pneg %p9354_p5 }
 0x439   : > { %p9361_p9 = por %p9360_p3, %p9359_p2 }
 0x43b   : > { %p9362_p12 = pnand %p9361_p9, %p9355_p8 }
 0x43d   : > { %9365 = shalt.err (!%p9362_p12)
}
 0x43e   : > { %s9441_s28 = smov 64   ;;  %s9442_s13 = smov 4  }
 0x43f   : > { %8966 = dma.vmem_to_hbm [thread:$0]  (%p11752_p7), %s11637_s11, 2048, %s11634_s30, %s6882_s17, %s9441_s28, %s9441_s28, %s9442_s13  }
 0x440 PF: > { %s6910_s9 = sand.u32 1, %s9408_s18   ;;  %p11753_p1 = scmp.ne.s32.totalorder %s11704_s25, 0 }
 0x441   : > { %p11754_p13 = scmp.ge.s32.totalorder %s9420_s21, 2  ;;  %s6911_s7 = scalar_lea.sflag [#allocation6], %s6910_s9 }
 0x443   : > { %p8980_p6 = pnand %p11754_p13, %p11753_p1 }
 0x445   : > { %9403 = dma.done.wait (!%p8980_p6), %s6911_s7, 2048  }
 0x446   : > { %9405 = vsyncadd (!%p8980_p6), %s6911_s7, 4294965248  ;;  %p19_p10 = scmp.ge.s32.totalorder %s9589_s29, 4   ;;  %s11755_s18 = smov %s9412_s19 }
 0x447   : > { %s11756_s19 = smov %s9416_s20  ;;  %s11757_s20 = smov %s9605_s27 }
 0x448   : > { %s11758_s21 = smov %s9589_s29  ;;  %21 = sbr.rel (!%p19_p10) target bundleno = 6 (0x6), region = 177 }
 0x44f   :  { %6916 = vsyncpa [#allocation5], 1 }
 0x450   :  { %6918 = vsyncpa [#allocation5 + $0x1], 1 }
 0x451   :  { %6919 = vsyncpa [#allocation8], 1 }
 0x452   :  { %6920 = vsyncpa [#allocation6], 1 }
 0x453   :  { %6922 = vsyncpa [#allocation6 + $0x1], 1 }

</bundles_post_ra>
